<compile_context>
chip_gen: v7x
topology: tpu7x:2x2x1
jax: 0.10.0
libtpu: 0.0.40
codegen_flags: <defaults>
</compile_context>

<pallas_src>
import jax
import jax.numpy as jnp
from jax.experimental import pallas as pl
from jax.experimental.pallas import tpu as pltpu


# ------------------------- fused GRU-stack + FC kernel -----------------------
def make_gru_kernel(n_layers, T, B):
    """B here is the sublane-padded batch (multiple of 8)."""

    def kernel(*refs):
        i = 0
        gx0_ref = refs[i]; i += 1                       # (T*B, 3H) x-gates, layer 0
        rec = []                                        # (w_hh, b_h) per layer
        for _ in range(n_layers):
            rec.append((refs[i], refs[i + 1])); i += 2
        inp = [None]                                    # (w_ih, b_i) per layer >= 1
        for _ in range(1, n_layers):
            inp.append((refs[i], refs[i + 1])); i += 2
        fc_w_ref, fc_b_ref, out_ref, gx_ref, seq_ref = refs[i:]

        def run_layer(gxsrc_ref, w_hh_ref, b_h_ref, write_seq):
            w_hh = w_hh_ref[...]                        # (H, 3H), resident in vregs
            H = w_hh.shape[0]
            # Hoist the bias broadcast out of the time loop.
            b_h = jnp.broadcast_to(b_h_ref[...], (B, 3 * H))

            def step(t, h):
                row = pl.multiple_of(t * B, 8)          # 8-aligned sublane start
                g_x = gxsrc_ref[pl.ds(row, B), :]       # (B, 3H)
                g_h = jnp.dot(h, w_hh,
                              preferred_element_type=jnp.float32) + b_h
                r = jax.nn.sigmoid(g_x[:, :H] + g_h[:, :H])
                z = jax.nn.sigmoid(g_x[:, H:2 * H] + g_h[:, H:2 * H])
                n = jnp.tanh(g_x[:, 2 * H:] + r * g_h[:, 2 * H:])
                h_new = (1.0 - z) * n + z * h           # PyTorch GRU update
                if write_seq:
                    seq_ref[pl.ds(row, B), :] = h_new
                return h_new

            return jax.lax.fori_loop(
                0, T, step, jnp.zeros((B, w_hh.shape[0]), jnp.float32),
                unroll=True)

        # Layer 0: x-gates were hoisted out of the recurrence (kernel input).
        h = run_layer(gx0_ref, rec[0][0], rec[0][1],
                      write_seq=(n_layers > 1))

        # Layers >= 1: one big hoisted input-projection matmul, then recurrence.
        for l in range(1, n_layers):
            gx_ref[...] = (jnp.dot(seq_ref[...], inp[l][0][...],
                                   preferred_element_type=jnp.float32)
                           + inp[l][1][...])
            h = run_layer(gx_ref, rec[l][0], rec[l][1],
                          write_seq=(l < n_layers - 1))

        # Fused final FC on the last hidden state (== fc(out[:, -1, :])).
        out_ref[...] = (jnp.dot(h, fc_w_ref[...],
                                preferred_element_type=jnp.float32)
                        + fc_b_ref[...]).astype(out_ref.dtype)

    return kernel


# --------------------------------- wrapper -----------------------------------
def gru_model_forward(x_btd, params):
    """x_btd: (B, T, input_dim), batch_first like the PyTorch module."""
    layers = params["layers"]
    n_layers = len(layers)
    B, T, _ = x_btd.shape
    H = layers[0]["w_hh"].shape[0]
    O = params["fc_w"].shape[1]
    B_pad = max(8, ((B + 7) // 8) * 8)   # sublane-aligned batch

    xf = x_btd.astype(jnp.float32)
    # Hoisted layer-0 input projection with the (B,T,D)->(T,B,D) transpose
    # folded into the matmul output layout, then batch padded to B_pad and
    # flattened to (T*B_pad, 3H) so in-kernel row slices are 8-aligned.
    gx0 = jnp.einsum("btd,dh->tbh", xf, layers[0]["w_ih"]) + layers[0]["b_i"]
    gx0 = jnp.pad(gx0, ((0, 0), (0, B_pad - B), (0, 0)))
    gx0 = gx0.reshape(T * B_pad, 3 * H)

    inputs = [gx0]
    for lp in layers:
        inputs += [lp["w_hh"], lp["b_h"]]
    for lp in layers[1:]:
        inputs += [lp["w_ih"], lp["b_i"]]
    inputs += [params["fc_w"], params["fc_b"]]

    out_pad = pl.pallas_call(
        make_gru_kernel(n_layers, T, B_pad),
        out_shape=jax.ShapeDtypeStruct((B_pad, O), jnp.float32),
        scratch_shapes=[
            pltpu.VMEM((T * B_pad, 3 * H), jnp.float32),  # x-gates, layers >= 1
            pltpu.VMEM((T * B_pad, H), jnp.float32),      # previous layer's seq
        ],
    )(*inputs)
    return out_pad[:B]


# ------------------------- pure-JAX reference (check) -------------------------
def gru_model_reference(x_btd, params):
    layers = params["layers"]
    xf = x_btd.astype(jnp.float32)
    seq = jnp.transpose(xf, (1, 0, 2))                  # (T, B, D)
    B = seq.shape[1]
    for lp in layers:
        H = lp["w_hh"].shape[0]
        gx = jnp.einsum("tbd,dh->tbh", seq, lp["w_ih"]) + lp["b_i"]

        def step(h, gx_t, lp=lp, H=H):
            gh = h @ lp["w_hh"] + lp["b_h"]
            r = jax.nn.sigmoid(gx_t[:, :H] + gh[:, :H])
            z = jax.nn.sigmoid(gx_t[:, H:2 * H] + gh[:, H:2 * H])
            n = jnp.tanh(gx_t[:, 2 * H:] + r * gh[:, 2 * H:])
            h_new = (1.0 - z) * n + z * h
            return h_new, h_new

        _, seq = jax.lax.scan(step, jnp.zeros((B, H), jnp.float32), gx)
    return seq[-1] @ params["fc_w"] + params["fc_b"]


# ------------------------------- parameters ----------------------------------
def init_params(key, input_dim, hidden_dim, layer_dim, output_dim):
    H = hidden_dim
    k = 1.0 / float(H) ** 0.5

    def u(kk, shape):
        return jax.random.uniform(kk, shape, jnp.float32, -k, k)

    params = {"layers": []}
    for layer in range(layer_dim):
        d_in = input_dim if layer == 0 else hidden_dim
        key, k_wi, k_wh, k_bi, k_bh = jax.random.split(key, 5)
        # PyTorch gate order (r, z, n), stored pre-transposed & gate-fused.
        params["layers"].append(dict(
            w_ih=u(k_wi, (d_in, 3 * H)),   # == W_ih^T, columns [r | z | n]
            w_hh=u(k_wh, (H, 3 * H)),      # == W_hh^T, columns [r | z | n]
            b_i=u(k_bi, (1, 3 * H)),       # [b_ir | b_iz | b_in]
            b_h=u(k_bh, (1, 3 * H)),       # [b_hr | b_hz | b_hn]
        ))
    key, k1, k2 = jax.random.split(key, 3)
    params["fc_w"] = u(k1, (H, output_dim))
    params["fc_b"] = u(k2, (1, output_dim))
    return params


# ----------------------------------- main -------------------------------------
if __name__ == "__main__":
    jax.config.update("jax_default_matmul_precision", "highest")

    B, T = 2, 8
    input_dim, hidden_dim, layer_dim, output_dim = 16, 32, 2, 4

    key = jax.random.PRNGKey(0)
    kx, kp = jax.random.split(key)
    x = jax.random.normal(kx, (B, T, input_dim), jnp.float32)
    params = init_params(kp, input_dim, hidden_dim, layer_dim, output_dim)

    out = jax.jit(gru_model_forward)(x, params)
    jax.block_until_ready(out)
    assert out.shape == (B, output_dim), out.shape

    ref = gru_model_reference(x, params)
    max_diff = float(jnp.max(jnp.abs(out - ref)))
    assert max_diff < 1e-2, f"kernel/reference mismatch, max_diff={max_diff}"

    print("KERNEL_OK")
</pallas_src>

<mosaic_0001>
module attributes {stable_mosaic.version = 11 : i64} {
  func.func @kernel(%arg0: memref<64x96xf32, #tpu.memory_space<vmem>>, %arg1: memref<32x96xf32, #tpu.memory_space<vmem>>, %arg2: memref<1x96xf32, #tpu.memory_space<vmem>>, %arg3: memref<32x96xf32, #tpu.memory_space<vmem>>, %arg4: memref<1x96xf32, #tpu.memory_space<vmem>>, %arg5: memref<32x96xf32, #tpu.memory_space<vmem>>, %arg6: memref<1x96xf32, #tpu.memory_space<vmem>>, %arg7: memref<32x4xf32, #tpu.memory_space<vmem>>, %arg8: memref<1x4xf32, #tpu.memory_space<vmem>>, %arg9: memref<8x4xf32, #tpu.memory_space<vmem>>, %arg10: memref<64x96xf32, #tpu.memory_space<vmem>>, %arg11: memref<64x32xf32, #tpu.memory_space<vmem>>) attributes {dimension_semantics = [], scalar_prefetch = 0 : i64, scratch_operands = 2 : i64, tpu.core_type = #tpu.core_type<tc>} {
    %c0 = arith.constant 0 : index
    %c0_0 = arith.constant 0 : index
    %0 = vector.load %arg1[%c0, %c0_0] : memref<32x96xf32, #tpu.memory_space<vmem>>, vector<32x96xf32>
    %c0_1 = arith.constant 0 : index
    %c0_2 = arith.constant 0 : index
    %1 = vector.load %arg2[%c0_1, %c0_2] : memref<1x96xf32, #tpu.memory_space<vmem>>, vector<1x96xf32>
    %2 = vector.shape_cast %1 : vector<1x96xf32> to vector<1x96xf32>
    %3 = vector.broadcast %2 : vector<1x96xf32> to vector<8x96xf32>
    %cst = arith.constant 0.000000e+00 : f32
    %4 = vector.broadcast %cst : f32 to vector<8x32xf32>
    %c0_i32 = arith.constant 0 : i32
    %c8_i32 = arith.constant 8 : i32
    %5 = arith.muli %c0_i32, %c8_i32 : i32
    %6 = tpu.assume_multiple %5, 8 : i32
    %7 = arith.index_cast %6 : i32 to index
    %c0_3 = arith.constant 0 : index
    %8 = vector.load %arg0[%7, %c0_3] : memref<64x96xf32, #tpu.memory_space<vmem>>, vector<8x96xf32>
    %cst_4 = arith.constant dense<0.000000e+00> : vector<8x96xf32>
    %9 = tpu.matmul %4, %0, %cst_4 {dimension_numbers = #tpu.dot_dimension_numbers<[1], [0], [0], [1], [0, 0, 1, 1], [], []>, precision = #tpu.contract_precision<fp32>} : vector<8x32xf32>, vector<32x96xf32>, vector<8x96xf32> -> vector<8x96xf32>
    %10 = arith.addf %9, %3 : vector<8x96xf32>
    %11 = vector.extract_strided_slice %8 {offsets = [0, 0], sizes = [8, 32], strides = [1, 1]} : vector<8x96xf32> to vector<8x32xf32>
    %12 = vector.extract_strided_slice %10 {offsets = [0, 0], sizes = [8, 32], strides = [1, 1]} : vector<8x96xf32> to vector<8x32xf32>
    %13 = arith.addf %11, %12 : vector<8x32xf32>
    %14 = arith.negf %13 : vector<8x32xf32>
    %15 = math.exp %14 : vector<8x32xf32>
    %cst_5 = arith.constant 1.000000e+00 : f32
    %16 = vector.broadcast %cst_5 : f32 to vector<8x32xf32>
    %17 = arith.addf %16, %15 : vector<8x32xf32>
    %18 = arith.divf %16, %17 : vector<8x32xf32>
    %19 = vector.extract_strided_slice %8 {offsets = [0, 32], sizes = [8, 32], strides = [1, 1]} : vector<8x96xf32> to vector<8x32xf32>
    %20 = vector.extract_strided_slice %10 {offsets = [0, 32], sizes = [8, 32], strides = [1, 1]} : vector<8x96xf32> to vector<8x32xf32>
    %21 = arith.addf %19, %20 : vector<8x32xf32>
    %22 = arith.negf %21 : vector<8x32xf32>
    %23 = math.exp %22 : vector<8x32xf32>
    %cst_6 = arith.constant 1.000000e+00 : f32
    %24 = vector.broadcast %cst_6 : f32 to vector<8x32xf32>
    %25 = arith.addf %24, %23 : vector<8x32xf32>
    %26 = arith.divf %24, %25 : vector<8x32xf32>
    %27 = vector.extract_strided_slice %8 {offsets = [0, 64], sizes = [8, 32], strides = [1, 1]} : vector<8x96xf32> to vector<8x32xf32>
    %28 = vector.extract_strided_slice %10 {offsets = [0, 64], sizes = [8, 32], strides = [1, 1]} : vector<8x96xf32> to vector<8x32xf32>
    %29 = arith.mulf %18, %28 : vector<8x32xf32>
    %30 = arith.addf %27, %29 : vector<8x32xf32>
    %31 = math.tanh %30 : vector<8x32xf32>
    %cst_7 = arith.constant 1.000000e+00 : f32
    %32 = vector.broadcast %cst_7 : f32 to vector<8x32xf32>
    %33 = arith.subf %32, %26 : vector<8x32xf32>
    %34 = arith.mulf %33, %31 : vector<8x32xf32>
    %35 = arith.mulf %26, %4 : vector<8x32xf32>
    %36 = arith.addf %34, %35 : vector<8x32xf32>
    %37 = arith.index_cast %6 : i32 to index
    %c0_8 = arith.constant 0 : index
    %38 = vector.load %arg11[%37, %c0_8] : memref<64x32xf32, #tpu.memory_space<vmem>>, vector<8x32xf32>
    tpu.vector_store %arg11[%37, %c0_8], %36 {strides = array<i32>} : memref<64x32xf32, #tpu.memory_space<vmem>>, vector<8x32xf32>,
    %c1_i32 = arith.constant 1 : i32
    %c8_i32_9 = arith.constant 8 : i32
    %39 = arith.muli %c1_i32, %c8_i32_9 : i32
    %40 = tpu.assume_multiple %39, 8 : i32
    %41 = arith.index_cast %40 : i32 to index
    %c0_10 = arith.constant 0 : index
    %42 = vector.load %arg0[%41, %c0_10] : memref<64x96xf32, #tpu.memory_space<vmem>>, vector<8x96xf32>
    %cst_11 = arith.constant dense<0.000000e+00> : vector<8x96xf32>
    %43 = tpu.matmul %36, %0, %cst_11 {dimension_numbers = #tpu.dot_dimension_numbers<[1], [0], [0], [1], [0, 0, 1, 1], [], []>, precision = #tpu.contract_precision<fp32>} : vector<8x32xf32>, vector<32x96xf32>, vector<8x96xf32> -> vector<8x96xf32>
    %44 = arith.addf %43, %3 : vector<8x96xf32>
    %45 = vector.extract_strided_slice %42 {offsets = [0, 0], sizes = [8, 32], strides = [1, 1]} : vector<8x96xf32> to vector<8x32xf32>
    %46 = vector.extract_strided_slice %44 {offsets = [0, 0], sizes = [8, 32], strides = [1, 1]} : vector<8x96xf32> to vector<8x32xf32>
    %47 = arith.addf %45, %46 : vector<8x32xf32>
    %48 = arith.negf %47 : vector<8x32xf32>
    %49 = math.exp %48 : vector<8x32xf32>
    %cst_12 = arith.constant 1.000000e+00 : f32
    %50 = vector.broadcast %cst_12 : f32 to vector<8x32xf32>
    %51 = arith.addf %50, %49 : vector<8x32xf32>
    %52 = arith.divf %50, %51 : vector<8x32xf32>
    %53 = vector.extract_strided_slice %42 {offsets = [0, 32], sizes = [8, 32], strides = [1, 1]} : vector<8x96xf32> to vector<8x32xf32>
    %54 = vector.extract_strided_slice %44 {offsets = [0, 32], sizes = [8, 32], strides = [1, 1]} : vector<8x96xf32> to vector<8x32xf32>
    %55 = arith.addf %53, %54 : vector<8x32xf32>
    %56 = arith.negf %55 : vector<8x32xf32>
    %57 = math.exp %56 : vector<8x32xf32>
    %cst_13 = arith.constant 1.000000e+00 : f32
    %58 = vector.broadcast %cst_13 : f32 to vector<8x32xf32>
    %59 = arith.addf %58, %57 : vector<8x32xf32>
    %60 = arith.divf %58, %59 : vector<8x32xf32>
    %61 = vector.extract_strided_slice %42 {offsets = [0, 64], sizes = [8, 32], strides = [1, 1]} : vector<8x96xf32> to vector<8x32xf32>
    %62 = vector.extract_strided_slice %44 {offsets = [0, 64], sizes = [8, 32], strides = [1, 1]} : vector<8x96xf32> to vector<8x32xf32>
    %63 = arith.mulf %52, %62 : vector<8x32xf32>
    %64 = arith.addf %61, %63 : vector<8x32xf32>
    %65 = math.tanh %64 : vector<8x32xf32>
    %cst_14 = arith.constant 1.000000e+00 : f32
    %66 = vector.broadcast %cst_14 : f32 to vector<8x32xf32>
    %67 = arith.subf %66, %60 : vector<8x32xf32>
    %68 = arith.mulf %67, %65 : vector<8x32xf32>
    %69 = arith.mulf %60, %36 : vector<8x32xf32>
    %70 = arith.addf %68, %69 : vector<8x32xf32>
    %71 = arith.index_cast %40 : i32 to index
    %c0_15 = arith.constant 0 : index
    %72 = vector.load %arg11[%71, %c0_15] : memref<64x32xf32, #tpu.memory_space<vmem>>, vector<8x32xf32>
    tpu.vector_store %arg11[%71, %c0_15], %70 {strides = array<i32>} : memref<64x32xf32, #tpu.memory_space<vmem>>, vector<8x32xf32>,
    %c2_i32 = arith.constant 2 : i32
    %c8_i32_16 = arith.constant 8 : i32
    %73 = arith.muli %c2_i32, %c8_i32_16 : i32
    %74 = tpu.assume_multiple %73, 8 : i32
    %75 = arith.index_cast %74 : i32 to index
    %c0_17 = arith.constant 0 : index
    %76 = vector.load %arg0[%75, %c0_17] : memref<64x96xf32, #tpu.memory_space<vmem>>, vector<8x96xf32>
    %cst_18 = arith.constant dense<0.000000e+00> : vector<8x96xf32>
    %77 = tpu.matmul %70, %0, %cst_18 {dimension_numbers = #tpu.dot_dimension_numbers<[1], [0], [0], [1], [0, 0, 1, 1], [], []>, precision = #tpu.contract_precision<fp32>} : vector<8x32xf32>, vector<32x96xf32>, vector<8x96xf32> -> vector<8x96xf32>
    %78 = arith.addf %77, %3 : vector<8x96xf32>
    %79 = vector.extract_strided_slice %76 {offsets = [0, 0], sizes = [8, 32], strides = [1, 1]} : vector<8x96xf32> to vector<8x32xf32>
    %80 = vector.extract_strided_slice %78 {offsets = [0, 0], sizes = [8, 32], strides = [1, 1]} : vector<8x96xf32> to vector<8x32xf32>
    %81 = arith.addf %79, %80 : vector<8x32xf32>
    %82 = arith.negf %81 : vector<8x32xf32>
    %83 = math.exp %82 : vector<8x32xf32>
    %cst_19 = arith.constant 1.000000e+00 : f32
    %84 = vector.broadcast %cst_19 : f32 to vector<8x32xf32>
    %85 = arith.addf %84, %83 : vector<8x32xf32>
    %86 = arith.divf %84, %85 : vector<8x32xf32>
    %87 = vector.extract_strided_slice %76 {offsets = [0, 32], sizes = [8, 32], strides = [1, 1]} : vector<8x96xf32> to vector<8x32xf32>
    %88 = vector.extract_strided_slice %78 {offsets = [0, 32], sizes = [8, 32], strides = [1, 1]} : vector<8x96xf32> to vector<8x32xf32>
    %89 = arith.addf %87, %88 : vector<8x32xf32>
    %90 = arith.negf %89 : vector<8x32xf32>
    %91 = math.exp %90 : vector<8x32xf32>
    %cst_20 = arith.constant 1.000000e+00 : f32
    %92 = vector.broadcast %cst_20 : f32 to vector<8x32xf32>
    %93 = arith.addf %92, %91 : vector<8x32xf32>
    %94 = arith.divf %92, %93 : vector<8x32xf32>
    %95 = vector.extract_strided_slice %76 {offsets = [0, 64], sizes = [8, 32], strides = [1, 1]} : vector<8x96xf32> to vector<8x32xf32>
    %96 = vector.extract_strided_slice %78 {offsets = [0, 64], sizes = [8, 32], strides = [1, 1]} : vector<8x96xf32> to vector<8x32xf32>
    %97 = arith.mulf %86, %96 : vector<8x32xf32>
    %98 = arith.addf %95, %97 : vector<8x32xf32>
    %99 = math.tanh %98 : vector<8x32xf32>
    %cst_21 = arith.constant 1.000000e+00 : f32
    %100 = vector.broadcast %cst_21 : f32 to vector<8x32xf32>
    %101 = arith.subf %100, %94 : vector<8x32xf32>
    %102 = arith.mulf %101, %99 : vector<8x32xf32>
    %103 = arith.mulf %94, %70 : vector<8x32xf32>
    %104 = arith.addf %102, %103 : vector<8x32xf32>
    %105 = arith.index_cast %74 : i32 to index
    %c0_22 = arith.constant 0 : index
    %106 = vector.load %arg11[%105, %c0_22] : memref<64x32xf32, #tpu.memory_space<vmem>>, vector<8x32xf32>
    tpu.vector_store %arg11[%105, %c0_22], %104 {strides = array<i32>} : memref<64x32xf32, #tpu.memory_space<vmem>>, vector<8x32xf32>,
    %c3_i32 = arith.constant 3 : i32
    %c8_i32_23 = arith.constant 8 : i32
    %107 = arith.muli %c3_i32, %c8_i32_23 : i32
    %108 = tpu.assume_multiple %107, 8 : i32
    %109 = arith.index_cast %108 : i32 to index
    %c0_24 = arith.constant 0 : index
    %110 = vector.load %arg0[%109, %c0_24] : memref<64x96xf32, #tpu.memory_space<vmem>>, vector<8x96xf32>
    %cst_25 = arith.constant dense<0.000000e+00> : vector<8x96xf32>
    %111 = tpu.matmul %104, %0, %cst_25 {dimension_numbers = #tpu.dot_dimension_numbers<[1], [0], [0], [1], [0, 0, 1, 1], [], []>, precision = #tpu.contract_precision<fp32>} : vector<8x32xf32>, vector<32x96xf32>, vector<8x96xf32> -> vector<8x96xf32>
    %112 = arith.addf %111, %3 : vector<8x96xf32>
    %113 = vector.extract_strided_slice %110 {offsets = [0, 0], sizes = [8, 32], strides = [1, 1]} : vector<8x96xf32> to vector<8x32xf32>
    %114 = vector.extract_strided_slice %112 {offsets = [0, 0], sizes = [8, 32], strides = [1, 1]} : vector<8x96xf32> to vector<8x32xf32>
    %115 = arith.addf %113, %114 : vector<8x32xf32>
    %116 = arith.negf %115 : vector<8x32xf32>
    %117 = math.exp %116 : vector<8x32xf32>
    %cst_26 = arith.constant 1.000000e+00 : f32
    %118 = vector.broadcast %cst_26 : f32 to vector<8x32xf32>
    %119 = arith.addf %118, %117 : vector<8x32xf32>
    %120 = arith.divf %118, %119 : vector<8x32xf32>
    %121 = vector.extract_strided_slice %110 {offsets = [0, 32], sizes = [8, 32], strides = [1, 1]} : vector<8x96xf32> to vector<8x32xf32>
    %122 = vector.extract_strided_slice %112 {offsets = [0, 32], sizes = [8, 32], strides = [1, 1]} : vector<8x96xf32> to vector<8x32xf32>
    %123 = arith.addf %121, %122 : vector<8x32xf32>
    %124 = arith.negf %123 : vector<8x32xf32>
    %125 = math.exp %124 : vector<8x32xf32>
    %cst_27 = arith.constant 1.000000e+00 : f32
    %126 = vector.broadcast %cst_27 : f32 to vector<8x32xf32>
    %127 = arith.addf %126, %125 : vector<8x32xf32>
    %128 = arith.divf %126, %127 : vector<8x32xf32>
    %129 = vector.extract_strided_slice %110 {offsets = [0, 64], sizes = [8, 32], strides = [1, 1]} : vector<8x96xf32> to vector<8x32xf32>
    %130 = vector.extract_strided_slice %112 {offsets = [0, 64], sizes = [8, 32], strides = [1, 1]} : vector<8x96xf32> to vector<8x32xf32>
    %131 = arith.mulf %120, %130 : vector<8x32xf32>
    %132 = arith.addf %129, %131 : vector<8x32xf32>
    %133 = math.tanh %132 : vector<8x32xf32>
    %cst_28 = arith.constant 1.000000e+00 : f32
    %134 = vector.broadcast %cst_28 : f32 to vector<8x32xf32>
    %135 = arith.subf %134, %128 : vector<8x32xf32>
    %136 = arith.mulf %135, %133 : vector<8x32xf32>
    %137 = arith.mulf %128, %104 : vector<8x32xf32>
    %138 = arith.addf %136, %137 : vector<8x32xf32>
    %139 = arith.index_cast %108 : i32 to index
    %c0_29 = arith.constant 0 : index
    %140 = vector.load %arg11[%139, %c0_29] : memref<64x32xf32, #tpu.memory_space<vmem>>, vector<8x32xf32>
    tpu.vector_store %arg11[%139, %c0_29], %138 {strides = array<i32>} : memref<64x32xf32, #tpu.memory_space<vmem>>, vector<8x32xf32>,
    %c4_i32 = arith.constant 4 : i32
    %c8_i32_30 = arith.constant 8 : i32
    %141 = arith.muli %c4_i32, %c8_i32_30 : i32
    %142 = tpu.assume_multiple %141, 8 : i32
    %143 = arith.index_cast %142 : i32 to index
    %c0_31 = arith.constant 0 : index
    %144 = vector.load %arg0[%143, %c0_31] : memref<64x96xf32, #tpu.memory_space<vmem>>, vector<8x96xf32>
    %cst_32 = arith.constant dense<0.000000e+00> : vector<8x96xf32>
    %145 = tpu.matmul %138, %0, %cst_32 {dimension_numbers = #tpu.dot_dimension_numbers<[1], [0], [0], [1], [0, 0, 1, 1], [], []>, precision = #tpu.contract_precision<fp32>} : vector<8x32xf32>, vector<32x96xf32>, vector<8x96xf32> -> vector<8x96xf32>
    %146 = arith.addf %145, %3 : vector<8x96xf32>
    %147 = vector.extract_strided_slice %144 {offsets = [0, 0], sizes = [8, 32], strides = [1, 1]} : vector<8x96xf32> to vector<8x32xf32>
    %148 = vector.extract_strided_slice %146 {offsets = [0, 0], sizes = [8, 32], strides = [1, 1]} : vector<8x96xf32> to vector<8x32xf32>
    %149 = arith.addf %147, %148 : vector<8x32xf32>
    %150 = arith.negf %149 : vector<8x32xf32>
    %151 = math.exp %150 : vector<8x32xf32>
    %cst_33 = arith.constant 1.000000e+00 : f32
    %152 = vector.broadcast %cst_33 : f32 to vector<8x32xf32>
    %153 = arith.addf %152, %151 : vector<8x32xf32>
    %154 = arith.divf %152, %153 : vector<8x32xf32>
    %155 = vector.extract_strided_slice %144 {offsets = [0, 32], sizes = [8, 32], strides = [1, 1]} : vector<8x96xf32> to vector<8x32xf32>
    %156 = vector.extract_strided_slice %146 {offsets = [0, 32], sizes = [8, 32], strides = [1, 1]} : vector<8x96xf32> to vector<8x32xf32>
    %157 = arith.addf %155, %156 : vector<8x32xf32>
    %158 = arith.negf %157 : vector<8x32xf32>
    %159 = math.exp %158 : vector<8x32xf32>
    %cst_34 = arith.constant 1.000000e+00 : f32
    %160 = vector.broadcast %cst_34 : f32 to vector<8x32xf32>
    %161 = arith.addf %160, %159 : vector<8x32xf32>
    %162 = arith.divf %160, %161 : vector<8x32xf32>
    %163 = vector.extract_strided_slice %144 {offsets = [0, 64], sizes = [8, 32], strides = [1, 1]} : vector<8x96xf32> to vector<8x32xf32>
    %164 = vector.extract_strided_slice %146 {offsets = [0, 64], sizes = [8, 32], strides = [1, 1]} : vector<8x96xf32> to vector<8x32xf32>
    %165 = arith.mulf %154, %164 : vector<8x32xf32>
    %166 = arith.addf %163, %165 : vector<8x32xf32>
    %167 = math.tanh %166 : vector<8x32xf32>
    %cst_35 = arith.constant 1.000000e+00 : f32
    %168 = vector.broadcast %cst_35 : f32 to vector<8x32xf32>
    %169 = arith.subf %168, %162 : vector<8x32xf32>
    %170 = arith.mulf %169, %167 : vector<8x32xf32>
    %171 = arith.mulf %162, %138 : vector<8x32xf32>
    %172 = arith.addf %170, %171 : vector<8x32xf32>
    %173 = arith.index_cast %142 : i32 to index
    %c0_36 = arith.constant 0 : index
    %174 = vector.load %arg11[%173, %c0_36] : memref<64x32xf32, #tpu.memory_space<vmem>>, vector<8x32xf32>
    tpu.vector_store %arg11[%173, %c0_36], %172 {strides = array<i32>} : memref<64x32xf32, #tpu.memory_space<vmem>>, vector<8x32xf32>,
    %c5_i32 = arith.constant 5 : i32
    %c8_i32_37 = arith.constant 8 : i32
    %175 = arith.muli %c5_i32, %c8_i32_37 : i32
    %176 = tpu.assume_multiple %175, 8 : i32
    %177 = arith.index_cast %176 : i32 to index
    %c0_38 = arith.constant 0 : index
    %178 = vector.load %arg0[%177, %c0_38] : memref<64x96xf32, #tpu.memory_space<vmem>>, vector<8x96xf32>
    %cst_39 = arith.constant dense<0.000000e+00> : vector<8x96xf32>
    %179 = tpu.matmul %172, %0, %cst_39 {dimension_numbers = #tpu.dot_dimension_numbers<[1], [0], [0], [1], [0, 0, 1, 1], [], []>, precision = #tpu.contract_precision<fp32>} : vector<8x32xf32>, vector<32x96xf32>, vector<8x96xf32> -> vector<8x96xf32>
    %180 = arith.addf %179, %3 : vector<8x96xf32>
    %181 = vector.extract_strided_slice %178 {offsets = [0, 0], sizes = [8, 32], strides = [1, 1]} : vector<8x96xf32> to vector<8x32xf32>
    %182 = vector.extract_strided_slice %180 {offsets = [0, 0], sizes = [8, 32], strides = [1, 1]} : vector<8x96xf32> to vector<8x32xf32>
    %183 = arith.addf %181, %182 : vector<8x32xf32>
    %184 = arith.negf %183 : vector<8x32xf32>
    %185 = math.exp %184 : vector<8x32xf32>
    %cst_40 = arith.constant 1.000000e+00 : f32
    %186 = vector.broadcast %cst_40 : f32 to vector<8x32xf32>
    %187 = arith.addf %186, %185 : vector<8x32xf32>
    %188 = arith.divf %186, %187 : vector<8x32xf32>
    %189 = vector.extract_strided_slice %178 {offsets = [0, 32], sizes = [8, 32], strides = [1, 1]} : vector<8x96xf32> to vector<8x32xf32>
    %190 = vector.extract_strided_slice %180 {offsets = [0, 32], sizes = [8, 32], strides = [1, 1]} : vector<8x96xf32> to vector<8x32xf32>
    %191 = arith.addf %189, %190 : vector<8x32xf32>
    %192 = arith.negf %191 : vector<8x32xf32>
    %193 = math.exp %192 : vector<8x32xf32>
    %cst_41 = arith.constant 1.000000e+00 : f32
    %194 = vector.broadcast %cst_41 : f32 to vector<8x32xf32>
    %195 = arith.addf %194, %193 : vector<8x32xf32>
    %196 = arith.divf %194, %195 : vector<8x32xf32>
    %197 = vector.extract_strided_slice %178 {offsets = [0, 64], sizes = [8, 32], strides = [1, 1]} : vector<8x96xf32> to vector<8x32xf32>
    %198 = vector.extract_strided_slice %180 {offsets = [0, 64], sizes = [8, 32], strides = [1, 1]} : vector<8x96xf32> to vector<8x32xf32>
    %199 = arith.mulf %188, %198 : vector<8x32xf32>
    %200 = arith.addf %197, %199 : vector<8x32xf32>
    %201 = math.tanh %200 : vector<8x32xf32>
    %cst_42 = arith.constant 1.000000e+00 : f32
    %202 = vector.broadcast %cst_42 : f32 to vector<8x32xf32>
    %203 = arith.subf %202, %196 : vector<8x32xf32>
    %204 = arith.mulf %203, %201 : vector<8x32xf32>
    %205 = arith.mulf %196, %172 : vector<8x32xf32>
    %206 = arith.addf %204, %205 : vector<8x32xf32>
    %207 = arith.index_cast %176 : i32 to index
    %c0_43 = arith.constant 0 : index
    %208 = vector.load %arg11[%207, %c0_43] : memref<64x32xf32, #tpu.memory_space<vmem>>, vector<8x32xf32>
    tpu.vector_store %arg11[%207, %c0_43], %206 {strides = array<i32>} : memref<64x32xf32, #tpu.memory_space<vmem>>, vector<8x32xf32>,
    %c6_i32 = arith.constant 6 : i32
    %c8_i32_44 = arith.constant 8 : i32
    %209 = arith.muli %c6_i32, %c8_i32_44 : i32
    %210 = tpu.assume_multiple %209, 8 : i32
    %211 = arith.index_cast %210 : i32 to index
    %c0_45 = arith.constant 0 : index
    %212 = vector.load %arg0[%211, %c0_45] : memref<64x96xf32, #tpu.memory_space<vmem>>, vector<8x96xf32>
    %cst_46 = arith.constant dense<0.000000e+00> : vector<8x96xf32>
    %213 = tpu.matmul %206, %0, %cst_46 {dimension_numbers = #tpu.dot_dimension_numbers<[1], [0], [0], [1], [0, 0, 1, 1], [], []>, precision = #tpu.contract_precision<fp32>} : vector<8x32xf32>, vector<32x96xf32>, vector<8x96xf32> -> vector<8x96xf32>
    %214 = arith.addf %213, %3 : vector<8x96xf32>
    %215 = vector.extract_strided_slice %212 {offsets = [0, 0], sizes = [8, 32], strides = [1, 1]} : vector<8x96xf32> to vector<8x32xf32>
    %216 = vector.extract_strided_slice %214 {offsets = [0, 0], sizes = [8, 32], strides = [1, 1]} : vector<8x96xf32> to vector<8x32xf32>
    %217 = arith.addf %215, %216 : vector<8x32xf32>
    %218 = arith.negf %217 : vector<8x32xf32>
    %219 = math.exp %218 : vector<8x32xf32>
    %cst_47 = arith.constant 1.000000e+00 : f32
    %220 = vector.broadcast %cst_47 : f32 to vector<8x32xf32>
    %221 = arith.addf %220, %219 : vector<8x32xf32>
    %222 = arith.divf %220, %221 : vector<8x32xf32>
    %223 = vector.extract_strided_slice %212 {offsets = [0, 32], sizes = [8, 32], strides = [1, 1]} : vector<8x96xf32> to vector<8x32xf32>
    %224 = vector.extract_strided_slice %214 {offsets = [0, 32], sizes = [8, 32], strides = [1, 1]} : vector<8x96xf32> to vector<8x32xf32>
    %225 = arith.addf %223, %224 : vector<8x32xf32>
    %226 = arith.negf %225 : vector<8x32xf32>
    %227 = math.exp %226 : vector<8x32xf32>
    %cst_48 = arith.constant 1.000000e+00 : f32
    %228 = vector.broadcast %cst_48 : f32 to vector<8x32xf32>
    %229 = arith.addf %228, %227 : vector<8x32xf32>
    %230 = arith.divf %228, %229 : vector<8x32xf32>
    %231 = vector.extract_strided_slice %212 {offsets = [0, 64], sizes = [8, 32], strides = [1, 1]} : vector<8x96xf32> to vector<8x32xf32>
    %232 = vector.extract_strided_slice %214 {offsets = [0, 64], sizes = [8, 32], strides = [1, 1]} : vector<8x96xf32> to vector<8x32xf32>
    %233 = arith.mulf %222, %232 : vector<8x32xf32>
    %234 = arith.addf %231, %233 : vector<8x32xf32>
    %235 = math.tanh %234 : vector<8x32xf32>
    %cst_49 = arith.constant 1.000000e+00 : f32
    %236 = vector.broadcast %cst_49 : f32 to vector<8x32xf32>
    %237 = arith.subf %236, %230 : vector<8x32xf32>
    %238 = arith.mulf %237, %235 : vector<8x32xf32>
    %239 = arith.mulf %230, %206 : vector<8x32xf32>
    %240 = arith.addf %238, %239 : vector<8x32xf32>
    %241 = arith.index_cast %210 : i32 to index
    %c0_50 = arith.constant 0 : index
    %242 = vector.load %arg11[%241, %c0_50] : memref<64x32xf32, #tpu.memory_space<vmem>>, vector<8x32xf32>
    tpu.vector_store %arg11[%241, %c0_50], %240 {strides = array<i32>} : memref<64x32xf32, #tpu.memory_space<vmem>>, vector<8x32xf32>,
    %c7_i32 = arith.constant 7 : i32
    %c8_i32_51 = arith.constant 8 : i32
    %243 = arith.muli %c7_i32, %c8_i32_51 : i32
    %244 = tpu.assume_multiple %243, 8 : i32
    %245 = arith.index_cast %244 : i32 to index
    %c0_52 = arith.constant 0 : index
    %246 = vector.load %arg0[%245, %c0_52] : memref<64x96xf32, #tpu.memory_space<vmem>>, vector<8x96xf32>
    %cst_53 = arith.constant dense<0.000000e+00> : vector<8x96xf32>
    %247 = tpu.matmul %240, %0, %cst_53 {dimension_numbers = #tpu.dot_dimension_numbers<[1], [0], [0], [1], [0, 0, 1, 1], [], []>, precision = #tpu.contract_precision<fp32>} : vector<8x32xf32>, vector<32x96xf32>, vector<8x96xf32> -> vector<8x96xf32>
    %248 = arith.addf %247, %3 : vector<8x96xf32>
    %249 = vector.extract_strided_slice %246 {offsets = [0, 0], sizes = [8, 32], strides = [1, 1]} : vector<8x96xf32> to vector<8x32xf32>
    %250 = vector.extract_strided_slice %248 {offsets = [0, 0], sizes = [8, 32], strides = [1, 1]} : vector<8x96xf32> to vector<8x32xf32>
    %251 = arith.addf %249, %250 : vector<8x32xf32>
    %252 = arith.negf %251 : vector<8x32xf32>
    %253 = math.exp %252 : vector<8x32xf32>
    %cst_54 = arith.constant 1.000000e+00 : f32
    %254 = vector.broadcast %cst_54 : f32 to vector<8x32xf32>
    %255 = arith.addf %254, %253 : vector<8x32xf32>
    %256 = arith.divf %254, %255 : vector<8x32xf32>
    %257 = vector.extract_strided_slice %246 {offsets = [0, 32], sizes = [8, 32], strides = [1, 1]} : vector<8x96xf32> to vector<8x32xf32>
    %258 = vector.extract_strided_slice %248 {offsets = [0, 32], sizes = [8, 32], strides = [1, 1]} : vector<8x96xf32> to vector<8x32xf32>
    %259 = arith.addf %257, %258 : vector<8x32xf32>
    %260 = arith.negf %259 : vector<8x32xf32>
    %261 = math.exp %260 : vector<8x32xf32>
    %cst_55 = arith.constant 1.000000e+00 : f32
    %262 = vector.broadcast %cst_55 : f32 to vector<8x32xf32>
    %263 = arith.addf %262, %261 : vector<8x32xf32>
    %264 = arith.divf %262, %263 : vector<8x32xf32>
    %265 = vector.extract_strided_slice %246 {offsets = [0, 64], sizes = [8, 32], strides = [1, 1]} : vector<8x96xf32> to vector<8x32xf32>
    %266 = vector.extract_strided_slice %248 {offsets = [0, 64], sizes = [8, 32], strides = [1, 1]} : vector<8x96xf32> to vector<8x32xf32>
    %267 = arith.mulf %256, %266 : vector<8x32xf32>
    %268 = arith.addf %265, %267 : vector<8x32xf32>
    %269 = math.tanh %268 : vector<8x32xf32>
    %cst_56 = arith.constant 1.000000e+00 : f32
    %270 = vector.broadcast %cst_56 : f32 to vector<8x32xf32>
    %271 = arith.subf %270, %264 : vector<8x32xf32>
    %272 = arith.mulf %271, %269 : vector<8x32xf32>
    %273 = arith.mulf %264, %240 : vector<8x32xf32>
    %274 = arith.addf %272, %273 : vector<8x32xf32>
    %275 = arith.index_cast %244 : i32 to index
    %c0_57 = arith.constant 0 : index
    %276 = vector.load %arg11[%275, %c0_57] : memref<64x32xf32, #tpu.memory_space<vmem>>, vector<8x32xf32>
    tpu.vector_store %arg11[%275, %c0_57], %274 {strides = array<i32>} : memref<64x32xf32, #tpu.memory_space<vmem>>, vector<8x32xf32>,
    %c8_i32_58 = arith.constant 8 : i32
    %c0_59 = arith.constant 0 : index
    %c0_60 = arith.constant 0 : index
    %277 = vector.load %arg11[%c0_59, %c0_60] : memref<64x32xf32, #tpu.memory_space<vmem>>, vector<64x32xf32>
    %c0_61 = arith.constant 0 : index
    %c0_62 = arith.constant 0 : index
    %278 = vector.load %arg5[%c0_61, %c0_62] : memref<32x96xf32, #tpu.memory_space<vmem>>, vector<32x96xf32>
    %cst_63 = arith.constant dense<0.000000e+00> : vector<64x96xf32>
    %279 = tpu.matmul %277, %278, %cst_63 {dimension_numbers = #tpu.dot_dimension_numbers<[1], [0], [0], [1], [0, 0, 1, 1], [], []>, precision = #tpu.contract_precision<fp32>} : vector<64x32xf32>, vector<32x96xf32>, vector<64x96xf32> -> vector<64x96xf32>
    %c0_64 = arith.constant 0 : index
    %c0_65 = arith.constant 0 : index
    %280 = vector.load %arg6[%c0_64, %c0_65] : memref<1x96xf32, #tpu.memory_space<vmem>>, vector<1x96xf32>
    %281 = vector.broadcast %280 : vector<1x96xf32> to vector<64x96xf32>
    %282 = arith.addf %279, %281 : vector<64x96xf32>
    %c0_66 = arith.constant 0 : index
    %c0_67 = arith.constant 0 : index
    %283 = vector.load %arg10[%c0_66, %c0_67] : memref<64x96xf32, #tpu.memory_space<vmem>>, vector<64x96xf32>
    tpu.vector_store %arg10[%c0_66, %c0_67], %282 {strides = array<i32>} : memref<64x96xf32, #tpu.memory_space<vmem>>, vector<64x96xf32>,
    %c0_68 = arith.constant 0 : index
    %c0_69 = arith.constant 0 : index
    %284 = vector.load %arg3[%c0_68, %c0_69] : memref<32x96xf32, #tpu.memory_space<vmem>>, vector<32x96xf32>
    %c0_70 = arith.constant 0 : index
    %c0_71 = arith.constant 0 : index
    %285 = vector.load %arg4[%c0_70, %c0_71] : memref<1x96xf32, #tpu.memory_space<vmem>>, vector<1x96xf32>
    %286 = vector.shape_cast %285 : vector<1x96xf32> to vector<1x96xf32>
    %287 = vector.broadcast %286 : vector<1x96xf32> to vector<8x96xf32>
    %cst_72 = arith.constant 0.000000e+00 : f32
    %288 = vector.broadcast %cst_72 : f32 to vector<8x32xf32>
    %c0_i32_73 = arith.constant 0 : i32
    %c8_i32_74 = arith.constant 8 : i32
    %289 = arith.muli %c0_i32_73, %c8_i32_74 : i32
    %290 = tpu.assume_multiple %289, 8 : i32
    %291 = arith.index_cast %290 : i32 to index
    %c0_75 = arith.constant 0 : index
    %292 = vector.load %arg10[%291, %c0_75] : memref<64x96xf32, #tpu.memory_space<vmem>>, vector<8x96xf32>
    %cst_76 = arith.constant dense<0.000000e+00> : vector<8x96xf32>
    %293 = tpu.matmul %288, %284, %cst_76 {dimension_numbers = #tpu.dot_dimension_numbers<[1], [0], [0], [1], [0, 0, 1, 1], [], []>, precision = #tpu.contract_precision<fp32>} : vector<8x32xf32>, vector<32x96xf32>, vector<8x96xf32> -> vector<8x96xf32>
    %294 = arith.addf %293, %287 : vector<8x96xf32>
    %295 = vector.extract_strided_slice %292 {offsets = [0, 0], sizes = [8, 32], strides = [1, 1]} : vector<8x96xf32> to vector<8x32xf32>
    %296 = vector.extract_strided_slice %294 {offsets = [0, 0], sizes = [8, 32], strides = [1, 1]} : vector<8x96xf32> to vector<8x32xf32>
    %297 = arith.addf %295, %296 : vector<8x32xf32>
    %298 = arith.negf %297 : vector<8x32xf32>
    %299 = math.exp %298 : vector<8x32xf32>
    %cst_77 = arith.constant 1.000000e+00 : f32
    %300 = vector.broadcast %cst_77 : f32 to vector<8x32xf32>
    %301 = arith.addf %300, %299 : vector<8x32xf32>
    %302 = arith.divf %300, %301 : vector<8x32xf32>
    %303 = vector.extract_strided_slice %292 {offsets = [0, 32], sizes = [8, 32], strides = [1, 1]} : vector<8x96xf32> to vector<8x32xf32>
    %304 = vector.extract_strided_slice %294 {offsets = [0, 32], sizes = [8, 32], strides = [1, 1]} : vector<8x96xf32> to vector<8x32xf32>
    %305 = arith.addf %303, %304 : vector<8x32xf32>
    %306 = arith.negf %305 : vector<8x32xf32>
    %307 = math.exp %306 : vector<8x32xf32>
    %cst_78 = arith.constant 1.000000e+00 : f32
    %308 = vector.broadcast %cst_78 : f32 to vector<8x32xf32>
    %309 = arith.addf %308, %307 : vector<8x32xf32>
    %310 = arith.divf %308, %309 : vector<8x32xf32>
    %311 = vector.extract_strided_slice %292 {offsets = [0, 64], sizes = [8, 32], strides = [1, 1]} : vector<8x96xf32> to vector<8x32xf32>
    %312 = vector.extract_strided_slice %294 {offsets = [0, 64], sizes = [8, 32], strides = [1, 1]} : vector<8x96xf32> to vector<8x32xf32>
    %313 = arith.mulf %302, %312 : vector<8x32xf32>
    %314 = arith.addf %311, %313 : vector<8x32xf32>
    %315 = math.tanh %314 : vector<8x32xf32>
    %cst_79 = arith.constant 1.000000e+00 : f32
    %316 = vector.broadcast %cst_79 : f32 to vector<8x32xf32>
    %317 = arith.subf %316, %310 : vector<8x32xf32>
    %318 = arith.mulf %317, %315 : vector<8x32xf32>
    %319 = arith.mulf %310, %288 : vector<8x32xf32>
    %320 = arith.addf %318, %319 : vector<8x32xf32>
    %c1_i32_80 = arith.constant 1 : i32
    %c8_i32_81 = arith.constant 8 : i32
    %321 = arith.muli %c1_i32_80, %c8_i32_81 : i32
    %322 = tpu.assume_multiple %321, 8 : i32
    %323 = arith.index_cast %322 : i32 to index
    %c0_82 = arith.constant 0 : index
    %324 = vector.load %arg10[%323, %c0_82] : memref<64x96xf32, #tpu.memory_space<vmem>>, vector<8x96xf32>
    %cst_83 = arith.constant dense<0.000000e+00> : vector<8x96xf32>
    %325 = tpu.matmul %320, %284, %cst_83 {dimension_numbers = #tpu.dot_dimension_numbers<[1], [0], [0], [1], [0, 0, 1, 1], [], []>, precision = #tpu.contract_precision<fp32>} : vector<8x32xf32>, vector<32x96xf32>, vector<8x96xf32> -> vector<8x96xf32>
    %326 = arith.addf %325, %287 : vector<8x96xf32>
    %327 = vector.extract_strided_slice %324 {offsets = [0, 0], sizes = [8, 32], strides = [1, 1]} : vector<8x96xf32> to vector<8x32xf32>
    %328 = vector.extract_strided_slice %326 {offsets = [0, 0], sizes = [8, 32], strides = [1, 1]} : vector<8x96xf32> to vector<8x32xf32>
    %329 = arith.addf %327, %328 : vector<8x32xf32>
    %330 = arith.negf %329 : vector<8x32xf32>
    %331 = math.exp %330 : vector<8x32xf32>
    %cst_84 = arith.constant 1.000000e+00 : f32
    %332 = vector.broadcast %cst_84 : f32 to vector<8x32xf32>
    %333 = arith.addf %332, %331 : vector<8x32xf32>
    %334 = arith.divf %332, %333 : vector<8x32xf32>
    %335 = vector.extract_strided_slice %324 {offsets = [0, 32], sizes = [8, 32], strides = [1, 1]} : vector<8x96xf32> to vector<8x32xf32>
    %336 = vector.extract_strided_slice %326 {offsets = [0, 32], sizes = [8, 32], strides = [1, 1]} : vector<8x96xf32> to vector<8x32xf32>
    %337 = arith.addf %335, %336 : vector<8x32xf32>
    %338 = arith.negf %337 : vector<8x32xf32>
    %339 = math.exp %338 : vector<8x32xf32>
    %cst_85 = arith.constant 1.000000e+00 : f32
    %340 = vector.broadcast %cst_85 : f32 to vector<8x32xf32>
    %341 = arith.addf %340, %339 : vector<8x32xf32>
    %342 = arith.divf %340, %341 : vector<8x32xf32>
    %343 = vector.extract_strided_slice %324 {offsets = [0, 64], sizes = [8, 32], strides = [1, 1]} : vector<8x96xf32> to vector<8x32xf32>
    %344 = vector.extract_strided_slice %326 {offsets = [0, 64], sizes = [8, 32], strides = [1, 1]} : vector<8x96xf32> to vector<8x32xf32>
    %345 = arith.mulf %334, %344 : vector<8x32xf32>
    %346 = arith.addf %343, %345 : vector<8x32xf32>
    %347 = math.tanh %346 : vector<8x32xf32>
    %cst_86 = arith.constant 1.000000e+00 : f32
    %348 = vector.broadcast %cst_86 : f32 to vector<8x32xf32>
    %349 = arith.subf %348, %342 : vector<8x32xf32>
    %350 = arith.mulf %349, %347 : vector<8x32xf32>
    %351 = arith.mulf %342, %320 : vector<8x32xf32>
    %352 = arith.addf %350, %351 : vector<8x32xf32>
    %c2_i32_87 = arith.constant 2 : i32
    %c8_i32_88 = arith.constant 8 : i32
    %353 = arith.muli %c2_i32_87, %c8_i32_88 : i32
    %354 = tpu.assume_multiple %353, 8 : i32
    %355 = arith.index_cast %354 : i32 to index
    %c0_89 = arith.constant 0 : index
    %356 = vector.load %arg10[%355, %c0_89] : memref<64x96xf32, #tpu.memory_space<vmem>>, vector<8x96xf32>
    %cst_90 = arith.constant dense<0.000000e+00> : vector<8x96xf32>
    %357 = tpu.matmul %352, %284, %cst_90 {dimension_numbers = #tpu.dot_dimension_numbers<[1], [0], [0], [1], [0, 0, 1, 1], [], []>, precision = #tpu.contract_precision<fp32>} : vector<8x32xf32>, vector<32x96xf32>, vector<8x96xf32> -> vector<8x96xf32>
    %358 = arith.addf %357, %287 : vector<8x96xf32>
    %359 = vector.extract_strided_slice %356 {offsets = [0, 0], sizes = [8, 32], strides = [1, 1]} : vector<8x96xf32> to vector<8x32xf32>
    %360 = vector.extract_strided_slice %358 {offsets = [0, 0], sizes = [8, 32], strides = [1, 1]} : vector<8x96xf32> to vector<8x32xf32>
    %361 = arith.addf %359, %360 : vector<8x32xf32>
    %362 = arith.negf %361 : vector<8x32xf32>
    %363 = math.exp %362 : vector<8x32xf32>
    %cst_91 = arith.constant 1.000000e+00 : f32
    %364 = vector.broadcast %cst_91 : f32 to vector<8x32xf32>
    %365 = arith.addf %364, %363 : vector<8x32xf32>
    %366 = arith.divf %364, %365 : vector<8x32xf32>
    %367 = vector.extract_strided_slice %356 {offsets = [0, 32], sizes = [8, 32], strides = [1, 1]} : vector<8x96xf32> to vector<8x32xf32>
    %368 = vector.extract_strided_slice %358 {offsets = [0, 32], sizes = [8, 32], strides = [1, 1]} : vector<8x96xf32> to vector<8x32xf32>
    %369 = arith.addf %367, %368 : vector<8x32xf32>
    %370 = arith.negf %369 : vector<8x32xf32>
    %371 = math.exp %370 : vector<8x32xf32>
    %cst_92 = arith.constant 1.000000e+00 : f32
    %372 = vector.broadcast %cst_92 : f32 to vector<8x32xf32>
    %373 = arith.addf %372, %371 : vector<8x32xf32>
    %374 = arith.divf %372, %373 : vector<8x32xf32>
    %375 = vector.extract_strided_slice %356 {offsets = [0, 64], sizes = [8, 32], strides = [1, 1]} : vector<8x96xf32> to vector<8x32xf32>
    %376 = vector.extract_strided_slice %358 {offsets = [0, 64], sizes = [8, 32], strides = [1, 1]} : vector<8x96xf32> to vector<8x32xf32>
    %377 = arith.mulf %366, %376 : vector<8x32xf32>
    %378 = arith.addf %375, %377 : vector<8x32xf32>
    %379 = math.tanh %378 : vector<8x32xf32>
    %cst_93 = arith.constant 1.000000e+00 : f32
    %380 = vector.broadcast %cst_93 : f32 to vector<8x32xf32>
    %381 = arith.subf %380, %374 : vector<8x32xf32>
    %382 = arith.mulf %381, %379 : vector<8x32xf32>
    %383 = arith.mulf %374, %352 : vector<8x32xf32>
    %384 = arith.addf %382, %383 : vector<8x32xf32>
    %c3_i32_94 = arith.constant 3 : i32
    %c8_i32_95 = arith.constant 8 : i32
    %385 = arith.muli %c3_i32_94, %c8_i32_95 : i32
    %386 = tpu.assume_multiple %385, 8 : i32
    %387 = arith.index_cast %386 : i32 to index
    %c0_96 = arith.constant 0 : index
    %388 = vector.load %arg10[%387, %c0_96] : memref<64x96xf32, #tpu.memory_space<vmem>>, vector<8x96xf32>
    %cst_97 = arith.constant dense<0.000000e+00> : vector<8x96xf32>
    %389 = tpu.matmul %384, %284, %cst_97 {dimension_numbers = #tpu.dot_dimension_numbers<[1], [0], [0], [1], [0, 0, 1, 1], [], []>, precision = #tpu.contract_precision<fp32>} : vector<8x32xf32>, vector<32x96xf32>, vector<8x96xf32> -> vector<8x96xf32>
    %390 = arith.addf %389, %287 : vector<8x96xf32>
    %391 = vector.extract_strided_slice %388 {offsets = [0, 0], sizes = [8, 32], strides = [1, 1]} : vector<8x96xf32> to vector<8x32xf32>
    %392 = vector.extract_strided_slice %390 {offsets = [0, 0], sizes = [8, 32], strides = [1, 1]} : vector<8x96xf32> to vector<8x32xf32>
    %393 = arith.addf %391, %392 : vector<8x32xf32>
    %394 = arith.negf %393 : vector<8x32xf32>
    %395 = math.exp %394 : vector<8x32xf32>
    %cst_98 = arith.constant 1.000000e+00 : f32
    %396 = vector.broadcast %cst_98 : f32 to vector<8x32xf32>
    %397 = arith.addf %396, %395 : vector<8x32xf32>
    %398 = arith.divf %396, %397 : vector<8x32xf32>
    %399 = vector.extract_strided_slice %388 {offsets = [0, 32], sizes = [8, 32], strides = [1, 1]} : vector<8x96xf32> to vector<8x32xf32>
    %400 = vector.extract_strided_slice %390 {offsets = [0, 32], sizes = [8, 32], strides = [1, 1]} : vector<8x96xf32> to vector<8x32xf32>
    %401 = arith.addf %399, %400 : vector<8x32xf32>
    %402 = arith.negf %401 : vector<8x32xf32>
    %403 = math.exp %402 : vector<8x32xf32>
    %cst_99 = arith.constant 1.000000e+00 : f32
    %404 = vector.broadcast %cst_99 : f32 to vector<8x32xf32>
    %405 = arith.addf %404, %403 : vector<8x32xf32>
    %406 = arith.divf %404, %405 : vector<8x32xf32>
    %407 = vector.extract_strided_slice %388 {offsets = [0, 64], sizes = [8, 32], strides = [1, 1]} : vector<8x96xf32> to vector<8x32xf32>
    %408 = vector.extract_strided_slice %390 {offsets = [0, 64], sizes = [8, 32], strides = [1, 1]} : vector<8x96xf32> to vector<8x32xf32>
    %409 = arith.mulf %398, %408 : vector<8x32xf32>
    %410 = arith.addf %407, %409 : vector<8x32xf32>
    %411 = math.tanh %410 : vector<8x32xf32>
    %cst_100 = arith.constant 1.000000e+00 : f32
    %412 = vector.broadcast %cst_100 : f32 to vector<8x32xf32>
    %413 = arith.subf %412, %406 : vector<8x32xf32>
    %414 = arith.mulf %413, %411 : vector<8x32xf32>
    %415 = arith.mulf %406, %384 : vector<8x32xf32>
    %416 = arith.addf %414, %415 : vector<8x32xf32>
    %c4_i32_101 = arith.constant 4 : i32
    %c8_i32_102 = arith.constant 8 : i32
    %417 = arith.muli %c4_i32_101, %c8_i32_102 : i32
    %418 = tpu.assume_multiple %417, 8 : i32
    %419 = arith.index_cast %418 : i32 to index
    %c0_103 = arith.constant 0 : index
    %420 = vector.load %arg10[%419, %c0_103] : memref<64x96xf32, #tpu.memory_space<vmem>>, vector<8x96xf32>
    %cst_104 = arith.constant dense<0.000000e+00> : vector<8x96xf32>
    %421 = tpu.matmul %416, %284, %cst_104 {dimension_numbers = #tpu.dot_dimension_numbers<[1], [0], [0], [1], [0, 0, 1, 1], [], []>, precision = #tpu.contract_precision<fp32>} : vector<8x32xf32>, vector<32x96xf32>, vector<8x96xf32> -> vector<8x96xf32>
    %422 = arith.addf %421, %287 : vector<8x96xf32>
    %423 = vector.extract_strided_slice %420 {offsets = [0, 0], sizes = [8, 32], strides = [1, 1]} : vector<8x96xf32> to vector<8x32xf32>
    %424 = vector.extract_strided_slice %422 {offsets = [0, 0], sizes = [8, 32], strides = [1, 1]} : vector<8x96xf32> to vector<8x32xf32>
    %425 = arith.addf %423, %424 : vector<8x32xf32>
    %426 = arith.negf %425 : vector<8x32xf32>
    %427 = math.exp %426 : vector<8x32xf32>
    %cst_105 = arith.constant 1.000000e+00 : f32
    %428 = vector.broadcast %cst_105 : f32 to vector<8x32xf32>
    %429 = arith.addf %428, %427 : vector<8x32xf32>
    %430 = arith.divf %428, %429 : vector<8x32xf32>
    %431 = vector.extract_strided_slice %420 {offsets = [0, 32], sizes = [8, 32], strides = [1, 1]} : vector<8x96xf32> to vector<8x32xf32>
    %432 = vector.extract_strided_slice %422 {offsets = [0, 32], sizes = [8, 32], strides = [1, 1]} : vector<8x96xf32> to vector<8x32xf32>
    %433 = arith.addf %431, %432 : vector<8x32xf32>
    %434 = arith.negf %433 : vector<8x32xf32>
    %435 = math.exp %434 : vector<8x32xf32>
    %cst_106 = arith.constant 1.000000e+00 : f32
    %436 = vector.broadcast %cst_106 : f32 to vector<8x32xf32>
    %437 = arith.addf %436, %435 : vector<8x32xf32>
    %438 = arith.divf %436, %437 : vector<8x32xf32>
    %439 = vector.extract_strided_slice %420 {offsets = [0, 64], sizes = [8, 32], strides = [1, 1]} : vector<8x96xf32> to vector<8x32xf32>
    %440 = vector.extract_strided_slice %422 {offsets = [0, 64], sizes = [8, 32], strides = [1, 1]} : vector<8x96xf32> to vector<8x32xf32>
    %441 = arith.mulf %430, %440 : vector<8x32xf32>
    %442 = arith.addf %439, %441 : vector<8x32xf32>
    %443 = math.tanh %442 : vector<8x32xf32>
    %cst_107 = arith.constant 1.000000e+00 : f32
    %444 = vector.broadcast %cst_107 : f32 to vector<8x32xf32>
    %445 = arith.subf %444, %438 : vector<8x32xf32>
    %446 = arith.mulf %445, %443 : vector<8x32xf32>
    %447 = arith.mulf %438, %416 : vector<8x32xf32>
    %448 = arith.addf %446, %447 : vector<8x32xf32>
    %c5_i32_108 = arith.constant 5 : i32
    %c8_i32_109 = arith.constant 8 : i32
    %449 = arith.muli %c5_i32_108, %c8_i32_109 : i32
    %450 = tpu.assume_multiple %449, 8 : i32
    %451 = arith.index_cast %450 : i32 to index
    %c0_110 = arith.constant 0 : index
    %452 = vector.load %arg10[%451, %c0_110] : memref<64x96xf32, #tpu.memory_space<vmem>>, vector<8x96xf32>
    %cst_111 = arith.constant dense<0.000000e+00> : vector<8x96xf32>
    %453 = tpu.matmul %448, %284, %cst_111 {dimension_numbers = #tpu.dot_dimension_numbers<[1], [0], [0], [1], [0, 0, 1, 1], [], []>, precision = #tpu.contract_precision<fp32>} : vector<8x32xf32>, vector<32x96xf32>, vector<8x96xf32> -> vector<8x96xf32>
    %454 = arith.addf %453, %287 : vector<8x96xf32>
    %455 = vector.extract_strided_slice %452 {offsets = [0, 0], sizes = [8, 32], strides = [1, 1]} : vector<8x96xf32> to vector<8x32xf32>
    %456 = vector.extract_strided_slice %454 {offsets = [0, 0], sizes = [8, 32], strides = [1, 1]} : vector<8x96xf32> to vector<8x32xf32>
    %457 = arith.addf %455, %456 : vector<8x32xf32>
    %458 = arith.negf %457 : vector<8x32xf32>
    %459 = math.exp %458 : vector<8x32xf32>
    %cst_112 = arith.constant 1.000000e+00 : f32
    %460 = vector.broadcast %cst_112 : f32 to vector<8x32xf32>
    %461 = arith.addf %460, %459 : vector<8x32xf32>
    %462 = arith.divf %460, %461 : vector<8x32xf32>
    %463 = vector.extract_strided_slice %452 {offsets = [0, 32], sizes = [8, 32], strides = [1, 1]} : vector<8x96xf32> to vector<8x32xf32>
    %464 = vector.extract_strided_slice %454 {offsets = [0, 32], sizes = [8, 32], strides = [1, 1]} : vector<8x96xf32> to vector<8x32xf32>
    %465 = arith.addf %463, %464 : vector<8x32xf32>
    %466 = arith.negf %465 : vector<8x32xf32>
    %467 = math.exp %466 : vector<8x32xf32>
    %cst_113 = arith.constant 1.000000e+00 : f32
    %468 = vector.broadcast %cst_113 : f32 to vector<8x32xf32>
    %469 = arith.addf %468, %467 : vector<8x32xf32>
    %470 = arith.divf %468, %469 : vector<8x32xf32>
    %471 = vector.extract_strided_slice %452 {offsets = [0, 64], sizes = [8, 32], strides = [1, 1]} : vector<8x96xf32> to vector<8x32xf32>
    %472 = vector.extract_strided_slice %454 {offsets = [0, 64], sizes = [8, 32], strides = [1, 1]} : vector<8x96xf32> to vector<8x32xf32>
    %473 = arith.mulf %462, %472 : vector<8x32xf32>
    %474 = arith.addf %471, %473 : vector<8x32xf32>
    %475 = math.tanh %474 : vector<8x32xf32>
    %cst_114 = arith.constant 1.000000e+00 : f32
    %476 = vector.broadcast %cst_114 : f32 to vector<8x32xf32>
    %477 = arith.subf %476, %470 : vector<8x32xf32>
    %478 = arith.mulf %477, %475 : vector<8x32xf32>
    %479 = arith.mulf %470, %448 : vector<8x32xf32>
    %480 = arith.addf %478, %479 : vector<8x32xf32>
    %c6_i32_115 = arith.constant 6 : i32
    %c8_i32_116 = arith.constant 8 : i32
    %481 = arith.muli %c6_i32_115, %c8_i32_116 : i32
    %482 = tpu.assume_multiple %481, 8 : i32
    %483 = arith.index_cast %482 : i32 to index
    %c0_117 = arith.constant 0 : index
    %484 = vector.load %arg10[%483, %c0_117] : memref<64x96xf32, #tpu.memory_space<vmem>>, vector<8x96xf32>
    %cst_118 = arith.constant dense<0.000000e+00> : vector<8x96xf32>
    %485 = tpu.matmul %480, %284, %cst_118 {dimension_numbers = #tpu.dot_dimension_numbers<[1], [0], [0], [1], [0, 0, 1, 1], [], []>, precision = #tpu.contract_precision<fp32>} : vector<8x32xf32>, vector<32x96xf32>, vector<8x96xf32> -> vector<8x96xf32>
    %486 = arith.addf %485, %287 : vector<8x96xf32>
    %487 = vector.extract_strided_slice %484 {offsets = [0, 0], sizes = [8, 32], strides = [1, 1]} : vector<8x96xf32> to vector<8x32xf32>
    %488 = vector.extract_strided_slice %486 {offsets = [0, 0], sizes = [8, 32], strides = [1, 1]} : vector<8x96xf32> to vector<8x32xf32>
    %489 = arith.addf %487, %488 : vector<8x32xf32>
    %490 = arith.negf %489 : vector<8x32xf32>
    %491 = math.exp %490 : vector<8x32xf32>
    %cst_119 = arith.constant 1.000000e+00 : f32
    %492 = vector.broadcast %cst_119 : f32 to vector<8x32xf32>
    %493 = arith.addf %492, %491 : vector<8x32xf32>
    %494 = arith.divf %492, %493 : vector<8x32xf32>
    %495 = vector.extract_strided_slice %484 {offsets = [0, 32], sizes = [8, 32], strides = [1, 1]} : vector<8x96xf32> to vector<8x32xf32>
    %496 = vector.extract_strided_slice %486 {offsets = [0, 32], sizes = [8, 32], strides = [1, 1]} : vector<8x96xf32> to vector<8x32xf32>
    %497 = arith.addf %495, %496 : vector<8x32xf32>
    %498 = arith.negf %497 : vector<8x32xf32>
    %499 = math.exp %498 : vector<8x32xf32>
    %cst_120 = arith.constant 1.000000e+00 : f32
    %500 = vector.broadcast %cst_120 : f32 to vector<8x32xf32>
    %501 = arith.addf %500, %499 : vector<8x32xf32>
    %502 = arith.divf %500, %501 : vector<8x32xf32>
    %503 = vector.extract_strided_slice %484 {offsets = [0, 64], sizes = [8, 32], strides = [1, 1]} : vector<8x96xf32> to vector<8x32xf32>
    %504 = vector.extract_strided_slice %486 {offsets = [0, 64], sizes = [8, 32], strides = [1, 1]} : vector<8x96xf32> to vector<8x32xf32>
    %505 = arith.mulf %494, %504 : vector<8x32xf32>
    %506 = arith.addf %503, %505 : vector<8x32xf32>
    %507 = math.tanh %506 : vector<8x32xf32>
    %cst_121 = arith.constant 1.000000e+00 : f32
    %508 = vector.broadcast %cst_121 : f32 to vector<8x32xf32>
    %509 = arith.subf %508, %502 : vector<8x32xf32>
    %510 = arith.mulf %509, %507 : vector<8x32xf32>
    %511 = arith.mulf %502, %480 : vector<8x32xf32>
    %512 = arith.addf %510, %511 : vector<8x32xf32>
    %c7_i32_122 = arith.constant 7 : i32
    %c8_i32_123 = arith.constant 8 : i32
    %513 = arith.muli %c7_i32_122, %c8_i32_123 : i32
    %514 = tpu.assume_multiple %513, 8 : i32
    %515 = arith.index_cast %514 : i32 to index
    %c0_124 = arith.constant 0 : index
    %516 = vector.load %arg10[%515, %c0_124] : memref<64x96xf32, #tpu.memory_space<vmem>>, vector<8x96xf32>
    %cst_125 = arith.constant dense<0.000000e+00> : vector<8x96xf32>
    %517 = tpu.matmul %512, %284, %cst_125 {dimension_numbers = #tpu.dot_dimension_numbers<[1], [0], [0], [1], [0, 0, 1, 1], [], []>, precision = #tpu.contract_precision<fp32>} : vector<8x32xf32>, vector<32x96xf32>, vector<8x96xf32> -> vector<8x96xf32>
    %518 = arith.addf %517, %287 : vector<8x96xf32>
    %519 = vector.extract_strided_slice %516 {offsets = [0, 0], sizes = [8, 32], strides = [1, 1]} : vector<8x96xf32> to vector<8x32xf32>
    %520 = vector.extract_strided_slice %518 {offsets = [0, 0], sizes = [8, 32], strides = [1, 1]} : vector<8x96xf32> to vector<8x32xf32>
    %521 = arith.addf %519, %520 : vector<8x32xf32>
    %522 = arith.negf %521 : vector<8x32xf32>
    %523 = math.exp %522 : vector<8x32xf32>
    %cst_126 = arith.constant 1.000000e+00 : f32
    %524 = vector.broadcast %cst_126 : f32 to vector<8x32xf32>
    %525 = arith.addf %524, %523 : vector<8x32xf32>
    %526 = arith.divf %524, %525 : vector<8x32xf32>
    %527 = vector.extract_strided_slice %516 {offsets = [0, 32], sizes = [8, 32], strides = [1, 1]} : vector<8x96xf32> to vector<8x32xf32>
    %528 = vector.extract_strided_slice %518 {offsets = [0, 32], sizes = [8, 32], strides = [1, 1]} : vector<8x96xf32> to vector<8x32xf32>
    %529 = arith.addf %527, %528 : vector<8x32xf32>
    %530 = arith.negf %529 : vector<8x32xf32>
    %531 = math.exp %530 : vector<8x32xf32>
    %cst_127 = arith.constant 1.000000e+00 : f32
    %532 = vector.broadcast %cst_127 : f32 to vector<8x32xf32>
    %533 = arith.addf %532, %531 : vector<8x32xf32>
    %534 = arith.divf %532, %533 : vector<8x32xf32>
    %535 = vector.extract_strided_slice %516 {offsets = [0, 64], sizes = [8, 32], strides = [1, 1]} : vector<8x96xf32> to vector<8x32xf32>
    %536 = vector.extract_strided_slice %518 {offsets = [0, 64], sizes = [8, 32], strides = [1, 1]} : vector<8x96xf32> to vector<8x32xf32>
    %537 = arith.mulf %526, %536 : vector<8x32xf32>
    %538 = arith.addf %535, %537 : vector<8x32xf32>
    %539 = math.tanh %538 : vector<8x32xf32>
    %cst_128 = arith.constant 1.000000e+00 : f32
    %540 = vector.broadcast %cst_128 : f32 to vector<8x32xf32>
    %541 = arith.subf %540, %534 : vector<8x32xf32>
    %542 = arith.mulf %541, %539 : vector<8x32xf32>
    %543 = arith.mulf %534, %512 : vector<8x32xf32>
    %544 = arith.addf %542, %543 : vector<8x32xf32>
    %c8_i32_129 = arith.constant 8 : i32
    %c0_130 = arith.constant 0 : index
    %c0_131 = arith.constant 0 : index
    %545 = vector.load %arg7[%c0_130, %c0_131] : memref<32x4xf32, #tpu.memory_space<vmem>>, vector<32x4xf32>
    %cst_132 = arith.constant dense<0.000000e+00> : vector<8x4xf32>
    %546 = tpu.matmul %544, %545, %cst_132 {dimension_numbers = #tpu.dot_dimension_numbers<[1], [0], [0], [1], [0, 0, 1, 1], [], []>, precision = #tpu.contract_precision<fp32>} : vector<8x32xf32>, vector<32x4xf32>, vector<8x4xf32> -> vector<8x4xf32>
    %c0_133 = arith.constant 0 : index
    %c0_134 = arith.constant 0 : index
    %547 = vector.load %arg8[%c0_133, %c0_134] : memref<1x4xf32, #tpu.memory_space<vmem>>, vector<1x4xf32>
    %548 = vector.broadcast %547 : vector<1x4xf32> to vector<8x4xf32>
    %549 = arith.addf %546, %548 : vector<8x4xf32>
    %c0_135 = arith.constant 0 : index
    %c0_136 = arith.constant 0 : index
    %550 = vector.load %arg9[%c0_135, %c0_136] : memref<8x4xf32, #tpu.memory_space<vmem>>, vector<8x4xf32>
    tpu.vector_store %arg9[%c0_135, %c0_136], %549 {strides = array<i32>} : memref<8x4xf32, #tpu.memory_space<vmem>>, vector<8x4xf32>,
    return
  }
}

</mosaic_0001>

<bundles_post_ra>
// kernel: gru_model_forward.1
= control target key start
LH: loop header
LB: loop body
LE: loop exit
PB: predicated region body
PF: predicated region fallthrough
CT: control target
= control target key end

     0   :  { %v12552_v0 = vmov 0.0|0.0   ;;  %vm12553_vm0 = vmmov 0   ;;  %v12554_v4 = vmov 0.0   ;;  %s12555_s18 = smov 64   ;;  %s12556_s21 = smov 96   ;;  %vm44_vm1 = vcmask 261120   ;;  %s13729_s1 = inlined_call_operand.vmem [shape: f32[32,96], index: 1, kind: input, shape index: {}]   ;;  %s13730_s2 = inlined_call_operand.vmem [shape: f32[1,96], index: 2, kind: input, shape index: {}]   ;;  %s13731_s0 = inlined_call_operand.vmem [shape: f32[64,96], index: 0, kind: input, shape index: {}]   ;;  %s13732_s5 = inlined_call_operand.vmem [shape: f32[32,96], index: 5, kind: input, shape index: {}]   ;;  %s13733_s3 = inlined_call_operand.vmem [shape: f32[32,96], index: 3, kind: input, shape index: {}]   ;;  %s13734_s6 = inlined_call_operand.vmem [shape: f32[1,96], index: 6, kind: input, shape index: {}]   ;;  %s13735_s4 = inlined_call_operand.vmem [shape: f32[1,96], index: 4, kind: input, shape index: {}]   ;;  %s13736_s7 = inlined_call_operand.vmem [shape: f32[32,4], index: 7, kind: input, shape index: {}]   ;;  %s13737_s8 = inlined_call_operand.vmem [shape: f32[1,4], index: 8, kind: input, shape index: {}]   ;;  %s13738_s9 = inlined_call_operand.vmem [shape: f32[8,4], index: 9, kind: output, shape index: {}]  }
   0x1   :  { %11562 = vmatprep.subr.bf16.mxu0 %v12552_v0  ;;  %v32_v1 = vld [vmem:[%s13729_s1] sm:$0xff]  ;;  %v33_v2 = vld [vmem:[%s13729_s1 + $0x8] sm:$0xff]  ;;  %v34_v3 = vld [vmem:[%s13729_s1 + $0x10] sm:$0xff]  ;;  %10333 = vmatprep.mubr.msk.f32.mxu0 %vm12553_vm0, %v12554_v4  ;;  %vm5040_vm2 = vcmask 785408   ;;  %vm9699_vm3 = vcmask 31744  }
   0x2   :  { %v49_v5 = vand.u32 4294901760, %v32_v1  ;;  %v52_v6 = vand.u32 4294901760, %v33_v2  ;;  %v35_v7 = vld [vmem:[%s13729_s1 + $0x18] sm:$0xff]  ;;  %v55_v8 = vand.u32 4294901760, %v34_v3  ;;  %11556 = vmatprep.subr.bf16.mxu1 %v12552_v0  ;;  %10322 = vmatprep.mubr.msk.f32.mxu1 %vm12553_vm0, %v12554_v4  ;;  %v12694_v36 = vld [vmem:[%s13730_s2] ss:$0 sm:$0xff] }
   0x3   :  { %v58_v9 = vand.u32 4294901760, %v35_v7  ;;  %v43_v41 = vld [vmem:[%s13731_s0] sm:$0xff] }
   0x4   :  { %v12625_v10 = vpack.c.bf16 %v52_v6, %v49_v5  ;;  %v129_v11 = vsub.f32 %v32_v1, %v49_v5  ;;  %v136_v12 = vsub.f32 %v33_v2, %v52_v6  ;;  %v143_v13 = vsub.f32 %v34_v3, %v55_v8  ;;  %v9707_v5 = vld [vmem:[%s13731_s0 + $0x8] sm:$0xff] }
   0x5   :  { %v150_v14 = vsub.f32 %v35_v7, %v58_v9  ;;  %v12629_v21 = vpack.c.bf16 %v58_v9, %v55_v8 }
   0x6   :  { %v130_v15 = vand.u32 4294901760, %v129_v11  ;;  %v137_v16 = vand.u32 4294901760, %v136_v12  ;;  %v144_v17 = vand.u32 4294901760, %v143_v13  ;;  %11558 = vmatpush3.bf16.msra.mxu1 %v12625_v10  ;;  %v12645_v30 = vpack.c.bf16 %v136_v12, %v129_v11 }
   0x7   :  { %v151_v18 = vand.u32 4294901760, %v150_v14  ;;  %11559 = vmatprep.subr.bf16.mxu1 %v12552_v0  ;;  %v12652_v31 = vpack.c.bf16 %v150_v14, %v143_v13 }
   0x8   :  { %v131_v19 = vsub.f32 %v129_v11, %v130_v15  ;;  %v138_v20 = vsub.f32 %v136_v12, %v137_v16  ;;  %v145_v22 = vsub.f32 %v143_v13, %v144_v17  ;;  %v12665_v32 = vpack.c.bf16 %v137_v16, %v130_v15 }
   0x9   :  { %v152_v23 = vsub.f32 %v150_v14, %v151_v18  ;;  %v12670_v33 = vpack.c.bf16 %v151_v18, %v144_v17 }
   0xa   :  { %v132_v24 = vand.u32 4294901760, %v131_v19  ;;  %v139_v25 = vand.u32 4294901760, %v138_v20  ;;  %v146_v26 = vand.u32 4294901760, %v145_v22  ;;  %11561 = vmatpush3.bf16.msra.mxu1 %v12629_v21 }
   0xb   :  { %v153_v27 = vand.u32 4294901760, %v152_v23  ;;  %11592 = vmatprep.subr.bf16.mxu1 %v12552_v0 }
   0xc   :  { %v12633_v28 = vpack.c.bf16 %v139_v25, %v132_v24 }
   0xd   :  { %10323 = vmatmul.mubr.f32.vlgmr.msra.gmra.mrb[0].mxu1 %v12554_v4  ;;  %v12637_v29 = vpack.c.bf16 %v153_v27, %v146_v26 }
   0xe   :  { %11564 = vmatpush3.bf16.msra.mxu0 %v12633_v28  ;;  %11594 = vmatpush3.bf16.msra.mxu1 %v12625_v10 }
   0xf   :  { %11565 = vmatprep.subr.bf16.mxu0 %v12552_v0  ;;  %11595 = vmatprep.subr.bf16.mxu1 %v12552_v0 }
  0x10   :  { %10388 = vmatprep.mubr.msk.f32.mxu1 %vm12553_vm0, %v12554_v4 }
  0x12   :  { %11567 = vmatpush3.bf16.msra.mxu0 %v12637_v29  ;;  %11597 = vmatpush3.bf16.msra.mxu1 %v12629_v21 }
  0x13   :  { %11568 = vmatprep.subr.bf16.mxu0 %v12552_v0  ;;  %11598 = vmatprep.subr.bf16.mxu1 %v12552_v0 }
  0x15   :  { %10334 = vmatmul.mubr.f32.vlgmr.msra.gmra.mrb[0].mxu0 %v12554_v4 }
  0x16   :  { %11570 = vmatpush3.bf16.msra.mxu0 %v12645_v30  ;;  %10344 = vmatprep.mubr.msk.f32.mxu0 %vm12553_vm0, %v12554_v4 }
  0x17   :  { %11571 = vmatprep.subr.bf16.mxu0 %v12552_v0 }
  0x1a   :  { %11573 = vmatpush3.bf16.msra.mxu0 %v12652_v31 }
  0x1b   :  { %11574 = vmatprep.subr.bf16.mxu0 %v12552_v0 }
  0x1d   :  { %10345 = vmatmul.mubr.f32.vlgmr.msra.gmra.mrb[0].mxu0 %v12554_v4 }
  0x1e   :  { %11576 = vmatpush3.bf16.msra.mxu0 %v12625_v10  ;;  %10355 = vmatprep.mubr.msk.f32.mxu0 %vm12553_vm0, %v12554_v4 }
  0x1f   :  { %11577 = vmatprep.subr.bf16.mxu0 %v12552_v0 }
  0x22   :  { %11579 = vmatpush3.bf16.msra.mxu0 %v12629_v21 }
  0x23   :  { %11580 = vmatprep.subr.bf16.mxu0 %v12552_v0 }
  0x25   :  { %10356 = vmatmul.mubr.f32.vlgmr.msra.gmra.mrb[0].mxu0 %v12554_v4 }
  0x26   :  { %11582 = vmatpush3.bf16.msra.mxu0 %v12665_v32  ;;  %10366 = vmatprep.mubr.msk.f32.mxu0 %vm12553_vm0, %v12554_v4 }
  0x27   :  { %11583 = vmatprep.subr.bf16.mxu0 %v12552_v0 }
  0x2a   :  { %11585 = vmatpush3.bf16.msra.mxu0 %v12670_v33 }
  0x2b   :  { %11586 = vmatprep.subr.bf16.mxu0 %v12552_v0 }
  0x2d   :  { %10367 = vmatmul.mubr.f32.vlgmr.msra.gmra.mrb[0].mxu0 %v12554_v4 }
  0x2e   :  { %11588 = vmatpush3.bf16.msra.mxu0 %v12625_v10  ;;  %10377 = vmatprep.mubr.msk.f32.mxu0 %vm12553_vm0, %v12554_v4 }
  0x2f   :  { %11589 = vmatprep.subr.bf16.mxu0 %v12552_v0 }
  0x32   :  { %11591 = vmatpush3.bf16.msra.mxu0 %v12629_v21 }
  0x33   :  { %11628 = vmatprep.subr.bf16.mxu0 %v12552_v0 }
  0x35   :  { %10378 = vmatmul.mubr.f32.vlgmr.msra.gmra.mrb[0].mxu0 %v12554_v4 }
  0x36   :  { %11630 = vmatpush3.bf16.msra.mxu0 %v12625_v10  ;;  %10454 = vmatprep.mubr.msk.f32.mxu0 %vm12553_vm0, %v12554_v4 }
  0x37   :  { %11631 = vmatprep.subr.bf16.mxu0 %v12552_v0 }
  0x3a   :  { %11633 = vmatpush3.bf16.msra.mxu0 %v12629_v21 }
  0x3b   :  { %11634 = vmatprep.subr.bf16.mxu0 %v12552_v0 }
  0xe0   :  { %v123_v34 = vpop.f32.mrb[0].mxu1 }
  0xe1   :  { %v10324_v35 = vpop.f32.mrb[1].mxu1  ;;  %v124_v37 = vadd.f32 %v12694_v36, %v123_v34 }
 0x108   :  { %v529_v38 = vpop.f32.mrb[0].mxu0 }
 0x109   :  { %v12217_v39 = vadd.f32 %v529_v38, %v124_v37  ;;  %v10379_v40 = vpop.f32.mrb[1].mxu0 }
 0x10a   :  { %v9709_v40 = vld [vmem:[%s13731_s0 + $0x10] sm:$0xff] }
 0x10b   :  { %541 = vrot.lane.b32.xlu0 %v12217_v39, %s12555_s18  ;;  %v533_v42 = vadd.f32 %v12217_v39, %v43_v41 }
 0x10d   :  { %v9706_v43 = vmul.f32 -1.442695, %v533_v42 }
 0x10f   :  { %12455 = vpow2.f32 %v9706_v43 }
 0x119   :  { %v12456_v44 = vpop.eup %12455 }
 0x11a   :  { %v537_v45 = vadd.f32 1.0, %v12456_v44 }
 0x11c   :  { %12457 = vrcp.f32 %v537_v45 }
 0x126   :  { %v12458_v46 = vpop.eup %12457 }
 0x127   :  { %v551_v52 = vsub.f32 1.0, %v12458_v46  ;;  %v557_v54 = vmul.f32 0.0, %v12458_v46 }
 0x17d   :  { %v542_v47 = vpop.permute.xlu0 %541 }
 0x17e   :  { %v544_v48 = vmul.f32 %v12458_v46, %v542_v47 }
 0x180   :  { %546 = vrot.lane.b32.xlu0 %v544_v48, %s12555_s18 }
 0x1f2   :  { %v547_v49 = vpop.permute.xlu0 %546 }
 0x1f3   :  { %v549_v50 = vadd.f32 %v547_v49, %v43_v41 }
 0x1f5   :  { %12459 = vtanh.f32 %v549_v50 }
 0x1ff   :  { %v12460_v51 = vpop.eup %12459 }
 0x200   :  { %553 = vrot.lane.b32.xlu1 %v12460_v51, %s12556_s21 }
 0x272   :  { %v554_v53 = vpop.permute.xlu1 %553 }
 0x273   :  { %v556_v55 = vmul.f32 %v554_v53, %v551_v52 }
 0x275   :  { %v12703_v56 = vadd.f32 %v557_v54, %v556_v55 }
 0x277   :  { %560 = vrot.lane.b32.xlu1 %v12703_v56, %s12556_s21 }
 0x2e9   :  { %v561_v57 = vpop.permute.xlu1 %560 }
 0x2ea   :  { %563 = vst.msk [vmem:[#allocation3] sm:$0xff] %vm44_vm1, %v561_v57  ;;  %v566_v58 = vsel %vm44_vm1, %v561_v57, 0 }
 0x2eb   :  { %v637_v59 = vand.u32 4294901760, %v566_v58 }
 0x2ed   :  { %v638_v60 = vsub.f32 %v566_v58, %v637_v59 }
 0x2ef   :  { %v639_v61 = vand.u32 4294901760, %v638_v60 }
 0x2f1   :  { %v640_v62 = vsub.f32 %v638_v60, %v639_v61 }
 0x2f3   :  { %v641_v63 = vand.u32 4294901760, %v640_v62 }
 0x2f5   :  { %10389 = vmatmul.mubr.f32.vlgmr.msra.gmra.mrb[2].mxu1 %v641_v63 }
 0x2f6   :  { %11600 = vmatpush3.bf16.msra.mxu1 %v12633_v28  ;;  %10399 = vmatprep.mubr.msk.f32.mxu1 %vm12553_vm0, %v12554_v4 }
 0x2f7   :  { %11601 = vmatprep.subr.bf16.mxu1 %v12552_v0 }
 0x2fa   :  { %11603 = vmatpush3.bf16.msra.mxu1 %v12637_v29 }
 0x2fb   :  { %11604 = vmatprep.subr.bf16.mxu1 %v12552_v0 }
 0x2fd   :  { %10400 = vmatmul.mubr.f32.vlgmr.msra.gmra.mrb[2].mxu1 %v637_v59 }
 0x2fe   :  { %11606 = vmatpush3.bf16.msra.mxu1 %v12645_v30  ;;  %10410 = vmatprep.mubr.msk.f32.mxu1 %vm12553_vm0, %v12554_v4 }
 0x2ff   :  { %11607 = vmatprep.subr.bf16.mxu1 %v12552_v0 }
 0x302   :  { %11609 = vmatpush3.bf16.msra.mxu1 %v12652_v31 }
 0x303   :  { %11610 = vmatprep.subr.bf16.mxu1 %v12552_v0 }
 0x305   :  { %10411 = vmatmul.mubr.f32.vlgmr.msra.gmra.mrb[2].mxu1 %v638_v60 }
 0x306   :  { %11612 = vmatpush3.bf16.msra.mxu1 %v12625_v10  ;;  %10421 = vmatprep.mubr.msk.f32.mxu1 %vm12553_vm0, %v12554_v4 }
 0x307   :  { %11613 = vmatprep.subr.bf16.mxu1 %v12552_v0 }
 0x30a   :  { %11615 = vmatpush3.bf16.msra.mxu1 %v12629_v21 }
 0x30b   :  { %11616 = vmatprep.subr.bf16.mxu1 %v12552_v0 }
 0x30d   :  { %10422 = vmatmul.mubr.f32.vlgmr.msra.gmra.mrb[2].mxu1 %v639_v61 }
 0x30e   :  { %11618 = vmatpush3.bf16.msra.mxu1 %v12665_v32  ;;  %10432 = vmatprep.mubr.msk.f32.mxu1 %vm12553_vm0, %v12554_v4 }
 0x30f   :  { %11619 = vmatprep.subr.bf16.mxu1 %v12552_v0 }
 0x312   :  { %11621 = vmatpush3.bf16.msra.mxu1 %v12670_v33 }
 0x313   :  { %11622 = vmatprep.subr.bf16.mxu1 %v12552_v0 }
 0x315   :  { %10433 = vmatmul.mubr.f32.vlgmr.msra.gmra.mrb[2].mxu1 %v637_v59 }
 0x316   :  { %11624 = vmatpush3.bf16.msra.mxu1 %v12625_v10  ;;  %10443 = vmatprep.mubr.msk.f32.mxu1 %vm12553_vm0, %v12554_v4 }
 0x317   :  { %11625 = vmatprep.subr.bf16.mxu1 %v12552_v0 }
 0x31a   :  { %11627 = vmatpush3.bf16.msra.mxu1 %v12629_v21 }
 0x31b   :  { %11664 = vmatprep.subr.bf16.mxu1 %v12552_v0 }
 0x31d   :  { %10444 = vmatmul.mubr.f32.vlgmr.msra.gmra.mrb[2].mxu1 %v637_v59 }
 0x31e   :  { %11666 = vmatpush3.bf16.msra.mxu1 %v12625_v10  ;;  %10520 = vmatprep.mubr.msk.f32.mxu1 %vm12553_vm0, %v12554_v4 }
 0x31f   :  { %11667 = vmatprep.subr.bf16.mxu1 %v12552_v0 }
 0x322   :  { %11669 = vmatpush3.bf16.msra.mxu1 %v12629_v21 }
 0x323   :  { %11670 = vmatprep.subr.bf16.mxu1 %v12552_v0 }
 0x3f0   :  { %v1049_v1 = vpop.f32.mrb[2].mxu1 }
 0x3f1   :  { %v12218_v2 = vadd.f32 %v12694_v36, %v1049_v1  ;;  %v10445_v3 = vpop.f32.mrb[3].mxu1 }
 0x3f2   :  { %v9711_v3 = vld [vmem:[%s13731_s0 + $0x18] sm:$0xff] }
 0x3f3   :  { %1061 = vrot.lane.b32.xlu0 %v12218_v2, %s12555_s18  ;;  %v1053_v6 = vadd.f32 %v12218_v2, %v9707_v5 }
 0x3f5   :  { %v9708_v7 = vmul.f32 -1.442695, %v1053_v6 }
 0x3f7   :  { %12461 = vpow2.f32 %v9708_v7 }
 0x401   :  { %v12462_v8 = vpop.eup %12461 }
 0x402   :  { %v1057_v9 = vadd.f32 1.0, %v12462_v8 }
 0x404   :  { %12463 = vrcp.f32 %v1057_v9 }
 0x40e   :  { %v12464_v11 = vpop.eup %12463 }
 0x40f   :  { %v1071_v17 = vsub.f32 1.0, %v12464_v11  ;;  %v1077_v19 = vmul.f32 %v12464_v11, %v12703_v56 }
 0x465   :  { %v1062_v12 = vpop.permute.xlu0 %1061 }
 0x466   :  { %v1064_v13 = vmul.f32 %v12464_v11, %v1062_v12 }
 0x468   :  { %1066 = vrot.lane.b32.xlu1 %v1064_v13, %s12555_s18 }
 0x4da   :  { %v1067_v14 = vpop.permute.xlu1 %1066 }
 0x4db   :  { %v1069_v15 = vadd.f32 %v9707_v5, %v1067_v14 }
 0x4dd   :  { %12465 = vtanh.f32 %v1069_v15 }
 0x4e7   :  { %v12466_v16 = vpop.eup %12465 }
 0x4e8   :  { %1073 = vrot.lane.b32.xlu0 %v12466_v16, %s12556_s21 }
 0x55a   :  { %v1074_v18 = vpop.permute.xlu0 %1073 }
 0x55b   :  { %v1076_v20 = vmul.f32 %v1074_v18, %v1071_v17 }
 0x55d   :  { %v12753_v22 = vadd.f32 %v1077_v19, %v1076_v20 }
 0x55f   :  { %1080 = vrot.lane.b32.xlu1 %v12753_v22, %s12556_s21 }
 0x5d1   :  { %v1081_v23 = vpop.permute.xlu1 %1080 }
 0x5d2   :  { %1084 = vst.msk [vmem:[#allocation3 + $0x8] sm:$0xff] %vm44_vm1, %v1081_v23  ;;  %v1087_v24 = vsel %vm44_vm1, %v1081_v23, 0 }
 0x5d3   :  { %v1158_v25 = vand.u32 4294901760, %v1087_v24 }
 0x5d5   :  { %v1159_v26 = vsub.f32 %v1087_v24, %v1158_v25 }
 0x5d7   :  { %v1160_v27 = vand.u32 4294901760, %v1159_v26 }
 0x5d9   :  { %v1161_v34 = vsub.f32 %v1159_v26, %v1160_v27 }
 0x5db   :  { %v1162_v35 = vand.u32 4294901760, %v1161_v34 }
 0x5dd   :  { %10455 = vmatmul.mubr.f32.vlgmr.msra.gmra.mrb[2].mxu0 %v1162_v35 }
 0x5de   :  { %11636 = vmatpush3.bf16.msra.mxu0 %v12633_v28  ;;  %10465 = vmatprep.mubr.msk.f32.mxu0 %vm12553_vm0, %v12554_v4 }
 0x5df   :  { %11637 = vmatprep.subr.bf16.mxu0 %v12552_v0 }
 0x5e2   :  { %11639 = vmatpush3.bf16.msra.mxu0 %v12637_v29 }
 0x5e3   :  { %11640 = vmatprep.subr.bf16.mxu0 %v12552_v0 }
 0x5e5   :  { %10466 = vmatmul.mubr.f32.vlgmr.msra.gmra.mrb[2].mxu0 %v1158_v25 }
 0x5e6   :  { %11642 = vmatpush3.bf16.msra.mxu0 %v12645_v30  ;;  %10476 = vmatprep.mubr.msk.f32.mxu0 %vm12553_vm0, %v12554_v4 }
 0x5e7   :  { %11643 = vmatprep.subr.bf16.mxu0 %v12552_v0 }
 0x5ea   :  { %11645 = vmatpush3.bf16.msra.mxu0 %v12652_v31 }
 0x5eb   :  { %11646 = vmatprep.subr.bf16.mxu0 %v12552_v0 }
 0x5ed   :  { %10477 = vmatmul.mubr.f32.vlgmr.msra.gmra.mrb[2].mxu0 %v1159_v26 }
 0x5ee   :  { %11648 = vmatpush3.bf16.msra.mxu0 %v12625_v10  ;;  %10487 = vmatprep.mubr.msk.f32.mxu0 %vm12553_vm0, %v12554_v4 }
 0x5ef   :  { %11649 = vmatprep.subr.bf16.mxu0 %v12552_v0 }
 0x5f2   :  { %11651 = vmatpush3.bf16.msra.mxu0 %v12629_v21 }
 0x5f3   :  { %11652 = vmatprep.subr.bf16.mxu0 %v12552_v0 }
 0x5f5   :  { %10488 = vmatmul.mubr.f32.vlgmr.msra.gmra.mrb[2].mxu0 %v1160_v27 }
 0x5f6   :  { %11654 = vmatpush3.bf16.msra.mxu0 %v12665_v32  ;;  %10498 = vmatprep.mubr.msk.f32.mxu0 %vm12553_vm0, %v12554_v4 }
 0x5f7   :  { %11655 = vmatprep.subr.bf16.mxu0 %v12552_v0 }
 0x5fa   :  { %11657 = vmatpush3.bf16.msra.mxu0 %v12670_v33 }
 0x5fb   :  { %11658 = vmatprep.subr.bf16.mxu0 %v12552_v0 }
 0x5fd   :  { %10499 = vmatmul.mubr.f32.vlgmr.msra.gmra.mrb[2].mxu0 %v1158_v25 }
 0x5fe   :  { %11660 = vmatpush3.bf16.msra.mxu0 %v12625_v10  ;;  %10509 = vmatprep.mubr.msk.f32.mxu0 %vm12553_vm0, %v12554_v4 }
 0x5ff   :  { %11661 = vmatprep.subr.bf16.mxu0 %v12552_v0 }
 0x602   :  { %11663 = vmatpush3.bf16.msra.mxu0 %v12629_v21 }
 0x603   :  { %11700 = vmatprep.subr.bf16.mxu0 %v12552_v0 }
 0x605   :  { %10510 = vmatmul.mubr.f32.vlgmr.msra.gmra.mrb[2].mxu0 %v1158_v25 }
 0x606   :  { %11702 = vmatpush3.bf16.msra.mxu0 %v12625_v10  ;;  %10586 = vmatprep.mubr.msk.f32.mxu0 %vm12553_vm0, %v12554_v4 }
 0x607   :  { %11703 = vmatprep.subr.bf16.mxu0 %v12552_v0 }
 0x60a   :  { %11705 = vmatpush3.bf16.msra.mxu0 %v12629_v21 }
 0x60b   :  { %11706 = vmatprep.subr.bf16.mxu0 %v12552_v0 }
 0x6d8   :  { %v1570_v37 = vpop.f32.mrb[2].mxu0 }
 0x6d9   :  { %v12219_v38 = vadd.f32 %v12694_v36, %v1570_v37  ;;  %v10511_v39 = vpop.f32.mrb[3].mxu0 }
 0x6da   :  { %v9713_v39 = vld [vmem:[%s13731_s0 + $0x20] sm:$0xff] }
 0x6db   :  { %1582 = vrot.lane.b32.xlu0 %v12219_v38, %s12555_s18  ;;  %v1574_v41 = vadd.f32 %v12219_v38, %v9709_v40 }
 0x6dd   :  { %v9710_v42 = vmul.f32 -1.442695, %v1574_v41 }
 0x6df   :  { %12467 = vpow2.f32 %v9710_v42 }
 0x6e9   :  { %v12468_v43 = vpop.eup %12467 }
 0x6ea   :  { %v1578_v44 = vadd.f32 1.0, %v12468_v43 }
 0x6ec   :  { %12469 = vrcp.f32 %v1578_v44 }
 0x6f6   :  { %v12470_v45 = vpop.eup %12469 }
 0x6f7   :  { %v1592_v51 = vsub.f32 1.0, %v12470_v45  ;;  %v1598_v53 = vmul.f32 %v12470_v45, %v12753_v22 }
 0x74d   :  { %v1583_v46 = vpop.permute.xlu0 %1582 }
 0x74e   :  { %v1585_v47 = vmul.f32 %v12470_v45, %v1583_v46 }
 0x750   :  { %1587 = vrot.lane.b32.xlu1 %v1585_v47, %s12555_s18 }
 0x7c2   :  { %v1588_v48 = vpop.permute.xlu1 %1587 }
 0x7c3   :  { %v1590_v49 = vadd.f32 %v9709_v40, %v1588_v48 }
 0x7c5   :  { %12471 = vtanh.f32 %v1590_v49 }
 0x7cf   :  { %v12472_v50 = vpop.eup %12471 }
 0x7d0   :  { %1594 = vrot.lane.b32.xlu0 %v12472_v50, %s12556_s21 }
 0x842   :  { %v1595_v52 = vpop.permute.xlu0 %1594 }
 0x843   :  { %v1597_v54 = vmul.f32 %v1595_v52, %v1592_v51 }
 0x845   :  { %v12803_v55 = vadd.f32 %v1598_v53, %v1597_v54 }
 0x847   :  { %1601 = vrot.lane.b32.xlu1 %v12803_v55, %s12556_s21 }
 0x8b9   :  { %v1602_v56 = vpop.permute.xlu1 %1601 }
 0x8ba   :  { %1605 = vst.msk [vmem:[#allocation3 + $0x10] sm:$0xff] %vm44_vm1, %v1602_v56  ;;  %v1608_v57 = vsel %vm44_vm1, %v1602_v56, 0 }
 0x8bb   :  { %v1679_v58 = vand.u32 4294901760, %v1608_v57 }
 0x8bd   :  { %v1680_v59 = vsub.f32 %v1608_v57, %v1679_v58 }
 0x8bf   :  { %v1681_v60 = vand.u32 4294901760, %v1680_v59 }
 0x8c1   :  { %v1682_v61 = vsub.f32 %v1680_v59, %v1681_v60 }
 0x8c3   :  { %v1683_v62 = vand.u32 4294901760, %v1682_v61 }
 0x8c5   :  { %10521 = vmatmul.mubr.f32.vlgmr.msra.gmra.mrb[4].mxu1 %v1683_v62 }
 0x8c6   :  { %11672 = vmatpush3.bf16.msra.mxu1 %v12633_v28  ;;  %10531 = vmatprep.mubr.msk.f32.mxu1 %vm12553_vm0, %v12554_v4 }
 0x8c7   :  { %11673 = vmatprep.subr.bf16.mxu1 %v12552_v0 }
 0x8ca   :  { %11675 = vmatpush3.bf16.msra.mxu1 %v12637_v29 }
 0x8cb   :  { %11676 = vmatprep.subr.bf16.mxu1 %v12552_v0 }
 0x8cd   :  { %10532 = vmatmul.mubr.f32.vlgmr.msra.gmra.mrb[4].mxu1 %v1679_v58 }
 0x8ce   :  { %11678 = vmatpush3.bf16.msra.mxu1 %v12645_v30  ;;  %10542 = vmatprep.mubr.msk.f32.mxu1 %vm12553_vm0, %v12554_v4 }
 0x8cf   :  { %11679 = vmatprep.subr.bf16.mxu1 %v12552_v0 }
 0x8d2   :  { %11681 = vmatpush3.bf16.msra.mxu1 %v12652_v31 }
 0x8d3   :  { %11682 = vmatprep.subr.bf16.mxu1 %v12552_v0 }
 0x8d5   :  { %10543 = vmatmul.mubr.f32.vlgmr.msra.gmra.mrb[4].mxu1 %v1680_v59 }
 0x8d6   :  { %11684 = vmatpush3.bf16.msra.mxu1 %v12625_v10  ;;  %10553 = vmatprep.mubr.msk.f32.mxu1 %vm12553_vm0, %v12554_v4 }
 0x8d7   :  { %11685 = vmatprep.subr.bf16.mxu1 %v12552_v0 }
 0x8da   :  { %11687 = vmatpush3.bf16.msra.mxu1 %v12629_v21 }
 0x8db   :  { %11688 = vmatprep.subr.bf16.mxu1 %v12552_v0 }
 0x8dd   :  { %10554 = vmatmul.mubr.f32.vlgmr.msra.gmra.mrb[4].mxu1 %v1681_v60 }
 0x8de   :  { %11690 = vmatpush3.bf16.msra.mxu1 %v12665_v32  ;;  %10564 = vmatprep.mubr.msk.f32.mxu1 %vm12553_vm0, %v12554_v4 }
 0x8df   :  { %11691 = vmatprep.subr.bf16.mxu1 %v12552_v0 }
 0x8e2   :  { %11693 = vmatpush3.bf16.msra.mxu1 %v12670_v33 }
 0x8e3   :  { %11694 = vmatprep.subr.bf16.mxu1 %v12552_v0 }
 0x8e5   :  { %10565 = vmatmul.mubr.f32.vlgmr.msra.gmra.mrb[4].mxu1 %v1679_v58 }
 0x8e6   :  { %11696 = vmatpush3.bf16.msra.mxu1 %v12625_v10  ;;  %10575 = vmatprep.mubr.msk.f32.mxu1 %vm12553_vm0, %v12554_v4 }
 0x8e7   :  { %11697 = vmatprep.subr.bf16.mxu1 %v12552_v0 }
 0x8ea   :  { %11699 = vmatpush3.bf16.msra.mxu1 %v12629_v21 }
 0x8eb   :  { %11736 = vmatprep.subr.bf16.mxu1 %v12552_v0 }
 0x8ed   :  { %10576 = vmatmul.mubr.f32.vlgmr.msra.gmra.mrb[4].mxu1 %v1679_v58 }
 0x8ee   :  { %11738 = vmatpush3.bf16.msra.mxu1 %v12625_v10  ;;  %10652 = vmatprep.mubr.msk.f32.mxu1 %vm12553_vm0, %v12554_v4 }
 0x8ef   :  { %11739 = vmatprep.subr.bf16.mxu1 %v12552_v0 }
 0x8f2   :  { %11741 = vmatpush3.bf16.msra.mxu1 %v12629_v21 }
 0x8f3   :  { %11742 = vmatprep.subr.bf16.mxu1 %v12552_v0 }
 0x9c0   :  { %v2091_v63 = vpop.f32.mrb[4].mxu1 }
 0x9c1   :  { %v12220_v1 = vadd.f32 %v12694_v36, %v2091_v63  ;;  %v10577_v2 = vpop.f32.mrb[5].mxu1 }
 0x9c2   :  { %v9715_v2 = vld [vmem:[%s13731_s0 + $0x28] sm:$0xff] }
 0x9c3   :  { %2103 = vrot.lane.b32.xlu0 %v12220_v1, %s12555_s18  ;;  %v2095_v5 = vadd.f32 %v12220_v1, %v9711_v3 }
 0x9c5   :  { %v9712_v6 = vmul.f32 -1.442695, %v2095_v5 }
 0x9c7   :  { %12473 = vpow2.f32 %v9712_v6 }
 0x9d1   :  { %v12474_v7 = vpop.eup %12473 }
 0x9d2   :  { %v2099_v8 = vadd.f32 1.0, %v12474_v7 }
 0x9d4   :  { %12475 = vrcp.f32 %v2099_v8 }
 0x9de   :  { %v12476_v9 = vpop.eup %12475 }
 0x9df   :  { %v2113_v16 = vsub.f32 1.0, %v12476_v9  ;;  %v2119_v18 = vmul.f32 %v12476_v9, %v12803_v55 }
 0xa35   :  { %v2104_v11 = vpop.permute.xlu0 %2103 }
 0xa36   :  { %v2106_v12 = vmul.f32 %v12476_v9, %v2104_v11 }
 0xa38   :  { %2108 = vrot.lane.b32.xlu1 %v2106_v12, %s12555_s18 }
 0xaaa   :  { %v2109_v13 = vpop.permute.xlu1 %2108 }
 0xaab   :  { %v2111_v14 = vadd.f32 %v9711_v3, %v2109_v13 }
 0xaad   :  { %12477 = vtanh.f32 %v2111_v14 }
 0xab7   :  { %v12478_v15 = vpop.eup %12477 }
 0xab8   :  { %2115 = vrot.lane.b32.xlu0 %v12478_v15, %s12556_s21 }
 0xb2a   :  { %v2116_v17 = vpop.permute.xlu0 %2115 }
 0xb2b   :  { %v2118_v19 = vmul.f32 %v2116_v17, %v2113_v16 }
 0xb2d   :  { %v12853_v20 = vadd.f32 %v2119_v18, %v2118_v19 }
 0xb2f   :  { %2122 = vrot.lane.b32.xlu1 %v12853_v20, %s12556_s21 }
 0xba1   :  { %v2123_v22 = vpop.permute.xlu1 %2122 }
 0xba2   :  { %2126 = vst.msk [vmem:[#allocation3 + $0x18] sm:$0xff] %vm44_vm1, %v2123_v22  ;;  %v2129_v23 = vsel %vm44_vm1, %v2123_v22, 0  ;;  %v4220_v22 = vld [vmem:[%s13732_s5 + $0x8] sm:$0xff] }
 0xba3   :  { %v2200_v24 = vand.u32 4294901760, %v2129_v23 }
 0xba5   :  { %v2201_v25 = vsub.f32 %v2129_v23, %v2200_v24 }
 0xba7   :  { %v2202_v26 = vand.u32 4294901760, %v2201_v25 }
 0xba9   :  { %v2203_v27 = vsub.f32 %v2201_v25, %v2202_v26 }
 0xbab   :  { %v2204_v34 = vand.u32 4294901760, %v2203_v27 }
 0xbad   :  { %10587 = vmatmul.mubr.f32.vlgmr.msra.gmra.mrb[4].mxu0 %v2204_v34 }
 0xbae   :  { %11708 = vmatpush3.bf16.msra.mxu0 %v12633_v28  ;;  %10597 = vmatprep.mubr.msk.f32.mxu0 %vm12553_vm0, %v12554_v4 }
 0xbaf   :  { %11709 = vmatprep.subr.bf16.mxu0 %v12552_v0 }
 0xbb2   :  { %11711 = vmatpush3.bf16.msra.mxu0 %v12637_v29 }
 0xbb3   :  { %11712 = vmatprep.subr.bf16.mxu0 %v12552_v0 }
 0xbb5   :  { %10598 = vmatmul.mubr.f32.vlgmr.msra.gmra.mrb[4].mxu0 %v2200_v24 }
 0xbb6   :  { %11714 = vmatpush3.bf16.msra.mxu0 %v12645_v30  ;;  %10608 = vmatprep.mubr.msk.f32.mxu0 %vm12553_vm0, %v12554_v4 }
 0xbb7   :  { %11715 = vmatprep.subr.bf16.mxu0 %v12552_v0 }
 0xbba   :  { %11717 = vmatpush3.bf16.msra.mxu0 %v12652_v31 }
 0xbbb   :  { %11718 = vmatprep.subr.bf16.mxu0 %v12552_v0 }
 0xbbd   :  { %10609 = vmatmul.mubr.f32.vlgmr.msra.gmra.mrb[4].mxu0 %v2201_v25  ;;  %v4221_v25 = vld [vmem:[%s13732_s5 + $0x10] sm:$0xff] }
 0xbbe   :  { %11720 = vmatpush3.bf16.msra.mxu0 %v12625_v10  ;;  %10619 = vmatprep.mubr.msk.f32.mxu0 %vm12553_vm0, %v12554_v4  ;;  %v4261_v34 = vand.u32 4294901760, %v4221_v25 }
 0xbbf   :  { %11721 = vmatprep.subr.bf16.mxu0 %v12552_v0 }
 0xbc2   :  { %11723 = vmatpush3.bf16.msra.mxu0 %v12629_v21 }
 0xbc3   :  { %11724 = vmatprep.subr.bf16.mxu0 %v12552_v0 }
 0xbc5   :  { %10620 = vmatmul.mubr.f32.vlgmr.msra.gmra.mrb[4].mxu0 %v2202_v26  ;;  %v4222_v26 = vld [vmem:[%s13732_s5 + $0x18] sm:$0xff] }
 0xbc6   :  { %11726 = vmatpush3.bf16.msra.mxu0 %v12665_v32  ;;  %10630 = vmatprep.mubr.msk.f32.mxu0 %vm12553_vm0, %v12554_v4 }
 0xbc7   :  { %11727 = vmatprep.subr.bf16.mxu0 %v12552_v0 }
 0xbca   :  { %11729 = vmatpush3.bf16.msra.mxu0 %v12670_v33 }
 0xbcb   :  { %11730 = vmatprep.subr.bf16.mxu0 %v12552_v0 }
 0xbcd   :  { %10631 = vmatmul.mubr.f32.vlgmr.msra.gmra.mrb[4].mxu0 %v2200_v24 }
 0xbce   :  { %11732 = vmatpush3.bf16.msra.mxu0 %v12625_v10  ;;  %10641 = vmatprep.mubr.msk.f32.mxu0 %vm12553_vm0, %v12554_v4 }
 0xbcf   :  { %11733 = vmatprep.subr.bf16.mxu0 %v12552_v0 }
 0xbd2   :  { %11735 = vmatpush3.bf16.msra.mxu0 %v12629_v21 }
 0xbd3   :  { %11772 = vmatprep.subr.bf16.mxu0 %v12552_v0 }
 0xbd5   :  { %10642 = vmatmul.mubr.f32.vlgmr.msra.gmra.mrb[4].mxu0 %v2200_v24  ;;  %v4258_v24 = vand.u32 4294901760, %v4220_v22 }
 0xbd6   :  { %11774 = vmatpush3.bf16.msra.mxu0 %v12625_v10  ;;  %10718 = vmatprep.mubr.msk.f32.mxu0 %vm12553_vm0, %v12554_v4 }
 0xbd7   :  { %11775 = vmatprep.subr.bf16.mxu0 %v12552_v0 }
 0xbda   :  { %11777 = vmatpush3.bf16.msra.mxu0 %v12629_v21 }
 0xbdb   :  { %11778 = vmatprep.subr.bf16.mxu0 %v12552_v0 }
 0xca8   :  { %v2612_v35 = vpop.f32.mrb[4].mxu0 }
 0xca9   :  { %v12221_v37 = vadd.f32 %v12694_v36, %v2612_v35  ;;  %v10643_v38 = vpop.f32.mrb[5].mxu0  ;;  %v4264_v35 = vand.u32 4294901760, %v4222_v26 }
 0xcab   :  { %2624 = vrot.lane.b32.xlu0 %v12221_v37, %s12555_s18  ;;  %v2616_v40 = vadd.f32 %v12221_v37, %v9713_v39  ;;  %v12971_v37 = vpack.c.bf16 %v4264_v35, %v4261_v34 }
 0xcad   :  { %v9714_v41 = vmul.f32 -1.442695, %v2616_v40 }
 0xcaf   :  { %12479 = vpow2.f32 %v9714_v41 }
 0xcb9   :  { %v12480_v42 = vpop.eup %12479 }
 0xcba   :  { %v2620_v43 = vadd.f32 1.0, %v12480_v42 }
 0xcbc   :  { %12481 = vrcp.f32 %v2620_v43 }
 0xcc6   :  { %v12482_v44 = vpop.eup %12481 }
 0xcc7   :  { %v2634_v50 = vsub.f32 1.0, %v12482_v44  ;;  %v2640_v52 = vmul.f32 %v12482_v44, %v12853_v20  ;;  %v4219_v20 = vld [vmem:[%s13732_s5] sm:$0xff] }
 0xcc8   :  { %v4255_v23 = vand.u32 4294901760, %v4219_v20 }
 0xcca   :  { %v12969_v27 = vpack.c.bf16 %v4258_v24, %v4255_v23 }
 0xd1d   :  { %v2625_v45 = vpop.permute.xlu0 %2624 }
 0xd1e   :  { %v2627_v46 = vmul.f32 %v12482_v44, %v2625_v45  ;;  %v12991_v45 = vsub.f32 %v4219_v20, %v4255_v23 }
 0xd20   :  { %2629 = vrot.lane.b32.xlu1 %v2627_v46, %s12555_s18  ;;  %v12993_v46 = vsub.f32 %v4220_v22, %v4258_v24 }
 0xd92   :  { %v2630_v47 = vpop.permute.xlu1 %2629 }
 0xd93   :  { %v2632_v48 = vadd.f32 %v9713_v39, %v2630_v47  ;;  %v4406_v47 = vand.u32 4294901760, %v12991_v45 }
 0xd95   :  { %12483 = vtanh.f32 %v2632_v48  ;;  %v4413_v48 = vand.u32 4294901760, %v12993_v46 }
 0xd9f   :  { %v12484_v49 = vpop.eup %12483 }
 0xda0   :  { %2636 = vrot.lane.b32.xlu0 %v12484_v49, %s12556_s21  ;;  %v12999_v49 = vsub.f32 %v4221_v25, %v4261_v34  ;;  %v9717_v25 = vld [vmem:[%s13731_s0 + $0x30] sm:$0xff] }
 0xe12   :  { %v2637_v51 = vpop.permute.xlu0 %2636 }
 0xe13   :  { %v2639_v53 = vmul.f32 %v2637_v51, %v2634_v50  ;;  %v13001_v50 = vsub.f32 %v4222_v26, %v4264_v35  ;;  %v4407_v51 = vsub.f32 %v12991_v45, %v4406_v47 }
 0xe15   :  { %v12903_v54 = vadd.f32 %v2640_v52, %v2639_v53  ;;  %v4414_v52 = vsub.f32 %v12993_v46, %v4413_v48  ;;  %v4420_v53 = vand.u32 4294901760, %v12999_v49 }
 0xe17   :  { %2643 = vrot.lane.b32.xlu1 %v12903_v54, %s12556_s21 }
 0xe89   :  { %v2644_v55 = vpop.permute.xlu1 %2643 }
 0xe8a   :  { %2647 = vst.msk [vmem:[#allocation3 + $0x20] sm:$0xff] %vm44_vm1, %v2644_v55  ;;  %v2650_v56 = vsel %vm44_vm1, %v2644_v55, 0  ;;  %v4408_v55 = vand.u32 4294901760, %v4407_v51 }
 0xe8b   :  { %v2721_v57 = vand.u32 4294901760, %v2650_v56 }
 0xe8d   :  { %v2722_v58 = vsub.f32 %v2650_v56, %v2721_v57  ;;  %v4415_v56 = vand.u32 4294901760, %v4414_v52 }
 0xe8f   :  { %v2723_v59 = vand.u32 4294901760, %v2722_v58 }
 0xe91   :  { %v2724_v60 = vsub.f32 %v2722_v58, %v2723_v59 }
 0xe93   :  { %v2725_v61 = vand.u32 4294901760, %v2724_v60  ;;  %v11852_v60 = vpack.c.bf16 %v4415_v56, %v4408_v55 }
 0xe95   :  { %10653 = vmatmul.mubr.f32.vlgmr.msra.gmra.mrb[6].mxu1 %v2725_v61 }
 0xe96   :  { %11744 = vmatpush3.bf16.msra.mxu1 %v12633_v28  ;;  %10663 = vmatprep.mubr.msk.f32.mxu1 %vm12553_vm0, %v12554_v4 }
 0xe97   :  { %11745 = vmatprep.subr.bf16.mxu1 %v12552_v0 }
 0xe9a   :  { %11747 = vmatpush3.bf16.msra.mxu1 %v12637_v29 }
 0xe9b   :  { %11748 = vmatprep.subr.bf16.mxu1 %v12552_v0 }
 0xe9d   :  { %10664 = vmatmul.mubr.f32.vlgmr.msra.gmra.mrb[6].mxu1 %v2721_v57 }
 0xe9e   :  { %11750 = vmatpush3.bf16.msra.mxu1 %v12645_v30  ;;  %10674 = vmatprep.mubr.msk.f32.mxu1 %vm12553_vm0, %v12554_v4 }
 0xe9f   :  { %11751 = vmatprep.subr.bf16.mxu1 %v12552_v0 }
 0xea2   :  { %11753 = vmatpush3.bf16.msra.mxu1 %v12652_v31 }
 0xea3   :  { %11754 = vmatprep.subr.bf16.mxu1 %v12552_v0 }
 0xea5   :  { %10675 = vmatmul.mubr.f32.vlgmr.msra.gmra.mrb[6].mxu1 %v2722_v58 }
 0xea6   :  { %11756 = vmatpush3.bf16.msra.mxu1 %v12625_v10  ;;  %10685 = vmatprep.mubr.msk.f32.mxu1 %vm12553_vm0, %v12554_v4 }
 0xea7   :  { %11757 = vmatprep.subr.bf16.mxu1 %v12552_v0 }
 0xeaa   :  { %11759 = vmatpush3.bf16.msra.mxu1 %v12629_v21 }
 0xeab   :  { %11760 = vmatprep.subr.bf16.mxu1 %v12552_v0 }
 0xead   :  { %10686 = vmatmul.mubr.f32.vlgmr.msra.gmra.mrb[6].mxu1 %v2723_v59  ;;  %v4211_v59 = vld [vmem:[#allocation3] sm:$0xff] }
 0xeae   :  { %11762 = vmatpush3.bf16.msra.mxu1 %v12665_v32  ;;  %10696 = vmatprep.mubr.msk.f32.mxu1 %vm12553_vm0, %v12554_v4 }
 0xeaf   :  { %11763 = vmatprep.subr.bf16.mxu1 %v12552_v0 }
 0xeb2   :  { %11765 = vmatpush3.bf16.msra.mxu1 %v12670_v33 }
 0xeb3   :  { %11766 = vmatprep.subr.bf16.mxu1 %v12552_v0 }
 0xeb5   :  { %10697 = vmatmul.mubr.f32.vlgmr.msra.gmra.mrb[6].mxu1 %v2721_v57 }
 0xeb6   :  { %11768 = vmatpush3.bf16.msra.mxu1 %v12625_v10  ;;  %10707 = vmatprep.mubr.msk.f32.mxu1 %vm12553_vm0, %v12554_v4 }
 0xeb7   :  { %11769 = vmatprep.subr.bf16.mxu1 %v12552_v0 }
 0xeba   :  { %11771 = vmatpush3.bf16.msra.mxu1 %v12629_v21 }
 0xebb   :  { %11808 = vmatprep.subr.bf16.mxu1 %v12552_v0 }
 0xebd   :  { %10708 = vmatmul.mubr.f32.vlgmr.msra.gmra.mrb[6].mxu1 %v2721_v57  ;;  %v4421_v57 = vsub.f32 %v12999_v49, %v4420_v53 }
 0xebe   :  { %11810 = vmatpush3.bf16.msra.mxu1 %v12625_v10  ;;  %10784 = vmatprep.mubr.msk.f32.mxu1 %vm12553_vm0, %v12554_v4 }
 0xebf   :  { %11811 = vmatprep.subr.bf16.mxu1 %v12552_v0  ;;  %v4422_v61 = vand.u32 4294901760, %v4421_v57 }
 0xec2   :  { %11813 = vmatpush3.bf16.msra.mxu1 %v12629_v21 }
 0xec3   :  { %11814 = vmatprep.subr.bf16.mxu1 %v12552_v0 }
 0xf90   :  { %v3133_v62 = vpop.f32.mrb[6].mxu1 }
 0xf91   :  { %v12222_v63 = vadd.f32 %v12694_v36, %v3133_v62  ;;  %v10709_v1 = vpop.f32.mrb[7].mxu1 }
 0xf93   :  { %3145 = vrot.lane.b32.xlu0 %v12222_v63, %s12555_s18  ;;  %v3137_v3 = vadd.f32 %v12222_v63, %v9715_v2  ;;  %v13028_v63 = vsel %vm44_vm1, %v4211_v59, 0 }
 0xf95   :  { %v9716_v5 = vmul.f32 -1.442695, %v3137_v3  ;;  %v4212_v3 = vld [vmem:[#allocation3 + $0x8] sm:$0xff] }
 0xf97   :  { %12485 = vpow2.f32 %v9716_v5  ;;  %v4213_v5 = vld [vmem:[#allocation3 + $0x10] sm:$0xff] }
 0xfa1   :  { %v12486_v6 = vpop.eup %12485 }
 0xfa2   :  { %v3141_v7 = vadd.f32 1.0, %v12486_v6  ;;  %v13036_v6 = vsel %vm44_vm1, %v4212_v3, 0 }
 0xfa4   :  { %12487 = vrcp.f32 %v3141_v7  ;;  %v13039_v7 = vsel %vm44_vm1, %v4213_v5, 0 }
 0xfae   :  { %v12488_v8 = vpop.eup %12487 }
 0xfaf   :  { %v3155_v15 = vsub.f32 1.0, %v12488_v8  ;;  %v3161_v17 = vmul.f32 %v12488_v8, %v12903_v54  ;;  %v4427_v54 = vand.u32 4294901760, %v13001_v50 }
 0xfb1   :  { %v4428_v58 = vsub.f32 %v13001_v50, %v4427_v54 }
 0xfb3   :  { %v4429_v62 = vand.u32 4294901760, %v4428_v58 }
 0xfb5   :  { %v11856_v1 = vpack.c.bf16 %v4429_v62, %v4422_v61 }
0x1005   :  { %v3146_v9 = vpop.permute.xlu0 %3145 }
0x1006   :  { %v3148_v11 = vmul.f32 %v12488_v8, %v3146_v9  ;;  %v4214_v8 = vld [vmem:[#allocation3 + $0x18] sm:$0xff]  ;;  %v4215_v9 = vld [vmem:[#allocation3 + $0x20] sm:$0xff] }
0x1008   :  { %3150 = vrot.lane.b32.xlu1 %v3148_v11, %s12555_s18  ;;  %v13042_v11 = vand.u32 4294901760, %v13036_v6 }
0x107a   :  { %v3151_v12 = vpop.permute.xlu1 %3150 }
0x107b   :  { %v3153_v13 = vadd.f32 %v9715_v2, %v3151_v12  ;;  %v13032_v2 = vand.u32 4294901760, %v13028_v63  ;;  %v13045_v12 = vand.u32 4294901760, %v13039_v7 }
0x107d   :  { %12489 = vtanh.f32 %v3153_v13  ;;  %v13048_v13 = vsel %vm44_vm1, %v4214_v8, 0 }
0x1087   :  { %v12490_v14 = vpop.eup %12489 }
0x1088   :  { %3157 = vrot.lane.b32.xlu0 %v12490_v14, %s12556_s21  ;;  %v13052_v14 = vsel %vm44_vm1, %v4215_v9, 0 }
0x10fa   :  { %v3158_v16 = vpop.permute.xlu0 %3157 }
0x10fb   :  { %v3160_v18 = vmul.f32 %v3158_v16, %v3155_v15  ;;  %v13056_v16 = vand.u32 4294901760, %v13048_v13 }
0x10fd   :  { %v12953_v19 = vadd.f32 %v3161_v17, %v3160_v18  ;;  %v13059_v17 = vand.u32 4294901760, %v13052_v14 }
0x10ff   :  { %3164 = vrot.lane.b32.xlu1 %v12953_v19, %s12556_s21  ;;  %v13142_v8 = vsub.f32 %v13052_v14, %v13059_v17 }
0x1101   :  { %v4365_v14 = vand.u32 4294901760, %v13142_v8 }
0x1171   :  { %v3165_v38 = vpop.permute.xlu1 %3164 }
0x1172   :  { %3168 = vst.msk [vmem:[#allocation3 + $0x28] sm:$0xff] %vm44_vm1, %v3165_v38  ;;  %v3171_v39 = vsel %vm44_vm1, %v3165_v38, 0 }
0x1173   :  { %v3242_v40 = vand.u32 4294901760, %v3171_v39 }
0x1175   :  { %v3243_v41 = vsub.f32 %v3171_v39, %v3242_v40 }
0x1177   :  { %v3244_v42 = vand.u32 4294901760, %v3243_v41 }
0x1179   :  { %v3245_v43 = vsub.f32 %v3243_v41, %v3244_v42  ;;  %v4216_v15 = vld [vmem:[#allocation3 + $0x28] sm:$0xff] }
0x117a   :  { %v13062_v18 = vsel %vm44_vm1, %v4216_v15, 0 }
0x117b   :  { %v3246_v44 = vand.u32 4294901760, %v3245_v43  ;;  %v13067_v20 = vand.u32 4294901760, %v13062_v18 }
0x117d   :  { %10719 = vmatmul.mubr.f32.vlgmr.msra.gmra.mrb[6].mxu0 %v3246_v44  ;;  %v13152_v9 = vsub.f32 %v13062_v18, %v13067_v20 }
0x117e   :  { %11780 = vmatpush3.bf16.msra.mxu0 %v12633_v28  ;;  %10729 = vmatprep.mubr.msk.f32.mxu0 %vm12553_vm0, %v12554_v4 }
0x117f   :  { %11781 = vmatprep.subr.bf16.mxu0 %v12552_v0 }
0x1182   :  { %11783 = vmatpush3.bf16.msra.mxu0 %v12637_v29 }
0x1183   :  { %11784 = vmatprep.subr.bf16.mxu0 %v12552_v0 }
0x1185   :  { %10730 = vmatmul.mubr.f32.vlgmr.msra.gmra.mrb[6].mxu0 %v3242_v40 }
0x1186   :  { %11786 = vmatpush3.bf16.msra.mxu0 %v12645_v30  ;;  %10740 = vmatprep.mubr.msk.f32.mxu0 %vm12553_vm0, %v12554_v4 }
0x1187   :  { %11787 = vmatprep.subr.bf16.mxu0 %v12552_v0 }
0x118a   :  { %11789 = vmatpush3.bf16.msra.mxu0 %v12652_v31 }
0x118b   :  { %11790 = vmatprep.subr.bf16.mxu0 %v12552_v0 }
0x118d   :  { %10741 = vmatmul.mubr.f32.vlgmr.msra.gmra.mrb[6].mxu0 %v3243_v41 }
0x118e   :  { %11792 = vmatpush3.bf16.msra.mxu0 %v12625_v10  ;;  %10751 = vmatprep.mubr.msk.f32.mxu0 %vm12553_vm0, %v12554_v4 }
0x118f   :  { %11793 = vmatprep.subr.bf16.mxu0 %v12552_v0 }
0x1192   :  { %11795 = vmatpush3.bf16.msra.mxu0 %v12629_v21 }
0x1193   :  { %11796 = vmatprep.subr.bf16.mxu0 %v12552_v0 }
0x1195   :  { %10752 = vmatmul.mubr.f32.vlgmr.msra.gmra.mrb[6].mxu0 %v3244_v42 }
0x1196   :  { %11798 = vmatpush3.bf16.msra.mxu0 %v12665_v32  ;;  %10762 = vmatprep.mubr.msk.f32.mxu0 %vm12553_vm0, %v12554_v4 }
0x1197   :  { %11799 = vmatprep.subr.bf16.mxu0 %v12552_v0 }
0x119a   :  { %11801 = vmatpush3.bf16.msra.mxu0 %v12670_v33 }
0x119b   :  { %11802 = vmatprep.subr.bf16.mxu0 %v12552_v0 }
0x119d   :  { %10763 = vmatmul.mubr.f32.vlgmr.msra.gmra.mrb[6].mxu0 %v3242_v40 }
0x119e   :  { %11804 = vmatpush3.bf16.msra.mxu0 %v12625_v10  ;;  %10773 = vmatprep.mubr.msk.f32.mxu0 %vm12553_vm0, %v12554_v4 }
0x119f   :  { %11805 = vmatprep.subr.bf16.mxu0 %v12552_v0 }
0x11a2   :  { %11807 = vmatpush3.bf16.msra.mxu0 %v12629_v21 }
0x11a3   :  { %11853 = vmatprep.subr.bf16.mxu0 %v11852_v60 }
0x11a5   :  { %10774 = vmatmul.mubr.f32.vlgmr.msra.gmra.mrb[6].mxu0 %v3242_v40 }
0x11a6   :  { %11855 = vmatpush3.bf16.msra.mxu0 %v11852_v60  ;;  %10870 = vmatprep.mubr.f32.mxu0 %v13032_v2 }
0x11a7   :  { %11857 = vmatprep.subr.bf16.mxu0 %v11856_v1 }
0x11aa   :  { %11859 = vmatpush3.bf16.msra.mxu0 %v11856_v1 }
0x11ad   :  { %10871 = vmatmul.mubr.f32.vlgmr.msra.gmra.mrb[8].mxu0 %v13042_v11 }
0x11ae   :  { %10873 = vmatprep.mubr.f32.mxu0 %v13045_v12 }
0x11b1   :  { %10874 = vmatmul.mubr.f32.gmra.mrb[10].mxu0 %v13056_v16 }
0x11b2   :  { %10876 = vmatprep.mubr.f32.mxu0 %v13059_v17 }
0x11b5   :  { %10877 = vmatmul.mubr.f32.gmra.mrb[12].mxu0 %v13067_v20 }
0x1278   :  { %v3654_v22 = vpop.f32.mrb[6].mxu0 }
0x1279   :  { %v12223_v23 = vadd.f32 %v12694_v36, %v3654_v22  ;;  %v10775_v24 = vpop.f32.mrb[7].mxu0 }
0x127a   :  { %v4375_v24 = vand.u32 4294901760, %v13152_v9 }
0x127b   :  { %3666 = vrot.lane.b32.xlu0 %v12223_v23, %s12555_s18  ;;  %v3658_v26 = vadd.f32 %v12223_v23, %v9717_v25 }
0x127d   :  { %v9718_v34 = vmul.f32 -1.442695, %v3658_v26 }
0x127f   :  { %12491 = vpow2.f32 %v9718_v34 }
0x1289   :  { %v12492_v35 = vpop.eup %12491 }
0x128a   :  { %v3662_v38 = vadd.f32 1.0, %v12492_v35  ;;  %v4376_v35 = vsub.f32 %v13152_v9, %v4375_v24 }
0x128c   :  { %12493 = vrcp.f32 %v3662_v38 }
0x1296   :  { %v12494_v39 = vpop.eup %12493 }
0x1297   :  { %v3676_v44 = vsub.f32 1.0, %v12494_v39  ;;  %v3682_v52 = vmul.f32 %v12494_v39, %v12953_v19 }
0x12ed   :  { %v3667_v40 = vpop.permute.xlu0 %3666 }
0x12ee   :  { %v3669_v41 = vmul.f32 %v12494_v39, %v3667_v40  ;;  %v4377_v40 = vand.u32 4294901760, %v4376_v35 }
0x12f0   :  { %3671 = vrot.lane.b32.xlu1 %v3669_v41, %s12555_s18 }
0x1362   :  { %v3672_v42 = vpop.permute.xlu1 %3671 }
0x1363   :  { %v3674_v36 = vadd.f32 %v9717_v25, %v3672_v42  ;;  %v4366_v25 = vsub.f32 %v13142_v8, %v4365_v14 }
0x1365   :  { %12495 = vtanh.f32 %v3674_v36  ;;  %v4367_v38 = vand.u32 4294901760, %v4366_v25  ;;  %v12551_v36 = vld [vmem:[%s13730_s2] ss:$0 sm:$0xff]  ;;  %v5050_v25 = vld [vmem:[%s13733_s3 + $0x8] sm:$0xff] }
0x1366   :  { %v5065_v35 = vand.u32 4294901760, %v5050_v25 }
0x136f   :  { %v12496_v43 = vpop.eup %12495 }
0x1370   :  { %3678 = vrot.lane.b32.xlu0 %v12496_v43, %s12556_s21 }
0x13e2   :  { %v3679_v51 = vpop.permute.xlu0 %3678 }
0x13e3   :  { %v3681_v55 = vmul.f32 %v3679_v51, %v3676_v44 }
0x13e5   :  { %v13078_v56 = vadd.f32 %v3682_v52, %v3681_v55 }
0x13e7   :  { %3685 = vrot.lane.b32.xlu1 %v13078_v56, %s12556_s21 }
0x1459   :  { %v3686_v57 = vpop.permute.xlu1 %3685 }
0x145a   :  { %3689 = vst.msk [vmem:[#allocation3 + $0x30] sm:$0xff] %vm44_vm1, %v3686_v57  ;;  %v3692_v58 = vsel %vm44_vm1, %v3686_v57, 0 }
0x145b   :  { %v3763_v59 = vand.u32 4294901760, %v3692_v58 }
0x145d   :  { %v3764_v60 = vsub.f32 %v3692_v58, %v3763_v59 }
0x145f   :  { %v3765_v61 = vand.u32 4294901760, %v3764_v60 }
0x1461   :  { %v3766_v62 = vsub.f32 %v3764_v60, %v3765_v61  ;;  %v4217_v1 = vld [vmem:[#allocation3 + $0x30] sm:$0xff] }
0x1462   :  { %v4249_v3 = vsel %vm44_vm1, %v4217_v1, 0 }
0x1463   :  { %v3767_v5 = vand.u32 4294901760, %v3766_v62  ;;  %v13085_v19 = vand.u32 4294901760, %v4249_v3 }
0x1465   :  { %10785 = vmatmul.mubr.f32.vlgmr.msra.gmra.mrb[8].mxu1 %v3767_v5  ;;  %10879 = vmatprep.mubr.f32.mxu0 %v13085_v19  ;;  %v13159_v15 = vsub.f32 %v4249_v3, %v13085_v19 }
0x1466   :  { %11816 = vmatpush3.bf16.msra.mxu1 %v12633_v28  ;;  %10795 = vmatprep.mubr.msk.f32.mxu1 %vm12553_vm0, %v12554_v4  ;;  %v13112_v28 = vsub.f32 %v13028_v63, %v13032_v2 }
0x1467   :  { %11817 = vmatprep.subr.bf16.mxu1 %v12552_v0  ;;  %v4385_v26 = vand.u32 4294901760, %v13159_v15 }
0x1469   :  { %v4386_v39 = vsub.f32 %v13159_v15, %v4385_v26 }
0x146a   :  { %11819 = vmatpush3.bf16.msra.mxu1 %v12637_v29  ;;  %v4325_v29 = vand.u32 4294901760, %v13112_v28 }
0x146b   :  { %11820 = vmatprep.subr.bf16.mxu1 %v12552_v0  ;;  %v4387_v41 = vand.u32 4294901760, %v4386_v39 }
0x146d   :  { %10796 = vmatmul.mubr.f32.vlgmr.msra.gmra.mrb[8].mxu1 %v3763_v59 }
0x146e   :  { %11822 = vmatpush3.bf16.msra.mxu1 %v12645_v30  ;;  %10806 = vmatprep.mubr.msk.f32.mxu1 %vm12553_vm0, %v12554_v4  ;;  %v13122_v30 = vsub.f32 %v13036_v6, %v13042_v11 }
0x146f   :  { %11823 = vmatprep.subr.bf16.mxu1 %v12552_v0 }
0x1472   :  { %11825 = vmatpush3.bf16.msra.mxu1 %v12652_v31  ;;  %v4326_v31 = vsub.f32 %v13112_v28, %v4325_v29 }
0x1473   :  { %11826 = vmatprep.subr.bf16.mxu1 %v12552_v0 }
0x1474   :  { %v4327_v63 = vand.u32 4294901760, %v4326_v31 }
0x1475   :  { %10807 = vmatmul.mubr.f32.vlgmr.msra.gmra.mrb[8].mxu1 %v3764_v60  ;;  %v9719_v60 = vld [vmem:[%s13731_s0 + $0x38] sm:$0xff] }
0x1476   :  { %11828 = vmatpush3.bf16.msra.mxu1 %v12625_v10  ;;  %10817 = vmatprep.mubr.msk.f32.mxu1 %vm12553_vm0, %v12554_v4 }
0x1477   :  { %11829 = vmatprep.subr.bf16.mxu1 %v12552_v0 }
0x147a   :  { %11831 = vmatpush3.bf16.msra.mxu1 %v12629_v21 }
0x147b   :  { %11832 = vmatprep.subr.bf16.mxu1 %v12552_v0 }
0x147d   :  { %10818 = vmatmul.mubr.f32.vlgmr.msra.gmra.mrb[8].mxu1 %v3765_v61 }
0x147e   :  { %11834 = vmatpush3.bf16.msra.mxu1 %v12665_v32  ;;  %10828 = vmatprep.mubr.msk.f32.mxu1 %vm12553_vm0, %v12554_v4  ;;  %v13130_v32 = vsub.f32 %v13039_v7, %v13045_v12 }
0x147f   :  { %11835 = vmatprep.subr.bf16.mxu1 %v12552_v0 }
0x1480   :  { %v4345_v6 = vand.u32 4294901760, %v13130_v32 }
0x1482   :  { %11837 = vmatpush3.bf16.msra.mxu1 %v12670_v33  ;;  %v13137_v33 = vsub.f32 %v13048_v13, %v13056_v16  ;;  %v4346_v13 = vsub.f32 %v13130_v32, %v4345_v6 }
0x1483   :  { %11838 = vmatprep.subr.bf16.mxu1 %v12552_v0 }
0x1484   :  { %v4355_v7 = vand.u32 4294901760, %v13137_v33  ;;  %v4347_v18 = vand.u32 4294901760, %v4346_v13 }
0x1485   :  { %10829 = vmatmul.mubr.f32.vlgmr.msra.gmra.mrb[8].mxu1 %v3763_v59 }
0x1486   :  { %11840 = vmatpush3.bf16.msra.mxu1 %v12625_v10  ;;  %10839 = vmatprep.mubr.msk.f32.mxu1 %vm12553_vm0, %v12554_v4  ;;  %v4335_v10 = vand.u32 4294901760, %v13122_v30  ;;  %v4356_v23 = vsub.f32 %v13137_v33, %v4355_v7 }
0x1487   :  { %11841 = vmatprep.subr.bf16.mxu1 %v12552_v0 }
0x1488   :  { %v4357_v34 = vand.u32 4294901760, %v4356_v23  ;;  %v11860_v23 = vpack.c.bf16 %v12993_v46, %v12991_v45  ;;  %v11880_v45 = vpack.c.bf16 %v4427_v54, %v4420_v53  ;;  %v9721_v46 = vld [vmem:[%s13734_s6] ss:$0 sm:$0xff] }
0x148a   :  { %11843 = vmatpush3.bf16.msra.mxu1 %v12629_v21  ;;  %v4336_v21 = vsub.f32 %v13122_v30, %v4335_v10  ;;  %11861 = vmatprep.subr.bf16.mxu0 %v11860_v23 }
0x148b   :  { %11845 = vmatprep.subr.bf16.mxu1 %v12969_v27  ;;  %11863 = vmatpush3.bf16.msra.mxu0 %v11860_v23 }
0x148c   :  { %v4337_v22 = vand.u32 4294901760, %v4336_v21 }
0x148d   :  { %10840 = vmatmul.mubr.f32.vlgmr.msra.gmra.mrb[8].mxu1 %v3763_v59 }
0x148e   :  { %11847 = vmatpush3.bf16.msra.mxu1 %v12969_v27  ;;  %10850 = vmatprep.mubr.f32.mxu1 %v4327_v63 }
0x148f   :  { %11849 = vmatprep.subr.bf16.mxu1 %v12971_v37 }
0x1492   :  { %11851 = vmatpush3.bf16.msra.mxu1 %v12971_v37 }
0x1493   :  { %11892 = vmatprep.subr.bf16.mxu1 %v12552_v0 }
0x1495   :  { %10851 = vmatmul.mubr.f32.vlgmr.msra.gmra.mrb[10].mxu1 %v4337_v22 }
0x1496   :  { %10853 = vmatprep.mubr.f32.mxu1 %v4347_v18  ;;  %v5049_v18 = vld [vmem:[%s13733_s3] sm:$0xff] }
0x1499   :  { %10854 = vmatmul.mubr.f32.gmra.mrb[12].mxu1 %v4357_v34  ;;  %v5062_v34 = vand.u32 4294901760, %v5049_v18 }
0x149a   :  { %10856 = vmatprep.mubr.f32.mxu1 %v4367_v38 }
0x149b   :  { %v13206_v38 = vpack.c.bf16 %v5065_v35, %v5062_v34 }
0x149d   :  { %10857 = vmatmul.mubr.f32.gmra.mrb[14].mxu1 %v4377_v40 }
0x149e   :  { %10859 = vmatprep.mubr.f32.mxu1 %v4387_v41  ;;  %11894 = vmatpush3.bf16.msra.mxu1 %v13206_v38 }
0x149f   :  { %11895 = vmatprep.subr.bf16.mxu1 %v12552_v0 }
0x1560   :  { %v4175_v42 = vpop.f32.mrb[8].mxu1 }
0x1561   :  { %v12224_v43 = vadd.f32 %v12551_v36, %v4175_v42  ;;  %v10841_v44 = vpop.f32.mrb[9].mxu1  ;;  %v11864_v36 = vpack.c.bf16 %v13001_v50, %v12999_v49 }
0x1562   :  { %v5142_v44 = vsub.f32 %v5049_v18, %v5062_v34 }
0x1563   :  { %4187 = vrot.lane.b32.xlu0 %v12224_v43, %s12555_s18  ;;  %v4179_v61 = vadd.f32 %v12224_v43, %v9719_v60  ;;  %11865 = vmatprep.subr.bf16.mxu0 %v11864_v36 }
0x1564   :  { %11867 = vmatpush3.bf16.msra.mxu0 %v11864_v36 }
0x1565   :  { %v9720_v62 = vmul.f32 -1.442695, %v4179_v61  ;;  %11869 = vmatprep.subr.bf16.mxu0 %v12969_v27  ;;  %v5051_v61 = vld [vmem:[%s13733_s3 + $0x10] sm:$0xff] }
0x1567   :  { %12497 = vpow2.f32 %v9720_v62  ;;  %v5068_v62 = vand.u32 4294901760, %v5051_v61 }
0x1568   :  { %v13181_v51 = vpop.f32.mrb[10].mxu1 }
0x1569   :  { %v13183_v52 = vpop.f32.mrb[11].mxu1 }
0x156a   :  { %v4330_v49 = vadd.f32 %v9721_v46, %v13183_v52 }
0x156c   :  { %v13185_v55 = vpop.f32.mrb[12].mxu1 }
0x156d   :  { %v13187_v57 = vpop.f32.mrb[13].mxu1 }
0x1570   :  { %v13189_v58 = vpop.f32.mrb[14].mxu1 }
0x1571   :  { %v13191_v59 = vpop.f32.mrb[15].mxu1  ;;  %v12498_v1 = vpop.eup %12497 }
0x1572   :  { %v4183_v3 = vadd.f32 1.0, %v12498_v1 }
0x1574   :  { %12499 = vrcp.f32 %v4183_v3  ;;  %v5143_v3 = vand.u32 4294901760, %v5142_v44 }
0x157e   :  { %v12500_v5 = vpop.eup %12499 }
0x157f   :  { %v4197_v39 = vsub.f32 1.0, %v12500_v5  ;;  %v4203_v41 = vmul.f32 %v12500_v5, %v13078_v56  ;;  %v5052_v56 = vld [vmem:[%s13733_s3 + $0x18] sm:$0xff] }
0x1580   :  { %v5071_v1 = vand.u32 4294901760, %v5052_v56 }
0x15d5   :  { %v4188_v31 = vpop.permute.xlu0 %4187 }
0x15d6   :  { %v4190_v63 = vmul.f32 %v12500_v5, %v4188_v31  ;;  %v13221_v31 = vpack.c.bf16 %v5071_v1, %v5068_v62 }
0x15d8   :  { %4192 = vrot.lane.b32.xlu1 %v4190_v63, %s12555_s18  ;;  %v5144_v63 = vsub.f32 %v5142_v44, %v5143_v3  ;;  %11897 = vmatpush3.bf16.msra.mxu1 %v13221_v31 }
0x15d9   :  { %11898 = vmatprep.subr.bf16.mxu1 %v12552_v0 }
0x15da   :  { %v5145_v23 = vand.u32 4294901760, %v5144_v63 }
0x164a   :  { %v4193_v21 = vpop.permute.xlu1 %4192 }
0x164b   :  { %v4195_v13 = vadd.f32 %v9719_v60, %v4193_v21  ;;  %v5149_v60 = vsub.f32 %v5050_v25, %v5065_v35 }
0x164d   :  { %12501 = vtanh.f32 %v4195_v13  ;;  %v5150_v5 = vand.u32 4294901760, %v5149_v60  ;;  %v5156_v13 = vsub.f32 %v5051_v61, %v5068_v62 }
0x164f   :  { %v5151_v21 = vsub.f32 %v5149_v60, %v5150_v5  ;;  %v5157_v25 = vand.u32 4294901760, %v5156_v13 }
0x1651   :  { %v5152_v18 = vand.u32 4294901760, %v5151_v21 }
0x1653   :  { %v13225_v35 = vpack.c.bf16 %v5152_v18, %v5145_v23 }
0x1657   :  { %v12502_v22 = vpop.eup %12501 }
0x1658   :  { %4199 = vrot.lane.b32.xlu0 %v12502_v22, %s12556_s21  ;;  %v5163_v22 = vsub.f32 %v5052_v56, %v5071_v1  ;;  %v13233_v56 = vpack.c.bf16 %v5150_v5, %v5143_v3  ;;  %v11876_v5 = vpack.c.bf16 %v4413_v48, %v4406_v47  ;;  %v13352_v47 = vld [vmem:[%s13735_s4] ss:$0 sm:$0xff]  ;;  %v4340_v48 = vadd.f32 %v13181_v51, %v9721_v46 }
0x165a   :  { %v5164_v34 = vand.u32 4294901760, %v5163_v22  ;;  %v13231_v61 = vpack.c.bf16 %v5163_v22, %v5156_v13 }
0x165c   :  { %v13235_v62 = vpack.c.bf16 %v5164_v34, %v5157_v25 }
0x16ca   :  { %v4200_v40 = vpop.permute.xlu0 %4199 }
0x16cb   :  { %v4202_v42 = vmul.f32 %v4200_v40, %v4197_v39  ;;  %v5158_v39 = vsub.f32 %v5156_v13, %v5157_v25  ;;  %v5165_v40 = vsub.f32 %v5163_v22, %v5164_v34 }
0x16cd   :  { %v4204_v43 = vadd.f32 %v4203_v41, %v4202_v42  ;;  %v5159_v41 = vand.u32 4294901760, %v5158_v39  ;;  %v5166_v42 = vand.u32 4294901760, %v5165_v40 }
0x16cf   :  { %4206 = vrot.lane.b32.xlu1 %v4204_v43, %s12556_s21  ;;  %v13227_v36 = vpack.c.bf16 %v5166_v42, %v5159_v41  ;;  %v13229_v43 = vpack.c.bf16 %v5149_v60, %v5142_v44 }
0x1741   :  { %v4207_v1 = vpop.permute.xlu1 %4206 }
0x1742   :  { %4210 = vst.msk [vmem:[#allocation3 + $0x38] sm:$0xff] %vm44_vm1, %v4207_v1 }
0x1749   :  { %v4218_v63 = vld [vmem:[#allocation3 + $0x38] sm:$0xff] }
0x174a   :  { %v4252_v21 = vsel %vm44_vm1, %v4218_v63, 0 }
0x174b   :  { %v13239_v23 = vand.u32 4294901760, %v4252_v21 }
0x174d   :  { %10880 = vmatmul.mubr.f32.gmra.mrb[14].mxu0 %v13239_v23  ;;  %v4394_v18 = vsub.f32 %v4252_v21, %v13239_v23 }
0x174e   :  { %10890 = vmatprep.mubr.f32.mxu0 %v13112_v28 }
0x174f   :  { %v4395_v44 = vand.u32 4294901760, %v4394_v18 }
0x1751   :  { %10891 = vmatmul.mubr.f32.vlgmr.msra.gmra.mrb[8].mxu0 %v13122_v30  ;;  %v4396_v60 = vsub.f32 %v4394_v18, %v4395_v44 }
0x1752   :  { %10893 = vmatprep.mubr.f32.mxu0 %v13130_v32  ;;  %11871 = vmatpush3.bf16.msra.mxu0 %v12969_v27  ;;  %v4380_v32 = vadd.f32 %v13189_v58, %v9721_v46 }
0x1753   :  { %v4397_v3 = vand.u32 4294901760, %v4396_v60  ;;  %11873 = vmatprep.subr.bf16.mxu0 %v12971_v37 }
0x1755   :  { %10860 = vmatmul.mubr.f32.gmra.mrb[16].mxu1 %v4397_v3  ;;  %10894 = vmatmul.mubr.f32.gmra.mrb[10].mxu0 %v13137_v33 }
0x1756   :  { %10896 = vmatprep.mubr.f32.mxu0 %v13142_v8  ;;  %10970 = vmatprep.mubr.msk.f32.mxu1 %vm12553_vm0, %v12554_v4 }
0x1757   :  { %11875 = vmatpush3.bf16.msra.mxu0 %v12971_v37 }
0x1758   :  { %11877 = vmatprep.subr.bf16.mxu0 %v11876_v5 }
0x1759   :  { %10897 = vmatmul.mubr.f32.gmra.mrb[12].mxu0 %v13152_v9  ;;  %10971 = vmatmul.mubr.f32.vlgmr.msra.gmra.mrb[18].mxu1 %v12554_v4 }
0x175a   :  { %10899 = vmatprep.mubr.f32.mxu0 %v13159_v15  ;;  %11900 = vmatpush3.bf16.msra.mxu1 %v13225_v35 }
0x175b   :  { %11901 = vmatprep.subr.bf16.mxu1 %v12552_v0  ;;  %10981 = vmatprep.mubr.msk.f32.mxu1 %vm12553_vm0, %v12554_v4 }
0x175d   :  { %10900 = vmatmul.mubr.f32.gmra.mrb[14].mxu0 %v4394_v18 }
0x175e   :  { %10910 = vmatprep.mubr.f32.mxu0 %v4325_v29  ;;  %11903 = vmatpush3.bf16.msra.mxu1 %v13227_v36 }
0x175f   :  { %11904 = vmatprep.subr.bf16.mxu1 %v12552_v0 }
0x1761   :  { %10911 = vmatmul.mubr.f32.vlgmr.msra.gmra.mrb[8].mxu0 %v4335_v10  ;;  %10982 = vmatmul.mubr.f32.vlgmr.msra.gmra.mrb[18].mxu1 %v12554_v4  ;;  %v4370_v10 = vadd.f32 %v9721_v46, %v13191_v59 }
0x1762   :  { %10913 = vmatprep.mubr.f32.mxu0 %v4345_v6  ;;  %11906 = vmatpush3.bf16.msra.mxu1 %v13229_v43 }
0x1763   :  { %11907 = vmatprep.subr.bf16.mxu1 %v12552_v0  ;;  %10992 = vmatprep.mubr.msk.f32.mxu1 %vm12553_vm0, %v12554_v4 }
0x1764   :  { %11879 = vmatpush3.bf16.msra.mxu0 %v11876_v5 }
0x1765   :  { %10914 = vmatmul.mubr.f32.gmra.mrb[10].mxu0 %v4355_v7  ;;  %11881 = vmatprep.subr.bf16.mxu0 %v11880_v45 }
0x1766   :  { %10916 = vmatprep.mubr.f32.mxu0 %v4365_v14  ;;  %11909 = vmatpush3.bf16.msra.mxu1 %v13231_v61 }
0x1767   :  { %11910 = vmatprep.subr.bf16.mxu1 %v12552_v0 }
0x1768   :  { %11883 = vmatpush3.bf16.msra.mxu0 %v11880_v45 }
0x1769   :  { %10917 = vmatmul.mubr.f32.gmra.mrb[12].mxu0 %v4375_v24  ;;  %10993 = vmatmul.mubr.f32.vlgmr.msra.gmra.mrb[18].mxu1 %v12554_v4 }
0x176a   :  { %10919 = vmatprep.mubr.f32.mxu0 %v4385_v26  ;;  %11912 = vmatpush3.bf16.msra.mxu1 %v13206_v38 }
0x176b   :  { %11913 = vmatprep.subr.bf16.mxu1 %v12552_v0  ;;  %11003 = vmatprep.mubr.msk.f32.mxu1 %vm12553_vm0, %v12554_v4 }
0x176c   :  { %11885 = vmatprep.subr.bf16.mxu0 %v12969_v27 }
0x176d   :  { %10920 = vmatmul.mubr.f32.gmra.mrb[14].mxu0 %v4395_v44 }
0x176e   :  { %10930 = vmatprep.mubr.f32.mxu0 %v13032_v2  ;;  %11915 = vmatpush3.bf16.msra.mxu1 %v13221_v31 }
0x176f   :  { %11916 = vmatprep.subr.bf16.mxu1 %v12552_v0 }
0x1771   :  { %10931 = vmatmul.mubr.f32.vlgmr.msra.gmra.mrb[8].mxu0 %v13042_v11  ;;  %11004 = vmatmul.mubr.f32.vlgmr.msra.gmra.mrb[18].mxu1 %v12554_v4 }
0x1772   :  { %10933 = vmatprep.mubr.f32.mxu0 %v13045_v12  ;;  %11918 = vmatpush3.bf16.msra.mxu1 %v13233_v56 }
0x1773   :  { %11919 = vmatprep.subr.bf16.mxu1 %v12552_v0  ;;  %11014 = vmatprep.mubr.msk.f32.mxu1 %vm12553_vm0, %v12554_v4 }
0x1774   :  { %11887 = vmatpush3.bf16.msra.mxu0 %v12969_v27 }
0x1775   :  { %10934 = vmatmul.mubr.f32.gmra.mrb[10].mxu0 %v13056_v16  ;;  %11889 = vmatprep.subr.bf16.mxu0 %v12971_v37 }
0x1776   :  { %10936 = vmatprep.mubr.f32.mxu0 %v13059_v17  ;;  %11921 = vmatpush3.bf16.msra.mxu1 %v13235_v62 }
0x1777   :  { %11922 = vmatprep.subr.bf16.mxu1 %v12552_v0 }
0x1778   :  { %11891 = vmatpush3.bf16.msra.mxu0 %v12971_v37 }
0x1779   :  { %10937 = vmatmul.mubr.f32.gmra.mrb[12].mxu0 %v13067_v20  ;;  %11015 = vmatmul.mubr.f32.vlgmr.msra.gmra.mrb[18].mxu1 %v12554_v4 }
0x177a   :  { %10939 = vmatprep.mubr.f32.mxu0 %v13085_v19  ;;  %11924 = vmatpush3.bf16.msra.mxu1 %v13206_v38 }
0x177b   :  { %11925 = vmatprep.subr.bf16.mxu1 %v12552_v0  ;;  %11025 = vmatprep.mubr.msk.f32.mxu1 %vm12553_vm0, %v12554_v4 }
0x177c   :  { %11964 = vmatprep.subr.bf16.mxu0 %v12552_v0 }
0x177d   :  { %10940 = vmatmul.mubr.f32.gmra.mrb[14].mxu0 %v13239_v23 }
0x177e   :  { %10950 = vmatprep.mubr.f32.mxu0 %v13032_v2  ;;  %11927 = vmatpush3.bf16.msra.mxu1 %v13221_v31 }
0x177f   :  { %11928 = vmatprep.subr.bf16.mxu1 %v12552_v0 }
0x1781   :  { %10951 = vmatmul.mubr.f32.vlgmr.msra.gmra.mrb[8].mxu0 %v13042_v11  ;;  %11026 = vmatmul.mubr.f32.vlgmr.msra.gmra.mrb[18].mxu1 %v12554_v4 }
0x1782   :  { %10953 = vmatprep.mubr.f32.mxu0 %v13045_v12  ;;  %11930 = vmatpush3.bf16.msra.mxu1 %v13206_v38 }
0x1783   :  { %11931 = vmatprep.subr.bf16.mxu1 %v12552_v0  ;;  %11036 = vmatprep.mubr.msk.f32.mxu1 %vm12553_vm0, %v12554_v4 }
0x1784   :  { %11966 = vmatpush3.bf16.msra.mxu0 %v13206_v38 }
0x1785   :  { %10954 = vmatmul.mubr.f32.gmra.mrb[10].mxu0 %v13056_v16  ;;  %11967 = vmatprep.subr.bf16.mxu0 %v12552_v0 }
0x1786   :  { %10956 = vmatprep.mubr.f32.mxu0 %v13059_v17  ;;  %11933 = vmatpush3.bf16.msra.mxu1 %v13221_v31  ;;  %v4360_v17 = vadd.f32 %v13185_v55, %v9721_v46 }
0x1787   :  { %11934 = vmatprep.subr.bf16.mxu1 %v12552_v0 }
0x1788   :  { %11969 = vmatpush3.bf16.msra.mxu0 %v13221_v31 }
0x1789   :  { %10957 = vmatmul.mubr.f32.gmra.mrb[12].mxu0 %v13067_v20  ;;  %11970 = vmatprep.subr.bf16.mxu0 %v12552_v0  ;;  %v4350_v20 = vadd.f32 %v9721_v46, %v13187_v57 }
0x178a   :  { %10959 = vmatprep.mubr.f32.mxu0 %v13085_v19 }
0x178d   :  { %10960 = vmatmul.mubr.f32.gmra.mrb[14].mxu0 %v13239_v23 }
0x178e   :  { %11102 = vmatprep.mubr.msk.f32.mxu0 %vm12553_vm0, %v12554_v4 }
0x1828   :  { %v10861_v27 = vpop.f32.mrb[16].mxu1 }
0x1829   :  { %v4389_v37 = vpop.f32.mrb[17].mxu1  ;;  %v4400_v9 = vadd.f32 %v10861_v27, %v9721_v46 }
0x182a   :  { %v4390_v14 = vadd.f32 %v9721_v46, %v4389_v37 }
0x1854   :  { %v10952_v50 = vpop.f32.mrb[8].mxu0  ;;  %v5542_v53 = vpop.f32.mrb[18].mxu1 }
0x1855   :  { %v12226_v54 = vadd.f32 %v10952_v50, %v4340_v48  ;;  %v12241_v2 = vadd.f32 %v13352_v47, %v5542_v53  ;;  %v4994_v11 = vpop.f32.mrb[9].mxu0  ;;  %v11027_v12 = vpop.f32.mrb[19].mxu1 }
0x1856   :  { %v12228_v16 = vadd.f32 %v4994_v11, %v4330_v49 }
0x1857   :  { %5042 = vst.msk [vmem:[#allocation2 + $0x8] sm:$0xff] %vm5040_vm2, %v12226_v54  ;;  %5554 = vrot.lane.b32.xlu0 %v12241_v2, %s12555_s18 }
0x1858   :  { %5041 = vst.msk [vmem:[#allocation2] sm:$0xff] %vm5040_vm2, %v12228_v16  ;;  %v10955_v19 = vpop.f32.mrb[10].mxu0 }
0x1859   :  { %v12230_v28 = vadd.f32 %v10955_v19, %v4360_v17  ;;  %v5006_v29 = vpop.f32.mrb[11].mxu0 }
0x185a   :  { %v12232_v30 = vadd.f32 %v5006_v29, %v4350_v20 }
0x185b   :  { %5044 = vst.msk [vmem:[#allocation2 + $0x18] sm:$0xff] %vm5040_vm2, %v12230_v28 }
0x185c   :  { %5043 = vst.msk [vmem:[#allocation2 + $0x10] sm:$0xff] %vm5040_vm2, %v12232_v30  ;;  %v10958_v33 = vpop.f32.mrb[12].mxu0 }
0x185d   :  { %v12234_v6 = vadd.f32 %v10958_v33, %v4380_v32  ;;  %v5018_v8 = vpop.f32.mrb[13].mxu0 }
0x185e   :  { %v12236_v7 = vadd.f32 %v5018_v8, %v4370_v10  ;;  %v5573_v48 = vld [vmem:[#allocation2 + $0x8] sm:$0xff] }
0x185f   :  { %5046 = vst.msk [vmem:[#allocation2 + $0x28] sm:$0xff] %vm5040_vm2, %v12234_v6  ;;  %v5060_v52 = vld [vmem:[#allocation2] sm:$0xff] }
0x1860   :  { %5045 = vst.msk [vmem:[#allocation2 + $0x20] sm:$0xff] %vm5040_vm2, %v12236_v7  ;;  %v10961_v15 = vpop.f32.mrb[14].mxu0  ;;  %v5546_v55 = vadd.f32 %v12241_v2, %v5060_v52 }
0x1861   :  { %v12238_v24 = vadd.f32 %v10961_v15, %v4400_v9  ;;  %v5030_v26 = vpop.f32.mrb[15].mxu0 }
0x1862   :  { %v12240_v51 = vadd.f32 %v5030_v26, %v4390_v14  ;;  %v9723_v57 = vmul.f32 -1.442695, %v5546_v55 }
0x1863   :  { %5048 = vst.msk [vmem:[#allocation2 + $0x38] sm:$0xff] %vm5040_vm2, %v12238_v24 }
0x1864   :  { %5047 = vst.msk [vmem:[#allocation2 + $0x30] sm:$0xff] %vm5040_vm2, %v12240_v51  ;;  %12503 = vpow2.f32 %v9723_v57  ;;  %v6091_v51 = vld [vmem:[#allocation2 + $0x10] sm:$0xff] }
0x186e   :  { %v12504_v58 = vpop.eup %12503 }
0x186f   :  { %v5550_v59 = vadd.f32 1.0, %v12504_v58 }
0x1871   :  { %12505 = vrcp.f32 %v5550_v59 }
0x187b   :  { %v12506_v13 = vpop.eup %12505 }
0x187c   :  { %v5564_v41 = vsub.f32 1.0, %v12506_v13  ;;  %v5570_v1 = vmul.f32 0.0, %v12506_v13 }
0x18c9   :  { %v5555_v22 = vpop.permute.xlu0 %5554 }
0x18ca   :  { %v5557_v25 = vmul.f32 %v12506_v13, %v5555_v22 }
0x18cc   :  { %5559 = vrot.lane.b32.xlu1 %v5557_v25, %s12555_s18 }
0x193e   :  { %v5560_v34 = vpop.permute.xlu1 %5559 }
0x193f   :  { %v5562_v39 = vadd.f32 %v5560_v34, %v5060_v52 }
0x1941   :  { %12507 = vtanh.f32 %v5562_v39 }
0x194b   :  { %v12508_v40 = vpop.eup %12507 }
0x194c   :  { %5566 = vrot.lane.b32.xlu0 %v12508_v40, %s12556_s21 }
0x19be   :  { %v5567_v42 = vpop.permute.xlu0 %5566 }
0x19bf   :  { %v5569_v63 = vmul.f32 %v5567_v42, %v5564_v41 }
0x19c1   :  { %v13372_v21 = vadd.f32 %v5570_v1, %v5569_v63 }
0x19c3   :  { %5575 = vrot.lane.b32.xlu1 %v13372_v21, %s12556_s21 }
0x1a35   :  { %v5576_v23 = vpop.permute.xlu1 %5575 }
0x1a36   :  { %v5577_v18 = vsel %vm44_vm1, %v5576_v23, 0 }
0x1a37   :  { %v5648_v44 = vand.u32 4294901760, %v5577_v18 }
0x1a39   :  { %v5649_v60 = vsub.f32 %v5577_v18, %v5648_v44 }
0x1a3b   :  { %v5650_v3 = vand.u32 4294901760, %v5649_v60 }
0x1a3d   :  { %v5651_v5 = vsub.f32 %v5649_v60, %v5650_v3 }
0x1a3f   :  { %v5652_v45 = vand.u32 4294901760, %v5651_v5 }
0x1a41   :  { %11037 = vmatmul.mubr.f32.vlgmr.msra.gmra.mrb[20].mxu1 %v5652_v45 }
0x1a42   :  { %11936 = vmatpush3.bf16.msra.mxu1 %v13225_v35  ;;  %11047 = vmatprep.mubr.msk.f32.mxu1 %vm12553_vm0, %v12554_v4 }
0x1a43   :  { %11937 = vmatprep.subr.bf16.mxu1 %v12552_v0 }
0x1a46   :  { %11939 = vmatpush3.bf16.msra.mxu1 %v13227_v36 }
0x1a47   :  { %11940 = vmatprep.subr.bf16.mxu1 %v12552_v0 }
0x1a49   :  { %11048 = vmatmul.mubr.f32.vlgmr.msra.gmra.mrb[20].mxu1 %v5648_v44 }
0x1a4a   :  { %11942 = vmatpush3.bf16.msra.mxu1 %v13229_v43  ;;  %11058 = vmatprep.mubr.msk.f32.mxu1 %vm12553_vm0, %v12554_v4 }
0x1a4b   :  { %11943 = vmatprep.subr.bf16.mxu1 %v12552_v0 }
0x1a4e   :  { %11945 = vmatpush3.bf16.msra.mxu1 %v13231_v61 }
0x1a4f   :  { %11946 = vmatprep.subr.bf16.mxu1 %v12552_v0 }
0x1a51   :  { %11059 = vmatmul.mubr.f32.vlgmr.msra.gmra.mrb[20].mxu1 %v5649_v60 }
0x1a52   :  { %11948 = vmatpush3.bf16.msra.mxu1 %v13206_v38  ;;  %11069 = vmatprep.mubr.msk.f32.mxu1 %vm12553_vm0, %v12554_v4 }
0x1a53   :  { %11949 = vmatprep.subr.bf16.mxu1 %v12552_v0 }
0x1a56   :  { %11951 = vmatpush3.bf16.msra.mxu1 %v13221_v31 }
0x1a57   :  { %11952 = vmatprep.subr.bf16.mxu1 %v12552_v0 }
0x1a59   :  { %11070 = vmatmul.mubr.f32.vlgmr.msra.gmra.mrb[20].mxu1 %v5650_v3 }
0x1a5a   :  { %11954 = vmatpush3.bf16.msra.mxu1 %v13233_v56  ;;  %11080 = vmatprep.mubr.msk.f32.mxu1 %vm12553_vm0, %v12554_v4 }
0x1a5b   :  { %11955 = vmatprep.subr.bf16.mxu1 %v12552_v0 }
0x1a5e   :  { %11957 = vmatpush3.bf16.msra.mxu1 %v13235_v62 }
0x1a5f   :  { %11958 = vmatprep.subr.bf16.mxu1 %v12552_v0 }
0x1a61   :  { %11081 = vmatmul.mubr.f32.vlgmr.msra.gmra.mrb[20].mxu1 %v5648_v44 }
0x1a62   :  { %11960 = vmatpush3.bf16.msra.mxu1 %v13206_v38  ;;  %11091 = vmatprep.mubr.msk.f32.mxu1 %vm12553_vm0, %v12554_v4 }
0x1a63   :  { %11961 = vmatprep.subr.bf16.mxu1 %v12552_v0 }
0x1a66   :  { %11963 = vmatpush3.bf16.msra.mxu1 %v13221_v31 }
0x1a67   :  { %12000 = vmatprep.subr.bf16.mxu1 %v12552_v0 }
0x1a69   :  { %11092 = vmatmul.mubr.f32.vlgmr.msra.gmra.mrb[20].mxu1 %v5648_v44 }
0x1a6a   :  { %12002 = vmatpush3.bf16.msra.mxu1 %v13206_v38  ;;  %11168 = vmatprep.mubr.msk.f32.mxu1 %vm12553_vm0, %v12554_v4 }
0x1a6b   :  { %12003 = vmatprep.subr.bf16.mxu1 %v12552_v0 }
0x1a6e   :  { %12005 = vmatpush3.bf16.msra.mxu1 %v13221_v31 }
0x1a6f   :  { %12006 = vmatprep.subr.bf16.mxu1 %v12552_v0 }
0x1b3c   :  { %v6060_v27 = vpop.f32.mrb[20].mxu1 }
0x1b3d   :  { %v12242_v37 = vadd.f32 %v13352_v47, %v6060_v27  ;;  %v11093_v46 = vpop.f32.mrb[21].mxu1 }
0x1b3e   :  { %v6609_v46 = vld [vmem:[#allocation2 + $0x18] sm:$0xff] }
0x1b3f   :  { %6072 = vrot.lane.b32.xlu0 %v12242_v37, %s12555_s18  ;;  %v6064_v49 = vadd.f32 %v12242_v37, %v5573_v48 }
0x1b41   :  { %v9724_v50 = vmul.f32 -1.442695, %v6064_v49 }
0x1b43   :  { %12509 = vpow2.f32 %v9724_v50 }
0x1b4d   :  { %v12510_v53 = vpop.eup %12509 }
0x1b4e   :  { %v6068_v54 = vadd.f32 1.0, %v12510_v53 }
0x1b50   :  { %12511 = vrcp.f32 %v6068_v54 }
0x1b5a   :  { %v12512_v2 = vpop.eup %12511 }
0x1b5b   :  { %v6082_v19 = vsub.f32 1.0, %v12512_v2  ;;  %v6088_v29 = vmul.f32 %v12512_v2, %v13372_v21 }
0x1bb1   :  { %v6073_v11 = vpop.permute.xlu0 %6072 }
0x1bb2   :  { %v6075_v12 = vmul.f32 %v12512_v2, %v6073_v11 }
0x1bb4   :  { %6077 = vrot.lane.b32.xlu1 %v6075_v12, %s12555_s18 }
0x1c26   :  { %v6078_v16 = vpop.permute.xlu1 %6077 }
0x1c27   :  { %v6080_v17 = vadd.f32 %v6078_v16, %v5573_v48 }
0x1c29   :  { %12513 = vtanh.f32 %v6080_v17 }
0x1c33   :  { %v12514_v20 = vpop.eup %12513 }
0x1c34   :  { %6084 = vrot.lane.b32.xlu0 %v12514_v20, %s12556_s21 }
0x1ca6   :  { %v6085_v28 = vpop.permute.xlu0 %6084 }
0x1ca7   :  { %v6087_v30 = vmul.f32 %v6085_v28, %v6082_v19 }
0x1ca9   :  { %v13418_v32 = vadd.f32 %v6088_v29, %v6087_v30 }
0x1cab   :  { %6093 = vrot.lane.b32.xlu1 %v13418_v32, %s12556_s21 }
0x1d1d   :  { %v6094_v10 = vpop.permute.xlu1 %6093 }
0x1d1e   :  { %v6095_v33 = vsel %vm44_vm1, %v6094_v10, 0 }
0x1d1f   :  { %v6166_v6 = vand.u32 4294901760, %v6095_v33 }
0x1d21   :  { %v6167_v8 = vsub.f32 %v6095_v33, %v6166_v6 }
0x1d23   :  { %v6168_v7 = vand.u32 4294901760, %v6167_v8 }
0x1d25   :  { %v6169_v9 = vsub.f32 %v6167_v8, %v6168_v7 }
0x1d27   :  { %v6170_v14 = vand.u32 4294901760, %v6169_v9 }
0x1d29   :  { %11103 = vmatmul.mubr.f32.vlgmr.msra.gmra.mrb[16].mxu0 %v6170_v14 }
0x1d2a   :  { %11972 = vmatpush3.bf16.msra.mxu0 %v13225_v35  ;;  %11113 = vmatprep.mubr.msk.f32.mxu0 %vm12553_vm0, %v12554_v4 }
0x1d2b   :  { %11973 = vmatprep.subr.bf16.mxu0 %v12552_v0 }
0x1d2e   :  { %11975 = vmatpush3.bf16.msra.mxu0 %v13227_v36 }
0x1d2f   :  { %11976 = vmatprep.subr.bf16.mxu0 %v12552_v0 }
0x1d31   :  { %11114 = vmatmul.mubr.f32.vlgmr.msra.gmra.mrb[16].mxu0 %v6166_v6 }
0x1d32   :  { %11978 = vmatpush3.bf16.msra.mxu0 %v13229_v43  ;;  %11124 = vmatprep.mubr.msk.f32.mxu0 %vm12553_vm0, %v12554_v4 }
0x1d33   :  { %11979 = vmatprep.subr.bf16.mxu0 %v12552_v0 }
0x1d36   :  { %11981 = vmatpush3.bf16.msra.mxu0 %v13231_v61 }
0x1d37   :  { %11982 = vmatprep.subr.bf16.mxu0 %v12552_v0 }
0x1d39   :  { %11125 = vmatmul.mubr.f32.vlgmr.msra.gmra.mrb[16].mxu0 %v6167_v8 }
0x1d3a   :  { %11984 = vmatpush3.bf16.msra.mxu0 %v13206_v38  ;;  %11135 = vmatprep.mubr.msk.f32.mxu0 %vm12553_vm0, %v12554_v4 }
0x1d3b   :  { %11985 = vmatprep.subr.bf16.mxu0 %v12552_v0 }
0x1d3e   :  { %11987 = vmatpush3.bf16.msra.mxu0 %v13221_v31 }
0x1d3f   :  { %11988 = vmatprep.subr.bf16.mxu0 %v12552_v0 }
0x1d41   :  { %11136 = vmatmul.mubr.f32.vlgmr.msra.gmra.mrb[16].mxu0 %v6168_v7 }
0x1d42   :  { %11990 = vmatpush3.bf16.msra.mxu0 %v13233_v56  ;;  %11146 = vmatprep.mubr.msk.f32.mxu0 %vm12553_vm0, %v12554_v4 }
0x1d43   :  { %11991 = vmatprep.subr.bf16.mxu0 %v12552_v0 }
0x1d46   :  { %11993 = vmatpush3.bf16.msra.mxu0 %v13235_v62 }
0x1d47   :  { %11994 = vmatprep.subr.bf16.mxu0 %v12552_v0 }
0x1d49   :  { %11147 = vmatmul.mubr.f32.vlgmr.msra.gmra.mrb[16].mxu0 %v6166_v6 }
0x1d4a   :  { %11996 = vmatpush3.bf16.msra.mxu0 %v13206_v38  ;;  %11157 = vmatprep.mubr.msk.f32.mxu0 %vm12553_vm0, %v12554_v4 }
0x1d4b   :  { %11997 = vmatprep.subr.bf16.mxu0 %v12552_v0 }
0x1d4e   :  { %11999 = vmatpush3.bf16.msra.mxu0 %v13221_v31 }
0x1d4f   :  { %12036 = vmatprep.subr.bf16.mxu0 %v12552_v0 }
0x1d51   :  { %11158 = vmatmul.mubr.f32.vlgmr.msra.gmra.mrb[16].mxu0 %v6166_v6 }
0x1d52   :  { %12038 = vmatpush3.bf16.msra.mxu0 %v13206_v38  ;;  %11234 = vmatprep.mubr.msk.f32.mxu0 %vm12553_vm0, %v12554_v4 }
0x1d53   :  { %12039 = vmatprep.subr.bf16.mxu0 %v12552_v0 }
0x1d56   :  { %12041 = vmatpush3.bf16.msra.mxu0 %v13221_v31 }
0x1d57   :  { %12042 = vmatprep.subr.bf16.mxu0 %v12552_v0 }
0x1e24   :  { %v6578_v15 = vpop.f32.mrb[16].mxu0 }
0x1e25   :  { %v12243_v24 = vadd.f32 %v13352_v47, %v6578_v15  ;;  %v11159_v26 = vpop.f32.mrb[17].mxu0 }
0x1e26   :  { %v7127_v26 = vld [vmem:[#allocation2 + $0x20] sm:$0xff] }
0x1e27   :  { %6590 = vrot.lane.b32.xlu0 %v12243_v24, %s12555_s18  ;;  %v6582_v52 = vadd.f32 %v12243_v24, %v6091_v51 }
0x1e29   :  { %v9725_v55 = vmul.f32 -1.442695, %v6582_v52 }
0x1e2b   :  { %12515 = vpow2.f32 %v9725_v55 }
0x1e35   :  { %v12516_v57 = vpop.eup %12515 }
0x1e36   :  { %v6586_v58 = vadd.f32 1.0, %v12516_v57 }
0x1e38   :  { %12517 = vrcp.f32 %v6586_v58 }
0x1e42   :  { %v12518_v59 = vpop.eup %12517 }
0x1e43   :  { %v6600_v40 = vsub.f32 1.0, %v12518_v59  ;;  %v6606_v42 = vmul.f32 %v12518_v59, %v13418_v32 }
0x1e99   :  { %v6591_v13 = vpop.permute.xlu0 %6590 }
0x1e9a   :  { %v6593_v22 = vmul.f32 %v12518_v59, %v6591_v13 }
0x1e9c   :  { %6595 = vrot.lane.b32.xlu1 %v6593_v22, %s12555_s18 }
0x1f0e   :  { %v6596_v25 = vpop.permute.xlu1 %6595 }
0x1f0f   :  { %v6598_v34 = vadd.f32 %v6596_v25, %v6091_v51 }
0x1f11   :  { %12519 = vtanh.f32 %v6598_v34 }
0x1f1b   :  { %v12520_v39 = vpop.eup %12519 }
0x1f1c   :  { %6602 = vrot.lane.b32.xlu0 %v12520_v39, %s12556_s21 }
0x1f8e   :  { %v6603_v41 = vpop.permute.xlu0 %6602 }
0x1f8f   :  { %v6605_v1 = vmul.f32 %v6603_v41, %v6600_v40 }
0x1f91   :  { %v13464_v63 = vadd.f32 %v6606_v42, %v6605_v1 }
0x1f93   :  { %6611 = vrot.lane.b32.xlu1 %v13464_v63, %s12556_s21 }
0x2005   :  { %v6612_v21 = vpop.permute.xlu1 %6611 }
0x2006   :  { %v6613_v23 = vsel %vm44_vm1, %v6612_v21, 0 }
0x2007   :  { %v6684_v18 = vand.u32 4294901760, %v6613_v23 }
0x2009   :  { %v6685_v44 = vsub.f32 %v6613_v23, %v6684_v18 }
0x200b   :  { %v6686_v60 = vand.u32 4294901760, %v6685_v44 }
0x200d   :  { %v6687_v3 = vsub.f32 %v6685_v44, %v6686_v60 }
0x200f   :  { %v6688_v5 = vand.u32 4294901760, %v6687_v3 }
0x2011   :  { %11169 = vmatmul.mubr.f32.vlgmr.msra.gmra.mrb[22].mxu1 %v6688_v5 }
0x2012   :  { %12008 = vmatpush3.bf16.msra.mxu1 %v13225_v35  ;;  %11179 = vmatprep.mubr.msk.f32.mxu1 %vm12553_vm0, %v12554_v4 }
0x2013   :  { %12009 = vmatprep.subr.bf16.mxu1 %v12552_v0 }
0x2016   :  { %12011 = vmatpush3.bf16.msra.mxu1 %v13227_v36 }
0x2017   :  { %12012 = vmatprep.subr.bf16.mxu1 %v12552_v0 }
0x2019   :  { %11180 = vmatmul.mubr.f32.vlgmr.msra.gmra.mrb[22].mxu1 %v6684_v18 }
0x201a   :  { %12014 = vmatpush3.bf16.msra.mxu1 %v13229_v43  ;;  %11190 = vmatprep.mubr.msk.f32.mxu1 %vm12553_vm0, %v12554_v4 }
0x201b   :  { %12015 = vmatprep.subr.bf16.mxu1 %v12552_v0 }
0x201e   :  { %12017 = vmatpush3.bf16.msra.mxu1 %v13231_v61 }
0x201f   :  { %12018 = vmatprep.subr.bf16.mxu1 %v12552_v0 }
0x2021   :  { %11191 = vmatmul.mubr.f32.vlgmr.msra.gmra.mrb[22].mxu1 %v6685_v44 }
0x2022   :  { %12020 = vmatpush3.bf16.msra.mxu1 %v13206_v38  ;;  %11201 = vmatprep.mubr.msk.f32.mxu1 %vm12553_vm0, %v12554_v4 }
0x2023   :  { %12021 = vmatprep.subr.bf16.mxu1 %v12552_v0 }
0x2026   :  { %12023 = vmatpush3.bf16.msra.mxu1 %v13221_v31 }
0x2027   :  { %12024 = vmatprep.subr.bf16.mxu1 %v12552_v0 }
0x2029   :  { %11202 = vmatmul.mubr.f32.vlgmr.msra.gmra.mrb[22].mxu1 %v6686_v60 }
0x202a   :  { %12026 = vmatpush3.bf16.msra.mxu1 %v13233_v56  ;;  %11212 = vmatprep.mubr.msk.f32.mxu1 %vm12553_vm0, %v12554_v4 }
0x202b   :  { %12027 = vmatprep.subr.bf16.mxu1 %v12552_v0 }
0x202e   :  { %12029 = vmatpush3.bf16.msra.mxu1 %v13235_v62 }
0x202f   :  { %12030 = vmatprep.subr.bf16.mxu1 %v12552_v0 }
0x2031   :  { %11213 = vmatmul.mubr.f32.vlgmr.msra.gmra.mrb[22].mxu1 %v6684_v18 }
0x2032   :  { %12032 = vmatpush3.bf16.msra.mxu1 %v13206_v38  ;;  %11223 = vmatprep.mubr.msk.f32.mxu1 %vm12553_vm0, %v12554_v4 }
0x2033   :  { %12033 = vmatprep.subr.bf16.mxu1 %v12552_v0 }
0x2036   :  { %12035 = vmatpush3.bf16.msra.mxu1 %v13221_v31 }
0x2037   :  { %12072 = vmatprep.subr.bf16.mxu1 %v12552_v0 }
0x2039   :  { %11224 = vmatmul.mubr.f32.vlgmr.msra.gmra.mrb[22].mxu1 %v6684_v18 }
0x203a   :  { %12074 = vmatpush3.bf16.msra.mxu1 %v13206_v38  ;;  %11300 = vmatprep.mubr.msk.f32.mxu1 %vm12553_vm0, %v12554_v4 }
0x203b   :  { %12075 = vmatprep.subr.bf16.mxu1 %v12552_v0 }
0x203e   :  { %12077 = vmatpush3.bf16.msra.mxu1 %v13221_v31 }
0x203f   :  { %12078 = vmatprep.subr.bf16.mxu1 %v12552_v0 }
0x210c   :  { %v7096_v45 = vpop.f32.mrb[22].mxu1 }
0x210d   :  { %v12244_v27 = vadd.f32 %v13352_v47, %v7096_v45  ;;  %v11225_v37 = vpop.f32.mrb[23].mxu1 }
0x210e   :  { %v7645_v37 = vld [vmem:[#allocation2 + $0x28] sm:$0xff] }
0x210f   :  { %7108 = vrot.lane.b32.xlu0 %v12244_v27, %s12555_s18  ;;  %v7100_v48 = vadd.f32 %v12244_v27, %v6609_v46 }
0x2111   :  { %v9726_v49 = vmul.f32 -1.442695, %v7100_v48 }
0x2113   :  { %12521 = vpow2.f32 %v9726_v49 }
0x211d   :  { %v12522_v50 = vpop.eup %12521 }
0x211e   :  { %v7104_v53 = vadd.f32 1.0, %v12522_v50 }
0x2120   :  { %12523 = vrcp.f32 %v7104_v53 }
0x212a   :  { %v12524_v54 = vpop.eup %12523 }
0x212b   :  { %v7118_v20 = vsub.f32 1.0, %v12524_v54  ;;  %v7124_v28 = vmul.f32 %v12524_v54, %v13464_v63 }
0x2181   :  { %v7109_v2 = vpop.permute.xlu0 %7108 }
0x2182   :  { %v7111_v11 = vmul.f32 %v12524_v54, %v7109_v2 }
0x2184   :  { %7113 = vrot.lane.b32.xlu1 %v7111_v11, %s12555_s18 }
0x21f6   :  { %v7114_v12 = vpop.permute.xlu1 %7113 }
0x21f7   :  { %v7116_v16 = vadd.f32 %v7114_v12, %v6609_v46 }
0x21f9   :  { %12525 = vtanh.f32 %v7116_v16 }
0x2203   :  { %v12526_v17 = vpop.eup %12525 }
0x2204   :  { %7120 = vrot.lane.b32.xlu0 %v12526_v17, %s12556_s21 }
0x2276   :  { %v7121_v19 = vpop.permute.xlu0 %7120 }
0x2277   :  { %v7123_v29 = vmul.f32 %v7121_v19, %v7118_v20 }
0x2279   :  { %v13510_v30 = vadd.f32 %v7124_v28, %v7123_v29 }
0x227b   :  { %7129 = vrot.lane.b32.xlu1 %v13510_v30, %s12556_s21 }
0x22ed   :  { %v7130_v32 = vpop.permute.xlu1 %7129 }
0x22ee   :  { %v7131_v10 = vsel %vm44_vm1, %v7130_v32, 0 }
0x22ef   :  { %v7202_v33 = vand.u32 4294901760, %v7131_v10 }
0x22f1   :  { %v7203_v6 = vsub.f32 %v7131_v10, %v7202_v33 }
0x22f3   :  { %v7204_v8 = vand.u32 4294901760, %v7203_v6 }
0x22f5   :  { %v7205_v7 = vsub.f32 %v7203_v6, %v7204_v8 }
0x22f7   :  { %v7206_v9 = vand.u32 4294901760, %v7205_v7 }
0x22f9   :  { %11235 = vmatmul.mubr.f32.vlgmr.msra.gmra.mrb[18].mxu0 %v7206_v9 }
0x22fa   :  { %12044 = vmatpush3.bf16.msra.mxu0 %v13225_v35  ;;  %11245 = vmatprep.mubr.msk.f32.mxu0 %vm12553_vm0, %v12554_v4 }
0x22fb   :  { %12045 = vmatprep.subr.bf16.mxu0 %v12552_v0 }
0x22fe   :  { %12047 = vmatpush3.bf16.msra.mxu0 %v13227_v36 }
0x22ff   :  { %12048 = vmatprep.subr.bf16.mxu0 %v12552_v0 }
0x2301   :  { %11246 = vmatmul.mubr.f32.vlgmr.msra.gmra.mrb[18].mxu0 %v7202_v33 }
0x2302   :  { %12050 = vmatpush3.bf16.msra.mxu0 %v13229_v43  ;;  %11256 = vmatprep.mubr.msk.f32.mxu0 %vm12553_vm0, %v12554_v4 }
0x2303   :  { %12051 = vmatprep.subr.bf16.mxu0 %v12552_v0 }
0x2306   :  { %12053 = vmatpush3.bf16.msra.mxu0 %v13231_v61 }
0x2307   :  { %12054 = vmatprep.subr.bf16.mxu0 %v12552_v0 }
0x2309   :  { %11257 = vmatmul.mubr.f32.vlgmr.msra.gmra.mrb[18].mxu0 %v7203_v6 }
0x230a   :  { %12056 = vmatpush3.bf16.msra.mxu0 %v13206_v38  ;;  %11267 = vmatprep.mubr.msk.f32.mxu0 %vm12553_vm0, %v12554_v4 }
0x230b   :  { %12057 = vmatprep.subr.bf16.mxu0 %v12552_v0 }
0x230e   :  { %12059 = vmatpush3.bf16.msra.mxu0 %v13221_v31 }
0x230f   :  { %12060 = vmatprep.subr.bf16.mxu0 %v12552_v0 }
0x2311   :  { %11268 = vmatmul.mubr.f32.vlgmr.msra.gmra.mrb[18].mxu0 %v7204_v8 }
0x2312   :  { %12062 = vmatpush3.bf16.msra.mxu0 %v13233_v56  ;;  %11278 = vmatprep.mubr.msk.f32.mxu0 %vm12553_vm0, %v12554_v4 }
0x2313   :  { %12063 = vmatprep.subr.bf16.mxu0 %v12552_v0 }
0x2316   :  { %12065 = vmatpush3.bf16.msra.mxu0 %v13235_v62 }
0x2317   :  { %12066 = vmatprep.subr.bf16.mxu0 %v12552_v0 }
0x2319   :  { %11279 = vmatmul.mubr.f32.vlgmr.msra.gmra.mrb[18].mxu0 %v7202_v33 }
0x231a   :  { %12068 = vmatpush3.bf16.msra.mxu0 %v13206_v38  ;;  %11289 = vmatprep.mubr.msk.f32.mxu0 %vm12553_vm0, %v12554_v4 }
0x231b   :  { %12069 = vmatprep.subr.bf16.mxu0 %v12552_v0 }
0x231e   :  { %12071 = vmatpush3.bf16.msra.mxu0 %v13221_v31 }
0x231f   :  { %12108 = vmatprep.subr.bf16.mxu0 %v12552_v0 }
0x2321   :  { %11290 = vmatmul.mubr.f32.vlgmr.msra.gmra.mrb[18].mxu0 %v7202_v33 }
0x2322   :  { %12110 = vmatpush3.bf16.msra.mxu0 %v13206_v38  ;;  %11366 = vmatprep.mubr.msk.f32.mxu0 %vm12553_vm0, %v12554_v4 }
0x2323   :  { %12111 = vmatprep.subr.bf16.mxu0 %v12552_v0 }
0x2326   :  { %12113 = vmatpush3.bf16.msra.mxu0 %v13221_v31 }
0x2327   :  { %12114 = vmatprep.subr.bf16.mxu0 %v12552_v0 }
0x23f4   :  { %v7614_v14 = vpop.f32.mrb[18].mxu0 }
0x23f5   :  { %v12245_v15 = vadd.f32 %v13352_v47, %v7614_v14  ;;  %v11291_v24 = vpop.f32.mrb[19].mxu0 }
0x23f6   :  { %v8163_v24 = vld [vmem:[#allocation2 + $0x30] sm:$0xff] }
0x23f7   :  { %7626 = vrot.lane.b32.xlu0 %v12245_v15, %s12555_s18  ;;  %v7618_v51 = vadd.f32 %v12245_v15, %v7127_v26 }
0x23f9   :  { %v9727_v52 = vmul.f32 -1.442695, %v7618_v51 }
0x23fb   :  { %12527 = vpow2.f32 %v9727_v52 }
0x2405   :  { %v12528_v55 = vpop.eup %12527 }
0x2406   :  { %v7622_v57 = vadd.f32 1.0, %v12528_v55 }
0x2408   :  { %12529 = vrcp.f32 %v7622_v57 }
0x2412   :  { %v12530_v58 = vpop.eup %12529 }
0x2413   :  { %v7636_v39 = vsub.f32 1.0, %v12530_v58  ;;  %v7642_v41 = vmul.f32 %v12530_v58, %v13510_v30 }
0x2469   :  { %v7627_v59 = vpop.permute.xlu0 %7626 }
0x246a   :  { %v7629_v13 = vmul.f32 %v12530_v58, %v7627_v59 }
0x246c   :  { %7631 = vrot.lane.b32.xlu1 %v7629_v13, %s12555_s18 }
0x24de   :  { %v7632_v22 = vpop.permute.xlu1 %7631 }
0x24df   :  { %v7634_v25 = vadd.f32 %v7632_v22, %v7127_v26 }
0x24e1   :  { %12531 = vtanh.f32 %v7634_v25 }
0x24eb   :  { %v12532_v34 = vpop.eup %12531 }
0x24ec   :  { %7638 = vrot.lane.b32.xlu0 %v12532_v34, %s12556_s21 }
0x255e   :  { %v7639_v40 = vpop.permute.xlu0 %7638 }
0x255f   :  { %v7641_v42 = vmul.f32 %v7639_v40, %v7636_v39 }
0x2561   :  { %v13556_v1 = vadd.f32 %v7642_v41, %v7641_v42 }
0x2563   :  { %7647 = vrot.lane.b32.xlu1 %v13556_v1, %s12556_s21 }
0x25d5   :  { %v7648_v63 = vpop.permute.xlu1 %7647 }
0x25d6   :  { %v7649_v21 = vsel %vm44_vm1, %v7648_v63, 0 }
0x25d7   :  { %v7720_v23 = vand.u32 4294901760, %v7649_v21 }
0x25d9   :  { %v7721_v18 = vsub.f32 %v7649_v21, %v7720_v23 }
0x25db   :  { %v7722_v44 = vand.u32 4294901760, %v7721_v18 }
0x25dd   :  { %v7723_v60 = vsub.f32 %v7721_v18, %v7722_v44 }
0x25df   :  { %v7724_v3 = vand.u32 4294901760, %v7723_v60 }
0x25e1   :  { %11301 = vmatmul.mubr.f32.vlgmr.msra.gmra.mrb[24].mxu1 %v7724_v3 }
0x25e2   :  { %12080 = vmatpush3.bf16.msra.mxu1 %v13225_v35  ;;  %11311 = vmatprep.mubr.msk.f32.mxu1 %vm12553_vm0, %v12554_v4 }
0x25e3   :  { %12081 = vmatprep.subr.bf16.mxu1 %v12552_v0 }
0x25e6   :  { %12083 = vmatpush3.bf16.msra.mxu1 %v13227_v36 }
0x25e7   :  { %12084 = vmatprep.subr.bf16.mxu1 %v12552_v0 }
0x25e9   :  { %11312 = vmatmul.mubr.f32.vlgmr.msra.gmra.mrb[24].mxu1 %v7720_v23 }
0x25ea   :  { %12086 = vmatpush3.bf16.msra.mxu1 %v13229_v43  ;;  %11322 = vmatprep.mubr.msk.f32.mxu1 %vm12553_vm0, %v12554_v4 }
0x25eb   :  { %12087 = vmatprep.subr.bf16.mxu1 %v12552_v0 }
0x25ee   :  { %12089 = vmatpush3.bf16.msra.mxu1 %v13231_v61 }
0x25ef   :  { %12090 = vmatprep.subr.bf16.mxu1 %v12552_v0 }
0x25f1   :  { %11323 = vmatmul.mubr.f32.vlgmr.msra.gmra.mrb[24].mxu1 %v7721_v18 }
0x25f2   :  { %12092 = vmatpush3.bf16.msra.mxu1 %v13206_v38  ;;  %11333 = vmatprep.mubr.msk.f32.mxu1 %vm12553_vm0, %v12554_v4 }
0x25f3   :  { %12093 = vmatprep.subr.bf16.mxu1 %v12552_v0 }
0x25f6   :  { %12095 = vmatpush3.bf16.msra.mxu1 %v13221_v31 }
0x25f7   :  { %12096 = vmatprep.subr.bf16.mxu1 %v12552_v0 }
0x25f9   :  { %11334 = vmatmul.mubr.f32.vlgmr.msra.gmra.mrb[24].mxu1 %v7722_v44 }
0x25fa   :  { %12098 = vmatpush3.bf16.msra.mxu1 %v13233_v56  ;;  %11344 = vmatprep.mubr.msk.f32.mxu1 %vm12553_vm0, %v12554_v4 }
0x25fb   :  { %12099 = vmatprep.subr.bf16.mxu1 %v12552_v0 }
0x25fe   :  { %12101 = vmatpush3.bf16.msra.mxu1 %v13235_v62 }
0x25ff   :  { %12102 = vmatprep.subr.bf16.mxu1 %v12552_v0 }
0x2601   :  { %11345 = vmatmul.mubr.f32.vlgmr.msra.gmra.mrb[24].mxu1 %v7720_v23 }
0x2602   :  { %12104 = vmatpush3.bf16.msra.mxu1 %v13206_v38  ;;  %11355 = vmatprep.mubr.msk.f32.mxu1 %vm12553_vm0, %v12554_v4 }
0x2603   :  { %12105 = vmatprep.subr.bf16.mxu1 %v12552_v0 }
0x2606   :  { %12107 = vmatpush3.bf16.msra.mxu1 %v13221_v31 }
0x2607   :  { %12144 = vmatprep.subr.bf16.mxu1 %v12552_v0 }
0x2609   :  { %11356 = vmatmul.mubr.f32.vlgmr.msra.gmra.mrb[24].mxu1 %v7720_v23 }
0x260a   :  { %12146 = vmatpush3.bf16.msra.mxu1 %v13206_v38  ;;  %11432 = vmatprep.mubr.msk.f32.mxu1 %vm12553_vm0, %v12554_v4 }
0x260b   :  { %12147 = vmatprep.subr.bf16.mxu1 %v12552_v0 }
0x260e   :  { %12149 = vmatpush3.bf16.msra.mxu1 %v13221_v31 }
0x260f   :  { %12150 = vmatprep.subr.bf16.mxu1 %v12552_v0 }
0x26dc   :  { %v8132_v5 = vpop.f32.mrb[24].mxu1 }
0x26dd   :  { %v12246_v45 = vadd.f32 %v13352_v47, %v8132_v5  ;;  %v11357_v27 = vpop.f32.mrb[25].mxu1 }
0x26df   :  { %8144 = vrot.lane.b32.xlu0 %v12246_v45, %s12555_s18  ;;  %v8136_v46 = vadd.f32 %v12246_v45, %v7645_v37 }
0x26e1   :  { %v9728_v48 = vmul.f32 -1.442695, %v8136_v46 }
0x26e3   :  { %12533 = vpow2.f32 %v9728_v48  ;;  %v9199_v48 = vld [vmem:[%s13736_s7 + $0x8] sm:$0xff] }
0x26ed   :  { %v12534_v49 = vpop.eup %12533 }
0x26ee   :  { %v8140_v50 = vadd.f32 1.0, %v12534_v49 }
0x26f0   :  { %12535 = vrcp.f32 %v8140_v50  ;;  %v9218_v50 = vand.u32 4294901760, %v9199_v48 }
0x26fa   :  { %v12536_v53 = vpop.eup %12535 }
0x26fb   :  { %v8154_v17 = vsub.f32 1.0, %v12536_v53  ;;  %v8160_v19 = vmul.f32 %v12536_v53, %v13556_v1 }
0x2751   :  { %v8145_v54 = vpop.permute.xlu0 %8144 }
0x2752   :  { %v8147_v2 = vmul.f32 %v12536_v53, %v8145_v54 }
0x2754   :  { %8149 = vrot.lane.b32.xlu1 %v8147_v2, %s12555_s18  ;;  %v9302_v2 = vsub.f32 %v9199_v48, %v9218_v50 }
0x27c6   :  { %v8150_v11 = vpop.permute.xlu1 %8149 }
0x27c7   :  { %v8152_v12 = vadd.f32 %v8150_v11, %v7645_v37  ;;  %v9200_v11 = vld [vmem:[%s13736_s7 + $0x10] sm:$0xff] }
0x27c9   :  { %12537 = vtanh.f32 %v8152_v12  ;;  %v9201_v12 = vld [vmem:[%s13736_s7 + $0x18] sm:$0xff] }
0x27d3   :  { %v12538_v16 = vpop.eup %12537 }
0x27d4   :  { %8156 = vrot.lane.b32.xlu0 %v12538_v16, %s12556_s21  ;;  %v9221_v16 = vand.u32 4294901760, %v9200_v11 }
0x2846   :  { %v8157_v20 = vpop.permute.xlu0 %8156 }
0x2847   :  { %v8159_v28 = vmul.f32 %v8157_v20, %v8154_v17  ;;  %v9224_v17 = vand.u32 4294901760, %v9201_v12 }
0x2849   :  { %v13602_v29 = vadd.f32 %v8160_v19, %v8159_v28  ;;  %v9303_v19 = vand.u32 4294901760, %v9302_v2 }
0x284b   :  { %8165 = vrot.lane.b32.xlu1 %v13602_v29, %s12556_s21 }
0x28bd   :  { %v8166_v30 = vpop.permute.xlu1 %8165 }
0x28be   :  { %v8167_v32 = vsel %vm44_vm1, %v8166_v30, 0  ;;  %v9309_v30 = vsub.f32 %v9200_v11, %v9221_v16 }
0x28bf   :  { %v8238_v10 = vand.u32 4294901760, %v8167_v32 }
0x28c1   :  { %v8239_v33 = vsub.f32 %v8167_v32, %v8238_v10  ;;  %v9316_v32 = vsub.f32 %v9201_v12, %v9224_v17 }
0x28c3   :  { %v8240_v6 = vand.u32 4294901760, %v8239_v33 }
0x28c5   :  { %v8241_v8 = vsub.f32 %v8239_v33, %v8240_v6 }
0x28c7   :  { %v8242_v7 = vand.u32 4294901760, %v8241_v8  ;;  %v9304_v8 = vsub.f32 %v9302_v2, %v9303_v19 }
0x28c9   :  { %11367 = vmatmul.mubr.f32.vlgmr.msra.gmra.mrb[20].mxu0 %v8242_v7 }
0x28ca   :  { %12116 = vmatpush3.bf16.msra.mxu0 %v13225_v35  ;;  %11377 = vmatprep.mubr.msk.f32.mxu0 %vm12553_vm0, %v12554_v4 }
0x28cb   :  { %12117 = vmatprep.subr.bf16.mxu0 %v12552_v0 }
0x28ce   :  { %12119 = vmatpush3.bf16.msra.mxu0 %v13227_v36 }
0x28cf   :  { %12120 = vmatprep.subr.bf16.mxu0 %v12552_v0 }
0x28d1   :  { %11378 = vmatmul.mubr.f32.vlgmr.msra.gmra.mrb[20].mxu0 %v8238_v10 }
0x28d2   :  { %12122 = vmatpush3.bf16.msra.mxu0 %v13229_v43  ;;  %11388 = vmatprep.mubr.msk.f32.mxu0 %vm12553_vm0, %v12554_v4 }
0x28d3   :  { %12123 = vmatprep.subr.bf16.mxu0 %v12552_v0 }
0x28d6   :  { %12125 = vmatpush3.bf16.msra.mxu0 %v13231_v61 }
0x28d7   :  { %12126 = vmatprep.subr.bf16.mxu0 %v12552_v0 }
0x28d9   :  { %11389 = vmatmul.mubr.f32.vlgmr.msra.gmra.mrb[20].mxu0 %v8239_v33 }
0x28da   :  { %12128 = vmatpush3.bf16.msra.mxu0 %v13206_v38  ;;  %11399 = vmatprep.mubr.msk.f32.mxu0 %vm12553_vm0, %v12554_v4 }
0x28db   :  { %12129 = vmatprep.subr.bf16.mxu0 %v12552_v0 }
0x28de   :  { %12131 = vmatpush3.bf16.msra.mxu0 %v13221_v31 }
0x28df   :  { %12132 = vmatprep.subr.bf16.mxu0 %v12552_v0 }
0x28e1   :  { %11400 = vmatmul.mubr.f32.vlgmr.msra.gmra.mrb[20].mxu0 %v8240_v6 }
0x28e2   :  { %12134 = vmatpush3.bf16.msra.mxu0 %v13233_v56  ;;  %11410 = vmatprep.mubr.msk.f32.mxu0 %vm12553_vm0, %v12554_v4 }
0x28e3   :  { %12135 = vmatprep.subr.bf16.mxu0 %v12552_v0 }
0x28e6   :  { %12137 = vmatpush3.bf16.msra.mxu0 %v13235_v62 }
0x28e7   :  { %12138 = vmatprep.subr.bf16.mxu0 %v12552_v0 }
0x28e9   :  { %11411 = vmatmul.mubr.f32.vlgmr.msra.gmra.mrb[20].mxu0 %v8238_v10 }
0x28ea   :  { %12140 = vmatpush3.bf16.msra.mxu0 %v13206_v38  ;;  %11421 = vmatprep.mubr.msk.f32.mxu0 %vm12553_vm0, %v12554_v4 }
0x28eb   :  { %12141 = vmatprep.subr.bf16.mxu0 %v12552_v0 }
0x28ee   :  { %12143 = vmatpush3.bf16.msra.mxu0 %v13221_v31 }
0x28ef   :  { %12180 = vmatprep.subr.bf16.mxu0 %v12552_v0 }
0x28f1   :  { %11422 = vmatmul.mubr.f32.vlgmr.msra.gmra.mrb[20].mxu0 %v8238_v10 }
0x28f2   :  { %11498 = vmatprep.mubr.msk.f32.mxu0 %vm12553_vm0, %v12554_v4 }
0x29c4   :  { %v8650_v9 = vpop.f32.mrb[20].mxu0 }
0x29c5   :  { %v12247_v14 = vadd.f32 %v13352_v47, %v8650_v9  ;;  %v11423_v15 = vpop.f32.mrb[21].mxu0 }
0x29c6   :  { %v9317_v15 = vand.u32 4294901760, %v9316_v32 }
0x29c7   :  { %8662 = vrot.lane.b32.xlu0 %v12247_v14, %s12555_s18  ;;  %v8654_v26 = vadd.f32 %v12247_v14, %v8163_v24  ;;  %v9310_v14 = vand.u32 4294901760, %v9309_v30 }
0x29c9   :  { %v9729_v51 = vmul.f32 -1.442695, %v8654_v26 }
0x29cb   :  { %12539 = vpow2.f32 %v9729_v51  ;;  %v9311_v51 = vsub.f32 %v9309_v30, %v9310_v14 }
0x29d5   :  { %v12540_v52 = vpop.eup %12539 }
0x29d6   :  { %v8658_v55 = vadd.f32 1.0, %v12540_v52  ;;  %v9318_v52 = vsub.f32 %v9316_v32, %v9317_v15 }
0x29d8   :  { %12541 = vrcp.f32 %v8658_v55 }
0x29e2   :  { %v12542_v57 = vpop.eup %12541 }
0x29e3   :  { %v8672_v34 = vsub.f32 1.0, %v12542_v57  ;;  %v8678_v40 = vmul.f32 %v12542_v57, %v13602_v29  ;;  %v12184_v29 = vpack.c.bf16 %v9224_v17, %v9221_v16 }
0x2a39   :  { %v8663_v58 = vpop.permute.xlu0 %8662 }
0x2a3a   :  { %v8665_v59 = vmul.f32 %v12542_v57, %v8663_v58  ;;  %v9312_v57 = vand.u32 4294901760, %v9311_v51  ;;  %v9319_v58 = vand.u32 4294901760, %v9318_v52 }
0x2a3c   :  { %8667 = vrot.lane.b32.xlu1 %v8665_v59, %s12555_s18  ;;  %v12190_v59 = vpack.c.bf16 %v9319_v58, %v9312_v57 }
0x2aae   :  { %v8668_v13 = vpop.permute.xlu1 %8667 }
0x2aaf   :  { %v8670_v22 = vadd.f32 %v8668_v13, %v8163_v24  ;;  %v9305_v24 = vand.u32 4294901760, %v9304_v8 }
0x2ab1   :  { %12543 = vtanh.f32 %v8670_v22  ;;  %v12196_v22 = vpack.c.bf16 %v9316_v32, %v9309_v30 }
0x2abb   :  { %v12544_v25 = vpop.eup %12543 }
0x2abc   :  { %8674 = vrot.lane.b32.xlu0 %v12544_v25, %s12556_s21 }
0x2b2e   :  { %v8675_v39 = vpop.permute.xlu0 %8674 }
0x2b2f   :  { %v8677_v41 = vmul.f32 %v8675_v39, %v8672_v34  ;;  %v12208_v34 = vpack.c.bf16 %v9317_v15, %v9310_v14 }
0x2b31   :  { %v13644_v42 = vadd.f32 %v8678_v40, %v8677_v41 }
0x2b33   :  { %8683 = vrot.lane.b32.xlu1 %v13644_v42, %s12556_s21 }
0x2ba5   :  { %v8684_v1 = vpop.permute.xlu1 %8683 }
0x2ba6   :  { %v8685_v63 = vsel %vm44_vm1, %v8684_v1, 0 }
0x2ba7   :  { %v8756_v21 = vand.u32 4294901760, %v8685_v63 }
0x2ba9   :  { %v8757_v23 = vsub.f32 %v8685_v63, %v8756_v21 }
0x2bab   :  { %v8758_v18 = vand.u32 4294901760, %v8757_v23 }
0x2bad   :  { %v8759_v44 = vsub.f32 %v8757_v23, %v8758_v18 }
0x2baf   :  { %v8760_v60 = vand.u32 4294901760, %v8759_v44 }
0x2bb1   :  { %11433 = vmatmul.mubr.f32.vlgmr.msra.gmra.mrb[26].mxu1 %v8760_v60 }
0x2bb2   :  { %12152 = vmatpush3.bf16.msra.mxu1 %v13225_v35  ;;  %11443 = vmatprep.mubr.msk.f32.mxu1 %vm12553_vm0, %v12554_v4 }
0x2bb3   :  { %12153 = vmatprep.subr.bf16.mxu1 %v12552_v0 }
0x2bb6   :  { %12155 = vmatpush3.bf16.msra.mxu1 %v13227_v36 }
0x2bb7   :  { %12156 = vmatprep.subr.bf16.mxu1 %v12552_v0 }
0x2bb9   :  { %11444 = vmatmul.mubr.f32.vlgmr.msra.gmra.mrb[26].mxu1 %v8756_v21 }
0x2bba   :  { %12158 = vmatpush3.bf16.msra.mxu1 %v13229_v43  ;;  %11454 = vmatprep.mubr.msk.f32.mxu1 %vm12553_vm0, %v12554_v4 }
0x2bbb   :  { %12159 = vmatprep.subr.bf16.mxu1 %v12552_v0 }
0x2bbe   :  { %12161 = vmatpush3.bf16.msra.mxu1 %v13231_v61  ;;  %v8681_v61 = vld [vmem:[#allocation2 + $0x38] sm:$0xff] }
0x2bbf   :  { %12162 = vmatprep.subr.bf16.mxu1 %v12552_v0 }
0x2bc1   :  { %11455 = vmatmul.mubr.f32.vlgmr.msra.gmra.mrb[26].mxu1 %v8757_v23  ;;  %v9731_v23 = vld [vmem:[%s13737_s8] ss:$0 sm:$0xff] }
0x2bc2   :  { %12164 = vmatpush3.bf16.msra.mxu1 %v13206_v38  ;;  %11465 = vmatprep.mubr.msk.f32.mxu1 %vm12553_vm0, %v12554_v4 }
0x2bc3   :  { %12165 = vmatprep.subr.bf16.mxu1 %v12552_v0 }
0x2bc6   :  { %12167 = vmatpush3.bf16.msra.mxu1 %v13221_v31 }
0x2bc7   :  { %12168 = vmatprep.subr.bf16.mxu1 %v12552_v0 }
0x2bc9   :  { %11466 = vmatmul.mubr.f32.vlgmr.msra.gmra.mrb[26].mxu1 %v8758_v18 }
0x2bca   :  { %12170 = vmatpush3.bf16.msra.mxu1 %v13233_v56  ;;  %11476 = vmatprep.mubr.msk.f32.mxu1 %vm12553_vm0, %v12554_v4 }
0x2bcb   :  { %12171 = vmatprep.subr.bf16.mxu1 %v12552_v0 }
0x2bce   :  { %12173 = vmatpush3.bf16.msra.mxu1 %v13235_v62 }
0x2bcf   :  { %12174 = vmatprep.subr.bf16.mxu1 %v12552_v0 }
0x2bd1   :  { %11477 = vmatmul.mubr.f32.vlgmr.msra.gmra.mrb[26].mxu1 %v8756_v21 }
0x2bd2   :  { %12176 = vmatpush3.bf16.msra.mxu1 %v13206_v38  ;;  %11487 = vmatprep.mubr.msk.f32.mxu1 %vm12553_vm0, %v12554_v4 }
0x2bd3   :  { %12177 = vmatprep.subr.bf16.mxu1 %v12552_v0 }
0x2bd6   :  { %12179 = vmatpush3.bf16.msra.mxu1 %v13221_v31 }
0x2bd9   :  { %11488 = vmatmul.mubr.f32.vlgmr.msra.gmra.mrb[26].mxu1 %v8756_v21 }
0x2cac   :  { %v9168_v35 = vpop.f32.mrb[26].mxu1 }
0x2cad   :  { %v12248_v36 = vadd.f32 %v13352_v47, %v9168_v35  ;;  %v11489_v43 = vpop.f32.mrb[27].mxu1  ;;  %v9198_v47 = vld [vmem:[%s13736_s7] sm:$0xff] }
0x2cae   :  { %v9215_v49 = vand.u32 4294901760, %v9198_v47 }
0x2caf   :  { %9180 = vrot.lane.b32.xlu0 %v12248_v36, %s12555_s18  ;;  %v9172_v56 = vadd.f32 %v12248_v36, %v8681_v61 }
0x2cb0   :  { %v13688_v53 = vpack.c.bf16 %v9218_v50, %v9215_v49  ;;  %v9295_v54 = vsub.f32 %v9198_v47, %v9215_v49 }
0x2cb1   :  { %v9730_v62 = vmul.f32 -1.442695, %v9172_v56 }
0x2cb2   :  { %12182 = vmatpush3.bf16.msra.mxu0 %v13688_v53  ;;  %v9296_v20 = vand.u32 4294901760, %v9295_v54  ;;  %v12193_v13 = vpack.c.bf16 %v9302_v2, %v9295_v54 }
0x2cb3   :  { %12545 = vpow2.f32 %v9730_v62  ;;  %12183 = vmatprep.subr.bf16.mxu0 %v12552_v0 }
0x2cb4   :  { %v9297_v10 = vsub.f32 %v9295_v54, %v9296_v20  ;;  %v12205_v25 = vpack.c.bf16 %v9303_v19, %v9296_v20 }
0x2cb6   :  { %12185 = vmatpush3.bf16.msra.mxu0 %v12184_v29  ;;  %v9298_v9 = vand.u32 4294901760, %v9297_v10 }
0x2cb7   :  { %12186 = vmatprep.subr.bf16.mxu0 %v12552_v0 }
0x2cb8   :  { %v12187_v55 = vpack.c.bf16 %v9305_v24, %v9298_v9 }
0x2cbd   :  { %v12546_v3 = vpop.eup %12545 }
0x2cbe   :  { %v9176_v38 = vadd.f32 1.0, %v12546_v3 }
0x2cc0   :  { %12547 = vrcp.f32 %v9176_v38 }
0x2cca   :  { %v12548_v5 = vpop.eup %12547 }
0x2ccb   :  { %v9190_v28 = vsub.f32 1.0, %v12548_v5  ;;  %v9196_v33 = vmul.f32 %v12548_v5, %v13644_v42 }
0x2d21   :  { %v9181_v45 = vpop.permute.xlu0 %9180 }
0x2d22   :  { %v9183_v27 = vmul.f32 %v12548_v5, %v9181_v45 }
0x2d24   :  { %9185 = vrot.lane.b32.xlu1 %v9183_v27, %s12555_s18 }
0x2d96   :  { %v9186_v31 = vpop.permute.xlu1 %9185 }
0x2d97   :  { %v9188_v37 = vadd.f32 %v9186_v31, %v8681_v61 }
0x2d99   :  { %12549 = vtanh.f32 %v9188_v37 }
0x2da3   :  { %v12550_v46 = vpop.eup %12549 }
0x2da4   :  { %9192 = vrot.lane.b32.xlu0 %v12550_v46, %s12556_s21 }
0x2e16   :  { %v9193_v6 = vpop.permute.xlu0 %9192 }
0x2e17   :  { %v9195_v7 = vmul.f32 %v9193_v6, %v9190_v28 }
0x2e19   :  { %v9197_v26 = vadd.f32 %v9196_v33, %v9195_v7 }
0x2e1b   :  { %9210 = vrot.lane.b32.xlu1 %v9197_v26, %s12556_s21 }
0x2e8d   :  { %v9211_v39 = vpop.permute.xlu1 %9210 }
0x2e8e   :  { %v9212_v40 = vsel %vm44_vm1, %v9211_v39, 0 }
0x2e8f   :  { %v9283_v41 = vand.u32 4294901760, %v9212_v40 }
0x2e91   :  { %v9284_v42 = vsub.f32 %v9212_v40, %v9283_v41 }
0x2e93   :  { %v9285_v1 = vand.u32 4294901760, %v9284_v42 }
0x2e95   :  { %v9286_v63 = vsub.f32 %v9284_v42, %v9285_v1 }
0x2e97   :  { %v9287_v21 = vand.u32 4294901760, %v9286_v63 }
0x2e99   :  { %11499 = vmatmul.mubr.f32.vlgmr.msra.gmra.mrb[22].mxu0 %v9287_v21 }
0x2e9a   :  { %12188 = vmatpush3.bf16.msra.mxu0 %v12187_v55  ;;  %11509 = vmatprep.mubr.msk.f32.mxu0 %vm12553_vm0, %v12554_v4 }
0x2e9b   :  { %12189 = vmatprep.subr.bf16.mxu0 %v12552_v0 }
0x2e9e   :  { %12191 = vmatpush3.bf16.msra.mxu0 %v12190_v59 }
0x2e9f   :  { %12192 = vmatprep.subr.bf16.mxu0 %v12552_v0 }
0x2ea1   :  { %11510 = vmatmul.mubr.f32.vlgmr.msra.gmra.mrb[22].mxu0 %v9283_v41 }
0x2ea2   :  { %12194 = vmatpush3.bf16.msra.mxu0 %v12193_v13  ;;  %11520 = vmatprep.mubr.msk.f32.mxu0 %vm12553_vm0, %v12554_v4 }
0x2ea3   :  { %12195 = vmatprep.subr.bf16.mxu0 %v12552_v0 }
0x2ea6   :  { %12197 = vmatpush3.bf16.msra.mxu0 %v12196_v22 }
0x2ea7   :  { %12198 = vmatprep.subr.bf16.mxu0 %v12552_v0 }
0x2ea9   :  { %11521 = vmatmul.mubr.f32.vlgmr.msra.gmra.mrb[22].mxu0 %v9284_v42 }
0x2eaa   :  { %12200 = vmatpush3.bf16.msra.mxu0 %v13688_v53  ;;  %11531 = vmatprep.mubr.msk.f32.mxu0 %vm12553_vm0, %v12554_v4 }
0x2eab   :  { %12201 = vmatprep.subr.bf16.mxu0 %v12552_v0 }
0x2eae   :  { %12203 = vmatpush3.bf16.msra.mxu0 %v12184_v29 }
0x2eaf   :  { %12204 = vmatprep.subr.bf16.mxu0 %v12552_v0 }
0x2eb1   :  { %11532 = vmatmul.mubr.f32.vlgmr.msra.gmra.mrb[22].mxu0 %v9285_v1 }
0x2eb2   :  { %12206 = vmatpush3.bf16.msra.mxu0 %v12205_v25  ;;  %11542 = vmatprep.mubr.msk.f32.mxu0 %vm12553_vm0, %v12554_v4 }
0x2eb3   :  { %12207 = vmatprep.subr.bf16.mxu0 %v12552_v0 }
0x2eb6   :  { %12209 = vmatpush3.bf16.msra.mxu0 %v12208_v34 }
0x2eb7   :  { %12210 = vmatprep.subr.bf16.mxu0 %v12552_v0 }
0x2eb9   :  { %11543 = vmatmul.mubr.f32.vlgmr.msra.gmra.mrb[22].mxu0 %v9283_v41 }
0x2eba   :  { %12212 = vmatpush3.bf16.msra.mxu0 %v13688_v53  ;;  %11553 = vmatprep.mubr.msk.f32.mxu0 %vm12553_vm0, %v12554_v4 }
0x2ebb   :  { %12213 = vmatprep.subr.bf16.mxu0 %v12552_v0 }
0x2ebe   :  { %12215 = vmatpush3.bf16.msra.mxu0 %v12184_v29 }
0x2ec1   :  { %11554 = vmatmul.mubr.f32.vlgmr.msra.gmra.mrb[22].mxu0 %v9283_v41 }
0x2f94   :  { %v9695_v18 = vpop.f32.mrb[22].mxu0 }
0x2f95   :  { %v12249_v44 = vadd.f32 %v9731_v23, %v9695_v18  ;;  %v11555_v60 = vpop.f32.mrb[23].mxu0 }
0x2f97   :  { %9700 = vst.msk [vmem:[%s13738_s9] sm:$0xff] %vm9699_vm3, %v12249_v44 }

</bundles_post_ra>
